<compile_context>
chip_gen: v7x
topology: tpu7x:2x2x1
jax: 0.10.0
libtpu: 0.0.40
codegen_flags: <defaults>
</compile_context>

<pallas_src>
import jax
import jax.numpy as jnp
from jax.experimental import pallas as pl
from jax.experimental.pallas import tpu as pltpu


CHANNELS = [128, 128, 64, 64]
KERNEL_SIZES = [17, 9, 5, 5]
IN_DIMS = [21, 128, 128, 64]
REDUCTION = 4
C_PAD = 128          # all hidden channel dims zero-padded to 128 lanes
HEAD_PAD = 128       # lane-dense head width (real output width is 2)
K1_COLS = 384        # layer-1 im2col contraction dim, padded from 17*21 = 357


# ---------------------------------------------------------------------------
# Fused kernel: whole SENet forward for Bt batch elements per grid step
# ---------------------------------------------------------------------------

def senet_fused_kernel(
    xp_ref, pool_ref,
    w1c_ref, b1_ref, s1w1_ref, s1b1_ref, s1w2_ref, s1b2_ref,
    w2c_ref, b2_ref, s2w1_ref, s2b1_ref, s2w2_ref, s2b2_ref,
    w3c_ref, b3_ref, s3w1_ref, s3b1_ref, s3w2_ref, s3b2_ref,
    w4c_ref, b4_ref, s4w1_ref, s4b1_ref, s4w2_ref, s4b2_ref,
    fcw_ref, fcb_ref,
    o_ref,
    pad2_ref, pad3_ref, pad4_ref,
):
    f32 = jnp.float32
    bf16 = jnp.bfloat16

    bt = pad2_ref.shape[0]            # samples per grid step (static)
    seq = xp_ref.shape[0] // bt       # layer-1 sequence length
    lo = pool_ref.shape[0] // bt      # length after AvgPool1d(5, 5)

    def se_scale(y, inv_len, w1, b1, w2, b2):
        # squeeze-and-excite on (bt, L, C): mean over L -> fc1 -> relu -> fc2
        # -> sigmoid -> per-(sample, channel) scale.  fc inputs cast to bf16,
        # elementwise math stays f32.
        m = jnp.sum(y, axis=1) * inv_len                                   # (bt, C)
        s = jnp.dot(m.astype(bf16), w1[...], preferred_element_type=f32) + b1[...]
        s = jnp.maximum(s, 0.0)
        s = jnp.dot(s.astype(bf16), w2[...], preferred_element_type=f32) + b2[...]
        s = jax.nn.sigmoid(s)
        return y * s[:, None, :]

    def conv_im2col(pad_ref, y, wcol, bias):
        # y: (bt, Lc, Cin) f32.  Zero only the border (padding) rows of the
        # per-sample padded scratch each step (interior is fully overwritten,
        # no cross-grid-step state -> safe under megacore grid sharding),
        # build the (bt*Lc, K*Cin) patch matrix from lane-aligned shifted
        # sublane slices, then one MXU matmul + bias + relu.
        n, lc, c_in = y.shape
        k_taps = wcol.shape[0] // c_in
        p = k_taps // 2
        border = jnp.zeros((n, p, c_in), f32)
        pad_ref[:, pl.ds(0, p), :] = border
        pad_ref[:, pl.ds(p + lc, p), :] = border
        pad_ref[:, pl.ds(p, lc), :] = y
        patches = jnp.concatenate(
            [pad_ref[:, pl.ds(k, lc), :] for k in range(k_taps)], axis=2)
        patches = patches.reshape(n * lc, k_taps * c_in).astype(bf16)
        out = jnp.dot(patches, wcol[...], preferred_element_type=f32) + bias[...]
        out = jnp.maximum(out, 0.0)
        return out.reshape(n, lc, wcol.shape[1])

    # ---------------- layer 1: one im2col matmul (patches built in wrapper) --
    y1 = jnp.dot(xp_ref[...], w1c_ref[...], preferred_element_type=f32) + b1_ref[...]
    y1 = jnp.maximum(y1, 0.0)                                              # (bt*seq, 128)
    y1 = se_scale(y1.reshape(bt, seq, -1), 1.0 / seq,
                  s1w1_ref, s1b1_ref, s1w2_ref, s1b2_ref)

    # ---------------- AvgPool1d(5,5): block-diagonal ones matmul, 1/5 after --
    p1 = jnp.dot(pool_ref[...], y1.reshape(bt * seq, -1).astype(bf16),
                 preferred_element_type=f32) * 0.2                         # (bt*lo, 128)
    p1 = p1.reshape(bt, lo, -1)

    # ---------------- layer 2 -------------------------------------------------
    y2 = conv_im2col(pad2_ref, p1, w2c_ref, b2_ref)
    y2 = se_scale(y2, 1.0 / lo, s2w1_ref, s2b1_ref, s2w2_ref, s2b2_ref)

    # ---------------- layer 3 (output channels zero-padded 64 -> 128) --------
    y3 = conv_im2col(pad3_ref, y2, w3c_ref, b3_ref)
    y3 = se_scale(y3, 1.0 / lo, s3w1_ref, s3b1_ref, s3w2_ref, s3b2_ref)

    # ---------------- layer 4 (padded channels -> single im2col matmul) ------
    y4 = conv_im2col(pad4_ref, y3, w4c_ref, b4_ref)
    y4 = se_scale(y4, 1.0 / lo, s4w1_ref, s4b1_ref, s4w2_ref, s4b2_ref)

    # ---------------- head: global avg pool + Linear (lane-padded to 128) ----
    m = jnp.sum(y4, axis=1) * (1.0 / lo)                                   # (bt, 128)
    out = jnp.dot(m.astype(bf16), fcw_ref[...], preferred_element_type=f32) + fcb_ref[...]
    o_ref[...] = out.astype(o_ref.dtype)                                   # (bt, 128)


# ---------------------------------------------------------------------------
# Wrapper (single pallas_call)
# ---------------------------------------------------------------------------

def _round_up(x, m):
    return -(-x // m) * m


def _const_spec(arr):
    """Full-array BlockSpec with a constant block index (DMA'd once, reused)."""
    nd = arr.ndim
    return pl.BlockSpec(arr.shape, lambda b, _nd=nd: (0,) * _nd)


@jax.jit
def senet_forward(x, params):
    """x: (B, L, 21) channels-last.  Returns logits matching PyTorch out.squeeze()."""
    B, L, c_in = x.shape
    k1 = KERNEL_SIZES[0]
    pad1 = k1 // 2
    lo = L // 5                        # AvgPool1d(5,5) floor truncation (like PyTorch)

    # ----- batch tiling: Bt samples per grid step (MXU M = Bt*L / Bt*lo) ------
    bt = min(32, _round_up(B, 8))
    b_pad = _round_up(B, bt)
    n_steps = b_pad // bt
    if n_steps > 1 and n_steps % 2 == 1:
        b_pad += bt                    # keep the grid even so v7x's 2 TCs both work
        n_steps += 1
    if b_pad != B:
        x = jnp.pad(x, ((0, b_pad - B), (0, 0), (0, 0)))

    # ----- layer-1 im2col patches (only XLA-side data prep), bf16, K 357->384 -
    # NOTE(v5e): at very large B the patch DMA (~30 KB/sample) could be rebuilt
    # in-kernel from the raw padded input to cut HBM traffic; kept here since it
    # is the cheaper choice on v6e/v7x and simpler.
    xpad = jnp.pad(x, ((0, 0), (pad1, pad1), (0, 0)))
    patches = jnp.concatenate([xpad[:, k:k + L, :] for k in range(k1)], axis=2)
    patches = jnp.pad(patches, ((0, 0), (0, 0), (0, K1_COLS - k1 * c_in)))
    patches = patches.reshape(b_pad * L, K1_COLS).astype(jnp.bfloat16)

    # ----- block-diagonal AvgPool1d(5,5) ones-matrix (1/5 applied in-kernel) ---
    pool_one = jnp.repeat(jnp.eye(lo, dtype=jnp.float32), 5, axis=1)       # (lo, 5*lo)
    if 5 * lo != L:
        pool_one = jnp.pad(pool_one, ((0, 0), (0, L - 5 * lo)))
    pool_mat = jnp.kron(jnp.eye(bt, dtype=jnp.float32), pool_one).astype(jnp.bfloat16)

    in_specs = [pl.BlockSpec((bt * L, K1_COLS), lambda b: (b, 0)),
                _const_spec(pool_mat)]
    in_specs += [_const_spec(w) for w in params]

    out = pl.pallas_call(
        senet_fused_kernel,
        out_shape=jax.ShapeDtypeStruct((b_pad, HEAD_PAD), jnp.float32),
        grid=(n_steps,),
        in_specs=in_specs,
        out_specs=pl.BlockSpec((bt, HEAD_PAD), lambda b: (b, 0)),
        scratch_shapes=[
            # per-sample zero-padded conv inputs for layers 2-4
            pltpu.VMEM((bt, lo + 2 * (KERNEL_SIZES[1] // 2), C_PAD), jnp.float32),
            pltpu.VMEM((bt, lo + 2 * (KERNEL_SIZES[2] // 2), C_PAD), jnp.float32),
            pltpu.VMEM((bt, lo + 2 * (KERNEL_SIZES[3] // 2), C_PAD), jnp.float32),
        ],
        compiler_params=pltpu.CompilerParams(
            dimension_semantics=("parallel",),
            vmem_limit_bytes=32 * 1024 * 1024),
    )(patches, pool_mat, *params)

    logits = out[:B, :2]               # drop batch padding + un-pad the head lanes
    return jnp.squeeze(logits)         # matches PyTorch out.squeeze()


# ---------------------------------------------------------------------------
# Deterministic parameter construction (xavier_uniform weights, zero biases),
# emitted directly in the padded im2col / bf16 kernel layout.
# ---------------------------------------------------------------------------

def xavier_uniform(key, shape, fan_in, fan_out):
    limit = (6.0 / (fan_in + fan_out)) ** 0.5
    return jax.random.uniform(key, shape, jnp.float32, -limit, limit)


def make_params(key):
    keys = jax.random.split(key, 16)
    ki = 0
    bf16 = jnp.bfloat16
    params = []
    for li, (cin, cout, k) in enumerate(zip(IN_DIMS, CHANNELS, KERNEL_SIZES)):
        cred = cout // REDUCTION
        conv_w = xavier_uniform(keys[ki], (k, cin, cout), cin * k, cout * k); ki += 1
        if li == 0:
            # layer 1: patch cols are [tap, real_cin], tail zero-padded to K1_COLS
            wcol = conv_w.reshape(k * cin, cout)
            wcol = jnp.pad(wcol, ((0, K1_COLS - k * cin), (0, C_PAD - cout)))
        else:
            # layers 2-4: per-tap input channels padded to C_PAD, outputs to C_PAD
            wp = jnp.zeros((k, C_PAD, C_PAD), jnp.float32)
            wp = wp.at[:, :cin, :cout].set(conv_w)
            wcol = wp.reshape(k * C_PAD, C_PAD)
        conv_b = jnp.zeros((1, C_PAD), jnp.float32)

        se_w1 = xavier_uniform(keys[ki], (cout, cred), cout, cred); ki += 1
        se_w1 = jnp.pad(se_w1, ((0, C_PAD - cout), (0, 0)))    # zero rows: padded chans
        se_b1 = jnp.zeros((1, cred), jnp.float32)
        se_w2 = xavier_uniform(keys[ki], (cred, cout), cred, cout); ki += 1
        se_w2 = jnp.pad(se_w2, ((0, 0), (0, C_PAD - cout)))    # zero cols: padded chans
        se_b2 = jnp.zeros((1, C_PAD), jnp.float32)

        params += [wcol.astype(bf16), conv_b, se_w1.astype(bf16), se_b1,
                   se_w2.astype(bf16), se_b2]

    # final Linear(64, 2): rows padded 64->128 (zero), cols padded 2->128 (zero)
    fc_w = xavier_uniform(keys[ki], (CHANNELS[-1], 2), CHANNELS[-1], 2); ki += 1
    fc_w = jnp.pad(fc_w, ((0, C_PAD - CHANNELS[-1]), (0, HEAD_PAD - 2)))
    fc_b = jnp.zeros((1, HEAD_PAD), jnp.float32)
    params += [fc_w.astype(jnp.bfloat16), fc_b]
    return tuple(params)


if __name__ == "__main__":
    key = jax.random.PRNGKey(0)
    k_params, k_x = jax.random.split(key)

    B, L, IN_DIM = 2, 40, 21           # small seq length; channels fixed by the module
    x = jax.random.normal(k_x, (B, L, IN_DIM), jnp.float32)

    params = make_params(k_params)

    out = senet_forward(x, params)
    out = jax.block_until_ready(out)
    assert out.shape == (B, 2)
    print("KERNEL_OK")
</pallas_src>

<mosaic_0001>
module attributes {stable_mosaic.version = 11 : i64} {
  func.func @senet_fused_kernel(%arg0: i32, %arg1: memref<320x384xbf16, #tpu.memory_space<vmem>>, %arg2: memref<64x320xbf16, #tpu.memory_space<vmem>>, %arg3: memref<384x128xbf16, #tpu.memory_space<vmem>>, %arg4: memref<1x128xf32, #tpu.memory_space<vmem>>, %arg5: memref<128x32xbf16, #tpu.memory_space<vmem>>, %arg6: memref<1x32xf32, #tpu.memory_space<vmem>>, %arg7: memref<32x128xbf16, #tpu.memory_space<vmem>>, %arg8: memref<1x128xf32, #tpu.memory_space<vmem>>, %arg9: memref<1152x128xbf16, #tpu.memory_space<vmem>>, %arg10: memref<1x128xf32, #tpu.memory_space<vmem>>, %arg11: memref<128x32xbf16, #tpu.memory_space<vmem>>, %arg12: memref<1x32xf32, #tpu.memory_space<vmem>>, %arg13: memref<32x128xbf16, #tpu.memory_space<vmem>>, %arg14: memref<1x128xf32, #tpu.memory_space<vmem>>, %arg15: memref<640x128xbf16, #tpu.memory_space<vmem>>, %arg16: memref<1x128xf32, #tpu.memory_space<vmem>>, %arg17: memref<128x16xbf16, #tpu.memory_space<vmem>>, %arg18: memref<1x16xf32, #tpu.memory_space<vmem>>, %arg19: memref<16x128xbf16, #tpu.memory_space<vmem>>, %arg20: memref<1x128xf32, #tpu.memory_space<vmem>>, %arg21: memref<640x128xbf16, #tpu.memory_space<vmem>>, %arg22: memref<1x128xf32, #tpu.memory_space<vmem>>, %arg23: memref<128x16xbf16, #tpu.memory_space<vmem>>, %arg24: memref<1x16xf32, #tpu.memory_space<vmem>>, %arg25: memref<16x128xbf16, #tpu.memory_space<vmem>>, %arg26: memref<1x128xf32, #tpu.memory_space<vmem>>, %arg27: memref<128x128xbf16, #tpu.memory_space<vmem>>, %arg28: memref<1x128xf32, #tpu.memory_space<vmem>>, %arg29: memref<8x128xf32, #tpu.memory_space<vmem>>, %arg30: memref<8x16x128xf32, #tpu.memory_space<vmem>>, %arg31: memref<8x12x128xf32, #tpu.memory_space<vmem>>, %arg32: memref<8x12x128xf32, #tpu.memory_space<vmem>>) attributes {dimension_semantics = [#tpu.dimension_semantics<parallel>], iteration_bounds = array<i64: 1>, scalar_prefetch = 0 : i64, scratch_operands = 3 : i64, tpu.core_type = #tpu.core_type<tc>, window_params = [{transform_indices = @transform_0, window_bounds = array<i64: 320, 384>}, {pipeline_mode = #tpu.pipeline_mode<synchronous>, transform_indices = @transform_1, window_bounds = array<i64: 64, 320>}, {pipeline_mode = #tpu.pipeline_mode<synchronous>, transform_indices = @transform_2, window_bounds = array<i64: 384, 128>}, {pipeline_mode = #tpu.pipeline_mode<synchronous>, transform_indices = @transform_3, window_bounds = array<i64: 1, 128>}, {pipeline_mode = #tpu.pipeline_mode<synchronous>, transform_indices = @transform_4, window_bounds = array<i64: 128, 32>}, {pipeline_mode = #tpu.pipeline_mode<synchronous>, transform_indices = @transform_5, window_bounds = array<i64: 1, 32>}, {pipeline_mode = #tpu.pipeline_mode<synchronous>, transform_indices = @transform_6, window_bounds = array<i64: 32, 128>}, {pipeline_mode = #tpu.pipeline_mode<synchronous>, transform_indices = @transform_7, window_bounds = array<i64: 1, 128>}, {pipeline_mode = #tpu.pipeline_mode<synchronous>, transform_indices = @transform_8, window_bounds = array<i64: 1152, 128>}, {pipeline_mode = #tpu.pipeline_mode<synchronous>, transform_indices = @transform_9, window_bounds = array<i64: 1, 128>}, {pipeline_mode = #tpu.pipeline_mode<synchronous>, transform_indices = @transform_10, window_bounds = array<i64: 128, 32>}, {pipeline_mode = #tpu.pipeline_mode<synchronous>, transform_indices = @transform_11, window_bounds = array<i64: 1, 32>}, {pipeline_mode = #tpu.pipeline_mode<synchronous>, transform_indices = @transform_12, window_bounds = array<i64: 32, 128>}, {pipeline_mode = #tpu.pipeline_mode<synchronous>, transform_indices = @transform_13, window_bounds = array<i64: 1, 128>}, {pipeline_mode = #tpu.pipeline_mode<synchronous>, transform_indices = @transform_14, window_bounds = array<i64: 640, 128>}, {pipeline_mode = #tpu.pipeline_mode<synchronous>, transform_indices = @transform_15, window_bounds = array<i64: 1, 128>}, {pipeline_mode = #tpu.pipeline_mode<synchronous>, transform_indices = @transform_16, window_bounds = array<i64: 128, 16>}, {pipeline_mode = #tpu.pipeline_mode<synchronous>, transform_indices = @transform_17, window_bounds = array<i64: 1, 16>}, {pipeline_mode = #tpu.pipeline_mode<synchronous>, transform_indices = @transform_18, window_bounds = array<i64: 16, 128>}, {pipeline_mode = #tpu.pipeline_mode<synchronous>, transform_indices = @transform_19, window_bounds = array<i64: 1, 128>}, {pipeline_mode = #tpu.pipeline_mode<synchronous>, transform_indices = @transform_20, window_bounds = array<i64: 640, 128>}, {pipeline_mode = #tpu.pipeline_mode<synchronous>, transform_indices = @transform_21, window_bounds = array<i64: 1, 128>}, {pipeline_mode = #tpu.pipeline_mode<synchronous>, transform_indices = @transform_22, window_bounds = array<i64: 128, 16>}, {pipeline_mode = #tpu.pipeline_mode<synchronous>, transform_indices = @transform_23, window_bounds = array<i64: 1, 16>}, {pipeline_mode = #tpu.pipeline_mode<synchronous>, transform_indices = @transform_24, window_bounds = array<i64: 16, 128>}, {pipeline_mode = #tpu.pipeline_mode<synchronous>, transform_indices = @transform_25, window_bounds = array<i64: 1, 128>}, {pipeline_mode = #tpu.pipeline_mode<synchronous>, transform_indices = @transform_26, window_bounds = array<i64: 128, 128>}, {pipeline_mode = #tpu.pipeline_mode<synchronous>, transform_indices = @transform_27, window_bounds = array<i64: 1, 128>}, {transform_indices = @transform_28, window_bounds = array<i64: 8, 128>}]} {
    %c0 = arith.constant 0 : index
    %c0_0 = arith.constant 0 : index
    %0 = vector.load %arg1[%c0, %c0_0] : memref<320x384xbf16, #tpu.memory_space<vmem>>, vector<320x384xbf16>
    %c0_1 = arith.constant 0 : index
    %c0_2 = arith.constant 0 : index
    %1 = vector.load %arg3[%c0_1, %c0_2] : memref<384x128xbf16, #tpu.memory_space<vmem>>, vector<384x128xbf16>
    %cst = arith.constant dense<0.000000e+00> : vector<320x128xf32>
    %2 = tpu.matmul %0, %1, %cst {dimension_numbers = #tpu.dot_dimension_numbers<[1], [0], [0], [1], [0, 0, 1, 1], [], []>} : vector<320x384xbf16>, vector<384x128xbf16>, vector<320x128xf32> -> vector<320x128xf32>
    %c0_3 = arith.constant 0 : index
    %c0_4 = arith.constant 0 : index
    %3 = vector.load %arg4[%c0_3, %c0_4] : memref<1x128xf32, #tpu.memory_space<vmem>>, vector<1x128xf32>
    %4 = vector.broadcast %3 : vector<1x128xf32> to vector<320x128xf32>
    %5 = arith.addf %2, %4 : vector<320x128xf32>
    %cst_5 = arith.constant 0.000000e+00 : f32
    %6 = vector.broadcast %cst_5 : f32 to vector<320x128xf32>
    %7 = arith.maximumf %5, %6 : vector<320x128xf32>
    %8 = vector.shape_cast %7 : vector<320x128xf32> to vector<8x40x128xf32>
    %cst_6 = arith.constant dense<0.000000e+00> : vector<8x128xf32>
    %9 = vector.multi_reduction <add>, %8, %cst_6 [1] : vector<8x40x128xf32> to vector<8x128xf32>
    %cst_7 = arith.constant 2.500000e-02 : f32
    %10 = vector.broadcast %cst_7 : f32 to vector<8x128xf32>
    %11 = arith.mulf %9, %10 : vector<8x128xf32>
    %12 = arith.truncf %11 : vector<8x128xf32> to vector<8x128xbf16>
    %c0_8 = arith.constant 0 : index
    %c0_9 = arith.constant 0 : index
    %13 = vector.load %arg5[%c0_8, %c0_9] : memref<128x32xbf16, #tpu.memory_space<vmem>>, vector<128x32xbf16>
    %cst_10 = arith.constant dense<0.000000e+00> : vector<8x32xf32>
    %14 = tpu.matmul %12, %13, %cst_10 {dimension_numbers = #tpu.dot_dimension_numbers<[1], [0], [0], [1], [0, 0, 1, 1], [], []>} : vector<8x128xbf16>, vector<128x32xbf16>, vector<8x32xf32> -> vector<8x32xf32>
    %c0_11 = arith.constant 0 : index
    %c0_12 = arith.constant 0 : index
    %15 = vector.load %arg6[%c0_11, %c0_12] : memref<1x32xf32, #tpu.memory_space<vmem>>, vector<1x32xf32>
    %16 = vector.broadcast %15 : vector<1x32xf32> to vector<8x32xf32>
    %17 = arith.addf %14, %16 : vector<8x32xf32>
    %cst_13 = arith.constant 0.000000e+00 : f32
    %18 = vector.broadcast %cst_13 : f32 to vector<8x32xf32>
    %19 = arith.maximumf %17, %18 : vector<8x32xf32>
    %20 = arith.truncf %19 : vector<8x32xf32> to vector<8x32xbf16>
    %c0_14 = arith.constant 0 : index
    %c0_15 = arith.constant 0 : index
    %21 = vector.load %arg7[%c0_14, %c0_15] : memref<32x128xbf16, #tpu.memory_space<vmem>>, vector<32x128xbf16>
    %cst_16 = arith.constant dense<0.000000e+00> : vector<8x128xf32>
    %22 = tpu.matmul %20, %21, %cst_16 {dimension_numbers = #tpu.dot_dimension_numbers<[1], [0], [0], [1], [0, 0, 1, 1], [], []>} : vector<8x32xbf16>, vector<32x128xbf16>, vector<8x128xf32> -> vector<8x128xf32>
    %c0_17 = arith.constant 0 : index
    %c0_18 = arith.constant 0 : index
    %23 = vector.load %arg8[%c0_17, %c0_18] : memref<1x128xf32, #tpu.memory_space<vmem>>, vector<1x128xf32>
    %24 = vector.broadcast %23 : vector<1x128xf32> to vector<8x128xf32>
    %25 = arith.addf %22, %24 : vector<8x128xf32>
    %26 = arith.negf %25 : vector<8x128xf32>
    %27 = math.exp %26 : vector<8x128xf32>
    %cst_19 = arith.constant 1.000000e+00 : f32
    %28 = vector.broadcast %cst_19 : f32 to vector<8x128xf32>
    %29 = arith.addf %28, %27 : vector<8x128xf32>
    %30 = arith.divf %28, %29 : vector<8x128xf32>
    %31 = vector.shape_cast %30 : vector<8x128xf32> to vector<8x1x128xf32>
    %32 = vector.broadcast %31 : vector<8x1x128xf32> to vector<8x40x128xf32>
    %33 = arith.mulf %8, %32 : vector<8x40x128xf32>
    %c0_20 = arith.constant 0 : index
    %c0_21 = arith.constant 0 : index
    %34 = vector.load %arg2[%c0_20, %c0_21] : memref<64x320xbf16, #tpu.memory_space<vmem>>, vector<64x320xbf16>
    %35 = vector.shape_cast %33 : vector<8x40x128xf32> to vector<320x128xf32>
    %36 = arith.truncf %35 : vector<320x128xf32> to vector<320x128xbf16>
    %cst_22 = arith.constant dense<0.000000e+00> : vector<64x128xf32>
    %37 = tpu.matmul %34, %36, %cst_22 {dimension_numbers = #tpu.dot_dimension_numbers<[1], [0], [0], [1], [0, 0, 1, 1], [], []>} : vector<64x320xbf16>, vector<320x128xbf16>, vector<64x128xf32> -> vector<64x128xf32>
    %cst_23 = arith.constant 2.000000e-01 : f32
    %38 = vector.broadcast %cst_23 : f32 to vector<64x128xf32>
    %39 = arith.mulf %37, %38 : vector<64x128xf32>
    %40 = vector.shape_cast %39 : vector<64x128xf32> to vector<8x8x128xf32>
    %cst_24 = arith.constant 0.000000e+00 : f32
    %41 = vector.broadcast %cst_24 : f32 to vector<8x4x128xf32>
    %c0_25 = arith.constant 0 : index
    %c0_26 = arith.constant 0 : index
    %c0_27 = arith.constant 0 : index
    %42 = vector.load %arg30[%c0_25, %c0_26, %c0_27] : memref<8x16x128xf32, #tpu.memory_space<vmem>>, vector<8x4x128xf32>
    tpu.vector_store %arg30[%c0_25, %c0_26, %c0_27], %41 {strides = array<i32>} : memref<8x16x128xf32, #tpu.memory_space<vmem>>, vector<8x4x128xf32>,
    %c0_28 = arith.constant 0 : index
    %c12 = arith.constant 12 : index
    %c0_29 = arith.constant 0 : index
    %43 = vector.load %arg30[%c0_28, %c12, %c0_29] : memref<8x16x128xf32, #tpu.memory_space<vmem>>, vector<8x4x128xf32>
    tpu.vector_store %arg30[%c0_28, %c12, %c0_29], %41 {strides = array<i32>} : memref<8x16x128xf32, #tpu.memory_space<vmem>>, vector<8x4x128xf32>,
    %c0_30 = arith.constant 0 : index
    %c4 = arith.constant 4 : index
    %c0_31 = arith.constant 0 : index
    %44 = vector.load %arg30[%c0_30, %c4, %c0_31] : memref<8x16x128xf32, #tpu.memory_space<vmem>>, vector<8x8x128xf32>
    tpu.vector_store %arg30[%c0_30, %c4, %c0_31], %40 {strides = array<i32>} : memref<8x16x128xf32, #tpu.memory_space<vmem>>, vector<8x8x128xf32>,
    %c0_32 = arith.constant 0 : index
    %c0_33 = arith.constant 0 : index
    %c0_34 = arith.constant 0 : index
    %45 = vector.load %arg30[%c0_32, %c0_33, %c0_34] : memref<8x16x128xf32, #tpu.memory_space<vmem>>, vector<8x8x128xf32>
    %c0_35 = arith.constant 0 : index
    %c1 = arith.constant 1 : index
    %c0_36 = arith.constant 0 : index
    %46 = vector.load %arg30[%c0_35, %c1, %c0_36] : memref<8x16x128xf32, #tpu.memory_space<vmem>>, vector<8x8x128xf32>
    %c0_37 = arith.constant 0 : index
    %c2 = arith.constant 2 : index
    %c0_38 = arith.constant 0 : index
    %47 = vector.load %arg30[%c0_37, %c2, %c0_38] : memref<8x16x128xf32, #tpu.memory_space<vmem>>, vector<8x8x128xf32>
    %c0_39 = arith.constant 0 : index
    %c3 = arith.constant 3 : index
    %c0_40 = arith.constant 0 : index
    %48 = vector.load %arg30[%c0_39, %c3, %c0_40] : memref<8x16x128xf32, #tpu.memory_space<vmem>>, vector<8x8x128xf32>
    %c0_41 = arith.constant 0 : index
    %c4_42 = arith.constant 4 : index
    %c0_43 = arith.constant 0 : index
    %49 = vector.load %arg30[%c0_41, %c4_42, %c0_43] : memref<8x16x128xf32, #tpu.memory_space<vmem>>, vector<8x8x128xf32>
    %c0_44 = arith.constant 0 : index
    %c5 = arith.constant 5 : index
    %c0_45 = arith.constant 0 : index
    %50 = vector.load %arg30[%c0_44, %c5, %c0_45] : memref<8x16x128xf32, #tpu.memory_space<vmem>>, vector<8x8x128xf32>
    %c0_46 = arith.constant 0 : index
    %c6 = arith.constant 6 : index
    %c0_47 = arith.constant 0 : index
    %51 = vector.load %arg30[%c0_46, %c6, %c0_47] : memref<8x16x128xf32, #tpu.memory_space<vmem>>, vector<8x8x128xf32>
    %c0_48 = arith.constant 0 : index
    %c7 = arith.constant 7 : index
    %c0_49 = arith.constant 0 : index
    %52 = vector.load %arg30[%c0_48, %c7, %c0_49] : memref<8x16x128xf32, #tpu.memory_space<vmem>>, vector<8x8x128xf32>
    %c0_50 = arith.constant 0 : index
    %c8 = arith.constant 8 : index
    %c0_51 = arith.constant 0 : index
    %53 = vector.load %arg30[%c0_50, %c8, %c0_51] : memref<8x16x128xf32, #tpu.memory_space<vmem>>, vector<8x8x128xf32>
    %54 = tpu.concatenate %45, %46, %47, %48, %49, %50, %51, %52, %53 in 2 : vector<8x8x128xf32>, vector<8x8x128xf32>, vector<8x8x128xf32>, vector<8x8x128xf32>, vector<8x8x128xf32>, vector<8x8x128xf32>, vector<8x8x128xf32>, vector<8x8x128xf32>, vector<8x8x128xf32> -> vector<8x8x1152xf32>
    %55 = vector.shape_cast %54 : vector<8x8x1152xf32> to vector<64x1152xf32>
    %56 = arith.truncf %55 : vector<64x1152xf32> to vector<64x1152xbf16>
    %c0_52 = arith.constant 0 : index
    %c0_53 = arith.constant 0 : index
    %57 = vector.load %arg9[%c0_52, %c0_53] : memref<1152x128xbf16, #tpu.memory_space<vmem>>, vector<1152x128xbf16>
    %cst_54 = arith.constant dense<0.000000e+00> : vector<64x128xf32>
    %58 = tpu.matmul %56, %57, %cst_54 {dimension_numbers = #tpu.dot_dimension_numbers<[1], [0], [0], [1], [0, 0, 1, 1], [], []>} : vector<64x1152xbf16>, vector<1152x128xbf16>, vector<64x128xf32> -> vector<64x128xf32>
    %c0_55 = arith.constant 0 : index
    %c0_56 = arith.constant 0 : index
    %59 = vector.load %arg10[%c0_55, %c0_56] : memref<1x128xf32, #tpu.memory_space<vmem>>, vector<1x128xf32>
    %60 = vector.broadcast %59 : vector<1x128xf32> to vector<64x128xf32>
    %61 = arith.addf %58, %60 : vector<64x128xf32>
    %cst_57 = arith.constant 0.000000e+00 : f32
    %62 = vector.broadcast %cst_57 : f32 to vector<64x128xf32>
    %63 = arith.maximumf %61, %62 : vector<64x128xf32>
    %64 = vector.shape_cast %63 : vector<64x128xf32> to vector<8x8x128xf32>
    %cst_58 = arith.constant dense<0.000000e+00> : vector<8x128xf32>
    %65 = vector.multi_reduction <add>, %64, %cst_58 [1] : vector<8x8x128xf32> to vector<8x128xf32>
    %cst_59 = arith.constant 1.250000e-01 : f32
    %66 = vector.broadcast %cst_59 : f32 to vector<8x128xf32>
    %67 = arith.mulf %65, %66 : vector<8x128xf32>
    %68 = arith.truncf %67 : vector<8x128xf32> to vector<8x128xbf16>
    %c0_60 = arith.constant 0 : index
    %c0_61 = arith.constant 0 : index
    %69 = vector.load %arg11[%c0_60, %c0_61] : memref<128x32xbf16, #tpu.memory_space<vmem>>, vector<128x32xbf16>
    %cst_62 = arith.constant dense<0.000000e+00> : vector<8x32xf32>
    %70 = tpu.matmul %68, %69, %cst_62 {dimension_numbers = #tpu.dot_dimension_numbers<[1], [0], [0], [1], [0, 0, 1, 1], [], []>} : vector<8x128xbf16>, vector<128x32xbf16>, vector<8x32xf32> -> vector<8x32xf32>
    %c0_63 = arith.constant 0 : index
    %c0_64 = arith.constant 0 : index
    %71 = vector.load %arg12[%c0_63, %c0_64] : memref<1x32xf32, #tpu.memory_space<vmem>>, vector<1x32xf32>
    %72 = vector.broadcast %71 : vector<1x32xf32> to vector<8x32xf32>
    %73 = arith.addf %70, %72 : vector<8x32xf32>
    %cst_65 = arith.constant 0.000000e+00 : f32
    %74 = vector.broadcast %cst_65 : f32 to vector<8x32xf32>
    %75 = arith.maximumf %73, %74 : vector<8x32xf32>
    %76 = arith.truncf %75 : vector<8x32xf32> to vector<8x32xbf16>
    %c0_66 = arith.constant 0 : index
    %c0_67 = arith.constant 0 : index
    %77 = vector.load %arg13[%c0_66, %c0_67] : memref<32x128xbf16, #tpu.memory_space<vmem>>, vector<32x128xbf16>
    %cst_68 = arith.constant dense<0.000000e+00> : vector<8x128xf32>
    %78 = tpu.matmul %76, %77, %cst_68 {dimension_numbers = #tpu.dot_dimension_numbers<[1], [0], [0], [1], [0, 0, 1, 1], [], []>} : vector<8x32xbf16>, vector<32x128xbf16>, vector<8x128xf32> -> vector<8x128xf32>
    %c0_69 = arith.constant 0 : index
    %c0_70 = arith.constant 0 : index
    %79 = vector.load %arg14[%c0_69, %c0_70] : memref<1x128xf32, #tpu.memory_space<vmem>>, vector<1x128xf32>
    %80 = vector.broadcast %79 : vector<1x128xf32> to vector<8x128xf32>
    %81 = arith.addf %78, %80 : vector<8x128xf32>
    %82 = arith.negf %81 : vector<8x128xf32>
    %83 = math.exp %82 : vector<8x128xf32>
    %cst_71 = arith.constant 1.000000e+00 : f32
    %84 = vector.broadcast %cst_71 : f32 to vector<8x128xf32>
    %85 = arith.addf %84, %83 : vector<8x128xf32>
    %86 = arith.divf %84, %85 : vector<8x128xf32>
    %87 = vector.shape_cast %86 : vector<8x128xf32> to vector<8x1x128xf32>
    %88 = vector.broadcast %87 : vector<8x1x128xf32> to vector<8x8x128xf32>
    %89 = arith.mulf %64, %88 : vector<8x8x128xf32>
    %cst_72 = arith.constant 0.000000e+00 : f32
    %90 = vector.broadcast %cst_72 : f32 to vector<8x2x128xf32>
    %c0_73 = arith.constant 0 : index
    %c0_74 = arith.constant 0 : index
    %c0_75 = arith.constant 0 : index
    %91 = vector.load %arg31[%c0_73, %c0_74, %c0_75] : memref<8x12x128xf32, #tpu.memory_space<vmem>>, vector<8x2x128xf32>
    tpu.vector_store %arg31[%c0_73, %c0_74, %c0_75], %90 {strides = array<i32>} : memref<8x12x128xf32, #tpu.memory_space<vmem>>, vector<8x2x128xf32>,
    %c0_76 = arith.constant 0 : index
    %c10 = arith.constant 10 : index
    %c0_77 = arith.constant 0 : index
    %92 = vector.load %arg31[%c0_76, %c10, %c0_77] : memref<8x12x128xf32, #tpu.memory_space<vmem>>, vector<8x2x128xf32>
    tpu.vector_store %arg31[%c0_76, %c10, %c0_77], %90 {strides = array<i32>} : memref<8x12x128xf32, #tpu.memory_space<vmem>>, vector<8x2x128xf32>,
    %c0_78 = arith.constant 0 : index
    %c2_79 = arith.constant 2 : index
    %c0_80 = arith.constant 0 : index
    %93 = vector.load %arg31[%c0_78, %c2_79, %c0_80] : memref<8x12x128xf32, #tpu.memory_space<vmem>>, vector<8x8x128xf32>
    tpu.vector_store %arg31[%c0_78, %c2_79, %c0_80], %89 {strides = array<i32>} : memref<8x12x128xf32, #tpu.memory_space<vmem>>, vector<8x8x128xf32>,
    %c0_81 = arith.constant 0 : index
    %c0_82 = arith.constant 0 : index
    %c0_83 = arith.constant 0 : index
    %94 = vector.load %arg31[%c0_81, %c0_82, %c0_83] : memref<8x12x128xf32, #tpu.memory_space<vmem>>, vector<8x8x128xf32>
    %c0_84 = arith.constant 0 : index
    %c1_85 = arith.constant 1 : index
    %c0_86 = arith.constant 0 : index
    %95 = vector.load %arg31[%c0_84, %c1_85, %c0_86] : memref<8x12x128xf32, #tpu.memory_space<vmem>>, vector<8x8x128xf32>
    %c0_87 = arith.constant 0 : index
    %c2_88 = arith.constant 2 : index
    %c0_89 = arith.constant 0 : index
    %96 = vector.load %arg31[%c0_87, %c2_88, %c0_89] : memref<8x12x128xf32, #tpu.memory_space<vmem>>, vector<8x8x128xf32>
    %c0_90 = arith.constant 0 : index
    %c3_91 = arith.constant 3 : index
    %c0_92 = arith.constant 0 : index
    %97 = vector.load %arg31[%c0_90, %c3_91, %c0_92] : memref<8x12x128xf32, #tpu.memory_space<vmem>>, vector<8x8x128xf32>
    %c0_93 = arith.constant 0 : index
    %c4_94 = arith.constant 4 : index
    %c0_95 = arith.constant 0 : index
    %98 = vector.load %arg31[%c0_93, %c4_94, %c0_95] : memref<8x12x128xf32, #tpu.memory_space<vmem>>, vector<8x8x128xf32>
    %99 = tpu.concatenate %94, %95, %96, %97, %98 in 2 : vector<8x8x128xf32>, vector<8x8x128xf32>, vector<8x8x128xf32>, vector<8x8x128xf32>, vector<8x8x128xf32> -> vector<8x8x640xf32>
    %100 = vector.shape_cast %99 : vector<8x8x640xf32> to vector<64x640xf32>
    %101 = arith.truncf %100 : vector<64x640xf32> to vector<64x640xbf16>
    %c0_96 = arith.constant 0 : index
    %c0_97 = arith.constant 0 : index
    %102 = vector.load %arg15[%c0_96, %c0_97] : memref<640x128xbf16, #tpu.memory_space<vmem>>, vector<640x128xbf16>
    %cst_98 = arith.constant dense<0.000000e+00> : vector<64x128xf32>
    %103 = tpu.matmul %101, %102, %cst_98 {dimension_numbers = #tpu.dot_dimension_numbers<[1], [0], [0], [1], [0, 0, 1, 1], [], []>} : vector<64x640xbf16>, vector<640x128xbf16>, vector<64x128xf32> -> vector<64x128xf32>
    %c0_99 = arith.constant 0 : index
    %c0_100 = arith.constant 0 : index
    %104 = vector.load %arg16[%c0_99, %c0_100] : memref<1x128xf32, #tpu.memory_space<vmem>>, vector<1x128xf32>
    %105 = vector.broadcast %104 : vector<1x128xf32> to vector<64x128xf32>
    %106 = arith.addf %103, %105 : vector<64x128xf32>
    %cst_101 = arith.constant 0.000000e+00 : f32
    %107 = vector.broadcast %cst_101 : f32 to vector<64x128xf32>
    %108 = arith.maximumf %106, %107 : vector<64x128xf32>
    %109 = vector.shape_cast %108 : vector<64x128xf32> to vector<8x8x128xf32>
    %cst_102 = arith.constant dense<0.000000e+00> : vector<8x128xf32>
    %110 = vector.multi_reduction <add>, %109, %cst_102 [1] : vector<8x8x128xf32> to vector<8x128xf32>
    %cst_103 = arith.constant 1.250000e-01 : f32
    %111 = vector.broadcast %cst_103 : f32 to vector<8x128xf32>
    %112 = arith.mulf %110, %111 : vector<8x128xf32>
    %113 = arith.truncf %112 : vector<8x128xf32> to vector<8x128xbf16>
    %c0_104 = arith.constant 0 : index
    %c0_105 = arith.constant 0 : index
    %114 = vector.load %arg17[%c0_104, %c0_105] : memref<128x16xbf16, #tpu.memory_space<vmem>>, vector<128x16xbf16>
    %cst_106 = arith.constant dense<0.000000e+00> : vector<8x16xf32>
    %115 = tpu.matmul %113, %114, %cst_106 {dimension_numbers = #tpu.dot_dimension_numbers<[1], [0], [0], [1], [0, 0, 1, 1], [], []>} : vector<8x128xbf16>, vector<128x16xbf16>, vector<8x16xf32> -> vector<8x16xf32>
    %c0_107 = arith.constant 0 : index
    %c0_108 = arith.constant 0 : index
    %116 = vector.load %arg18[%c0_107, %c0_108] : memref<1x16xf32, #tpu.memory_space<vmem>>, vector<1x16xf32>
    %117 = vector.broadcast %116 : vector<1x16xf32> to vector<8x16xf32>
    %118 = arith.addf %115, %117 : vector<8x16xf32>
    %cst_109 = arith.constant 0.000000e+00 : f32
    %119 = vector.broadcast %cst_109 : f32 to vector<8x16xf32>
    %120 = arith.maximumf %118, %119 : vector<8x16xf32>
    %121 = arith.truncf %120 : vector<8x16xf32> to vector<8x16xbf16>
    %c0_110 = arith.constant 0 : index
    %c0_111 = arith.constant 0 : index
    %122 = vector.load %arg19[%c0_110, %c0_111] : memref<16x128xbf16, #tpu.memory_space<vmem>>, vector<16x128xbf16>
    %cst_112 = arith.constant dense<0.000000e+00> : vector<8x128xf32>
    %123 = tpu.matmul %121, %122, %cst_112 {dimension_numbers = #tpu.dot_dimension_numbers<[1], [0], [0], [1], [0, 0, 1, 1], [], []>} : vector<8x16xbf16>, vector<16x128xbf16>, vector<8x128xf32> -> vector<8x128xf32>
    %c0_113 = arith.constant 0 : index
    %c0_114 = arith.constant 0 : index
    %124 = vector.load %arg20[%c0_113, %c0_114] : memref<1x128xf32, #tpu.memory_space<vmem>>, vector<1x128xf32>
    %125 = vector.broadcast %124 : vector<1x128xf32> to vector<8x128xf32>
    %126 = arith.addf %123, %125 : vector<8x128xf32>
    %127 = arith.negf %126 : vector<8x128xf32>
    %128 = math.exp %127 : vector<8x128xf32>
    %cst_115 = arith.constant 1.000000e+00 : f32
    %129 = vector.broadcast %cst_115 : f32 to vector<8x128xf32>
    %130 = arith.addf %129, %128 : vector<8x128xf32>
    %131 = arith.divf %129, %130 : vector<8x128xf32>
    %132 = vector.shape_cast %131 : vector<8x128xf32> to vector<8x1x128xf32>
    %133 = vector.broadcast %132 : vector<8x1x128xf32> to vector<8x8x128xf32>
    %134 = arith.mulf %109, %133 : vector<8x8x128xf32>
    %cst_116 = arith.constant 0.000000e+00 : f32
    %135 = vector.broadcast %cst_116 : f32 to vector<8x2x128xf32>
    %c0_117 = arith.constant 0 : index
    %c0_118 = arith.constant 0 : index
    %c0_119 = arith.constant 0 : index
    %136 = vector.load %arg32[%c0_117, %c0_118, %c0_119] : memref<8x12x128xf32, #tpu.memory_space<vmem>>, vector<8x2x128xf32>
    tpu.vector_store %arg32[%c0_117, %c0_118, %c0_119], %135 {strides = array<i32>} : memref<8x12x128xf32, #tpu.memory_space<vmem>>, vector<8x2x128xf32>,
    %c0_120 = arith.constant 0 : index
    %c10_121 = arith.constant 10 : index
    %c0_122 = arith.constant 0 : index
    %137 = vector.load %arg32[%c0_120, %c10_121, %c0_122] : memref<8x12x128xf32, #tpu.memory_space<vmem>>, vector<8x2x128xf32>
    tpu.vector_store %arg32[%c0_120, %c10_121, %c0_122], %135 {strides = array<i32>} : memref<8x12x128xf32, #tpu.memory_space<vmem>>, vector<8x2x128xf32>,
    %c0_123 = arith.constant 0 : index
    %c2_124 = arith.constant 2 : index
    %c0_125 = arith.constant 0 : index
    %138 = vector.load %arg32[%c0_123, %c2_124, %c0_125] : memref<8x12x128xf32, #tpu.memory_space<vmem>>, vector<8x8x128xf32>
    tpu.vector_store %arg32[%c0_123, %c2_124, %c0_125], %134 {strides = array<i32>} : memref<8x12x128xf32, #tpu.memory_space<vmem>>, vector<8x8x128xf32>,
    %c0_126 = arith.constant 0 : index
    %c0_127 = arith.constant 0 : index
    %c0_128 = arith.constant 0 : index
    %139 = vector.load %arg32[%c0_126, %c0_127, %c0_128] : memref<8x12x128xf32, #tpu.memory_space<vmem>>, vector<8x8x128xf32>
    %c0_129 = arith.constant 0 : index
    %c1_130 = arith.constant 1 : index
    %c0_131 = arith.constant 0 : index
    %140 = vector.load %arg32[%c0_129, %c1_130, %c0_131] : memref<8x12x128xf32, #tpu.memory_space<vmem>>, vector<8x8x128xf32>
    %c0_132 = arith.constant 0 : index
    %c2_133 = arith.constant 2 : index
    %c0_134 = arith.constant 0 : index
    %141 = vector.load %arg32[%c0_132, %c2_133, %c0_134] : memref<8x12x128xf32, #tpu.memory_space<vmem>>, vector<8x8x128xf32>
    %c0_135 = arith.constant 0 : index
    %c3_136 = arith.constant 3 : index
    %c0_137 = arith.constant 0 : index
    %142 = vector.load %arg32[%c0_135, %c3_136, %c0_137] : memref<8x12x128xf32, #tpu.memory_space<vmem>>, vector<8x8x128xf32>
    %c0_138 = arith.constant 0 : index
    %c4_139 = arith.constant 4 : index
    %c0_140 = arith.constant 0 : index
    %143 = vector.load %arg32[%c0_138, %c4_139, %c0_140] : memref<8x12x128xf32, #tpu.memory_space<vmem>>, vector<8x8x128xf32>
    %144 = tpu.concatenate %139, %140, %141, %142, %143 in 2 : vector<8x8x128xf32>, vector<8x8x128xf32>, vector<8x8x128xf32>, vector<8x8x128xf32>, vector<8x8x128xf32> -> vector<8x8x640xf32>
    %145 = vector.shape_cast %144 : vector<8x8x640xf32> to vector<64x640xf32>
    %146 = arith.truncf %145 : vector<64x640xf32> to vector<64x640xbf16>
    %c0_141 = arith.constant 0 : index
    %c0_142 = arith.constant 0 : index
    %147 = vector.load %arg21[%c0_141, %c0_142] : memref<640x128xbf16, #tpu.memory_space<vmem>>, vector<640x128xbf16>
    %cst_143 = arith.constant dense<0.000000e+00> : vector<64x128xf32>
    %148 = tpu.matmul %146, %147, %cst_143 {dimension_numbers = #tpu.dot_dimension_numbers<[1], [0], [0], [1], [0, 0, 1, 1], [], []>} : vector<64x640xbf16>, vector<640x128xbf16>, vector<64x128xf32> -> vector<64x128xf32>
    %c0_144 = arith.constant 0 : index
    %c0_145 = arith.constant 0 : index
    %149 = vector.load %arg22[%c0_144, %c0_145] : memref<1x128xf32, #tpu.memory_space<vmem>>, vector<1x128xf32>
    %150 = vector.broadcast %149 : vector<1x128xf32> to vector<64x128xf32>
    %151 = arith.addf %148, %150 : vector<64x128xf32>
    %cst_146 = arith.constant 0.000000e+00 : f32
    %152 = vector.broadcast %cst_146 : f32 to vector<64x128xf32>
    %153 = arith.maximumf %151, %152 : vector<64x128xf32>
    %154 = vector.shape_cast %153 : vector<64x128xf32> to vector<8x8x128xf32>
    %cst_147 = arith.constant dense<0.000000e+00> : vector<8x128xf32>
    %155 = vector.multi_reduction <add>, %154, %cst_147 [1] : vector<8x8x128xf32> to vector<8x128xf32>
    %cst_148 = arith.constant 1.250000e-01 : f32
    %156 = vector.broadcast %cst_148 : f32 to vector<8x128xf32>
    %157 = arith.mulf %155, %156 : vector<8x128xf32>
    %158 = arith.truncf %157 : vector<8x128xf32> to vector<8x128xbf16>
    %c0_149 = arith.constant 0 : index
    %c0_150 = arith.constant 0 : index
    %159 = vector.load %arg23[%c0_149, %c0_150] : memref<128x16xbf16, #tpu.memory_space<vmem>>, vector<128x16xbf16>
    %cst_151 = arith.constant dense<0.000000e+00> : vector<8x16xf32>
    %160 = tpu.matmul %158, %159, %cst_151 {dimension_numbers = #tpu.dot_dimension_numbers<[1], [0], [0], [1], [0, 0, 1, 1], [], []>} : vector<8x128xbf16>, vector<128x16xbf16>, vector<8x16xf32> -> vector<8x16xf32>
    %c0_152 = arith.constant 0 : index
    %c0_153 = arith.constant 0 : index
    %161 = vector.load %arg24[%c0_152, %c0_153] : memref<1x16xf32, #tpu.memory_space<vmem>>, vector<1x16xf32>
    %162 = vector.broadcast %161 : vector<1x16xf32> to vector<8x16xf32>
    %163 = arith.addf %160, %162 : vector<8x16xf32>
    %cst_154 = arith.constant 0.000000e+00 : f32
    %164 = vector.broadcast %cst_154 : f32 to vector<8x16xf32>
    %165 = arith.maximumf %163, %164 : vector<8x16xf32>
    %166 = arith.truncf %165 : vector<8x16xf32> to vector<8x16xbf16>
    %c0_155 = arith.constant 0 : index
    %c0_156 = arith.constant 0 : index
    %167 = vector.load %arg25[%c0_155, %c0_156] : memref<16x128xbf16, #tpu.memory_space<vmem>>, vector<16x128xbf16>
    %cst_157 = arith.constant dense<0.000000e+00> : vector<8x128xf32>
    %168 = tpu.matmul %166, %167, %cst_157 {dimension_numbers = #tpu.dot_dimension_numbers<[1], [0], [0], [1], [0, 0, 1, 1], [], []>} : vector<8x16xbf16>, vector<16x128xbf16>, vector<8x128xf32> -> vector<8x128xf32>
    %c0_158 = arith.constant 0 : index
    %c0_159 = arith.constant 0 : index
    %169 = vector.load %arg26[%c0_158, %c0_159] : memref<1x128xf32, #tpu.memory_space<vmem>>, vector<1x128xf32>
    %170 = vector.broadcast %169 : vector<1x128xf32> to vector<8x128xf32>
    %171 = arith.addf %168, %170 : vector<8x128xf32>
    %172 = arith.negf %171 : vector<8x128xf32>
    %173 = math.exp %172 : vector<8x128xf32>
    %cst_160 = arith.constant 1.000000e+00 : f32
    %174 = vector.broadcast %cst_160 : f32 to vector<8x128xf32>
    %175 = arith.addf %174, %173 : vector<8x128xf32>
    %176 = arith.divf %174, %175 : vector<8x128xf32>
    %177 = vector.shape_cast %176 : vector<8x128xf32> to vector<8x1x128xf32>
    %178 = vector.broadcast %177 : vector<8x1x128xf32> to vector<8x8x128xf32>
    %179 = arith.mulf %154, %178 : vector<8x8x128xf32>
    %cst_161 = arith.constant dense<0.000000e+00> : vector<8x128xf32>
    %180 = vector.multi_reduction <add>, %179, %cst_161 [1] : vector<8x8x128xf32> to vector<8x128xf32>
    %cst_162 = arith.constant 1.250000e-01 : f32
    %181 = vector.broadcast %cst_162 : f32 to vector<8x128xf32>
    %182 = arith.mulf %180, %181 : vector<8x128xf32>
    %183 = arith.truncf %182 : vector<8x128xf32> to vector<8x128xbf16>
    %c0_163 = arith.constant 0 : index
    %c0_164 = arith.constant 0 : index
    %184 = vector.load %arg27[%c0_163, %c0_164] : memref<128x128xbf16, #tpu.memory_space<vmem>>, vector<128x128xbf16>
    %cst_165 = arith.constant dense<0.000000e+00> : vector<8x128xf32>
    %185 = tpu.matmul %183, %184, %cst_165 {dimension_numbers = #tpu.dot_dimension_numbers<[1], [0], [0], [1], [0, 0, 1, 1], [], []>} : vector<8x128xbf16>, vector<128x128xbf16>, vector<8x128xf32> -> vector<8x128xf32>
    %c0_166 = arith.constant 0 : index
    %c0_167 = arith.constant 0 : index
    %186 = vector.load %arg28[%c0_166, %c0_167] : memref<1x128xf32, #tpu.memory_space<vmem>>, vector<1x128xf32>
    %187 = vector.broadcast %186 : vector<1x128xf32> to vector<8x128xf32>
    %188 = arith.addf %185, %187 : vector<8x128xf32>
    %c0_168 = arith.constant 0 : index
    %c0_169 = arith.constant 0 : index
    %189 = vector.load %arg29[%c0_168, %c0_169] : memref<8x128xf32, #tpu.memory_space<vmem>>, vector<8x128xf32>
    tpu.vector_store %arg29[%c0_168, %c0_169], %188 {strides = array<i32>} : memref<8x128xf32, #tpu.memory_space<vmem>>, vector<8x128xf32>,
    return
  }
  func.func @transform_0(%arg0: i32) -> (i32, i32) {
    %c0_i32 = arith.constant 0 : i32
    %c0_i32_0 = arith.constant 0 : i32
    return %arg0, %c0_i32 : i32, i32
  }
  func.func @transform_1(%arg0: i32) -> (i32, i32) {
    %c0_i32 = arith.constant 0 : i32
    %c0_i32_0 = arith.constant 0 : i32
    %c0_i32_1 = arith.constant 0 : i32
    return %c0_i32, %c0_i32_0 : i32, i32
  }
  func.func @transform_2(%arg0: i32) -> (i32, i32) {
    %c0_i32 = arith.constant 0 : i32
    %c0_i32_0 = arith.constant 0 : i32
    %c0_i32_1 = arith.constant 0 : i32
    return %c0_i32, %c0_i32_0 : i32, i32
  }
  func.func @transform_3(%arg0: i32) -> (i32, i32) {
    %c0_i32 = arith.constant 0 : i32
    %c0_i32_0 = arith.constant 0 : i32
    %c0_i32_1 = arith.constant 0 : i32
    return %c0_i32, %c0_i32_0 : i32, i32
  }
  func.func @transform_4(%arg0: i32) -> (i32, i32) {
    %c0_i32 = arith.constant 0 : i32
    %c0_i32_0 = arith.constant 0 : i32
    %c0_i32_1 = arith.constant 0 : i32
    return %c0_i32, %c0_i32_0 : i32, i32
  }
  func.func @transform_5(%arg0: i32) -> (i32, i32) {
    %c0_i32 = arith.constant 0 : i32
    %c0_i32_0 = arith.constant 0 : i32
    %c0_i32_1 = arith.constant 0 : i32
    return %c0_i32, %c0_i32_0 : i32, i32
  }
  func.func @transform_6(%arg0: i32) -> (i32, i32) {
    %c0_i32 = arith.constant 0 : i32
    %c0_i32_0 = arith.constant 0 : i32
    %c0_i32_1 = arith.constant 0 : i32
    return %c0_i32, %c0_i32_0 : i32, i32
  }
  func.func @transform_7(%arg0: i32) -> (i32, i32) {
    %c0_i32 = arith.constant 0 : i32
    %c0_i32_0 = arith.constant 0 : i32
    %c0_i32_1 = arith.constant 0 : i32
    return %c0_i32, %c0_i32_0 : i32, i32
  }
  func.func @transform_8(%arg0: i32) -> (i32, i32) {
    %c0_i32 = arith.constant 0 : i32
    %c0_i32_0 = arith.constant 0 : i32
    %c0_i32_1 = arith.constant 0 : i32
    return %c0_i32, %c0_i32_0 : i32, i32
  }
  func.func @transform_9(%arg0: i32) -> (i32, i32) {
    %c0_i32 = arith.constant 0 : i32
    %c0_i32_0 = arith.constant 0 : i32
    %c0_i32_1 = arith.constant 0 : i32
    return %c0_i32, %c0_i32_0 : i32, i32
  }
  func.func @transform_10(%arg0: i32) -> (i32, i32) {
    %c0_i32 = arith.constant 0 : i32
    %c0_i32_0 = arith.constant 0 : i32
    %c0_i32_1 = arith.constant 0 : i32
    return %c0_i32, %c0_i32_0 : i32, i32
  }
  func.func @transform_11(%arg0: i32) -> (i32, i32) {
    %c0_i32 = arith.constant 0 : i32
    %c0_i32_0 = arith.constant 0 : i32
    %c0_i32_1 = arith.constant 0 : i32
    return %c0_i32, %c0_i32_0 : i32, i32
  }
  func.func @transform_12(%arg0: i32) -> (i32, i32) {
    %c0_i32 = arith.constant 0 : i32
    %c0_i32_0 = arith.constant 0 : i32
    %c0_i32_1 = arith.constant 0 : i32
    return %c0_i32, %c0_i32_0 : i32, i32
  }
  func.func @transform_13(%arg0: i32) -> (i32, i32) {
    %c0_i32 = arith.constant 0 : i32
    %c0_i32_0 = arith.constant 0 : i32
    %c0_i32_1 = arith.constant 0 : i32
    return %c0_i32, %c0_i32_0 : i32, i32
  }
  func.func @transform_14(%arg0: i32) -> (i32, i32) {
    %c0_i32 = arith.constant 0 : i32
    %c0_i32_0 = arith.constant 0 : i32
    %c0_i32_1 = arith.constant 0 : i32
    return %c0_i32, %c0_i32_0 : i32, i32
  }
  func.func @transform_15(%arg0: i32) -> (i32, i32) {
    %c0_i32 = arith.constant 0 : i32
    %c0_i32_0 = arith.constant 0 : i32
    %c0_i32_1 = arith.constant 0 : i32
    return %c0_i32, %c0_i32_0 : i32, i32
  }
  func.func @transform_16(%arg0: i32) -> (i32, i32) {
    %c0_i32 = arith.constant 0 : i32
    %c0_i32_0 = arith.constant 0 : i32
    %c0_i32_1 = arith.constant 0 : i32
    return %c0_i32, %c0_i32_0 : i32, i32
  }
  func.func @transform_17(%arg0: i32) -> (i32, i32) {
    %c0_i32 = arith.constant 0 : i32
    %c0_i32_0 = arith.constant 0 : i32
    %c0_i32_1 = arith.constant 0 : i32
    return %c0_i32, %c0_i32_0 : i32, i32
  }
  func.func @transform_18(%arg0: i32) -> (i32, i32) {
    %c0_i32 = arith.constant 0 : i32
    %c0_i32_0 = arith.constant 0 : i32
    %c0_i32_1 = arith.constant 0 : i32
    return %c0_i32, %c0_i32_0 : i32, i32
  }
  func.func @transform_19(%arg0: i32) -> (i32, i32) {
    %c0_i32 = arith.constant 0 : i32
    %c0_i32_0 = arith.constant 0 : i32
    %c0_i32_1 = arith.constant 0 : i32
    return %c0_i32, %c0_i32_0 : i32, i32
  }
  func.func @transform_20(%arg0: i32) -> (i32, i32) {
    %c0_i32 = arith.constant 0 : i32
    %c0_i32_0 = arith.constant 0 : i32
    %c0_i32_1 = arith.constant 0 : i32
    return %c0_i32, %c0_i32_0 : i32, i32
  }
  func.func @transform_21(%arg0: i32) -> (i32, i32) {
    %c0_i32 = arith.constant 0 : i32
    %c0_i32_0 = arith.constant 0 : i32
    %c0_i32_1 = arith.constant 0 : i32
    return %c0_i32, %c0_i32_0 : i32, i32
  }
  func.func @transform_22(%arg0: i32) -> (i32, i32) {
    %c0_i32 = arith.constant 0 : i32
    %c0_i32_0 = arith.constant 0 : i32
    %c0_i32_1 = arith.constant 0 : i32
    return %c0_i32, %c0_i32_0 : i32, i32
  }
  func.func @transform_23(%arg0: i32) -> (i32, i32) {
    %c0_i32 = arith.constant 0 : i32
    %c0_i32_0 = arith.constant 0 : i32
    %c0_i32_1 = arith.constant 0 : i32
    return %c0_i32, %c0_i32_0 : i32, i32
  }
  func.func @transform_24(%arg0: i32) -> (i32, i32) {
    %c0_i32 = arith.constant 0 : i32
    %c0_i32_0 = arith.constant 0 : i32
    %c0_i32_1 = arith.constant 0 : i32
    return %c0_i32, %c0_i32_0 : i32, i32
  }
  func.func @transform_25(%arg0: i32) -> (i32, i32) {
    %c0_i32 = arith.constant 0 : i32
    %c0_i32_0 = arith.constant 0 : i32
    %c0_i32_1 = arith.constant 0 : i32
    return %c0_i32, %c0_i32_0 : i32, i32
  }
  func.func @transform_26(%arg0: i32) -> (i32, i32) {
    %c0_i32 = arith.constant 0 : i32
    %c0_i32_0 = arith.constant 0 : i32
    %c0_i32_1 = arith.constant 0 : i32
    return %c0_i32, %c0_i32_0 : i32, i32
  }
  func.func @transform_27(%arg0: i32) -> (i32, i32) {
    %c0_i32 = arith.constant 0 : i32
    %c0_i32_0 = arith.constant 0 : i32
    %c0_i32_1 = arith.constant 0 : i32
    return %c0_i32, %c0_i32_0 : i32, i32
  }
  func.func @transform_28(%arg0: i32) -> (i32, i32) {
    %c0_i32 = arith.constant 0 : i32
    %c0_i32_0 = arith.constant 0 : i32
    return %arg0, %c0_i32 : i32, i32
  }
}

</mosaic_0001>

<bundles_post_ra>
// kernel: mul.4
= control target key start
LH: loop header
LB: loop body
LE: loop exit
PB: predicated region body
PF: predicated region fallthrough
CT: control target
= control target key end

     0   :  { %vm4_vm0 = vcmask 1047556   ;;  %s99_s14 = smov 35   ;;  %s100_s19 = smov 25   ;;  %vm6_vm1 = vcmask 39936   ;;  %vm16_vm2 = vcmask 326936   ;;  %vm26_vm3 = vcmask 285936   ;;  %s196_s0 = inlined_call_operand.vmem [shape: f32[8,8,5], index: 0, kind: input, shape index: {}]   ;;  %s197_s1 = inlined_call_operand.vmem [shape: f32[8,40], index: 1, kind: output, shape index: {}]  }
   0x1   :  { %v78_v0 = vld [vmem:[%s196_s0 + $0x7] ss:$8 sm:$0xf]   ;;  %v82_v3 = vld [vmem:[%s196_s0 + $0x5] ss:$8 sm:$0xf]  }
   0x2   :  { %v79_v1 = vld [vmem:[%s196_s0 + $0x7] ss:$8 sm:$0xf0]   ;;  %v83_v4 = vld [vmem:[%s196_s0 + $0x5] ss:$8 sm:$0xf0]  }
   0x3   :  { %v13_v2 = vsel %vm4_vm0, %v79_v1, %v78_v0  ;;  %v33_v5 = vsel %vm4_vm0, %v83_v4, %v82_v3  ;;  %v80_v6 = vld [vmem:[%s196_s0 + $0x6] ss:$8 sm:$0xf]   ;;  %v84_v9 = vld [vmem:[%s196_s0 + $0x4] ss:$8 sm:$0xf]  }
   0x4   :  { %14 = vrot.lane.b32.xlu0 %v13_v2, %s99_s14  ;;  %v81_v7 = vld [vmem:[%s196_s0 + $0x6] ss:$8 sm:$0xf0]   ;;  %34 = vrot.lane.b32.xlu1 %v33_v5, %s100_s19  ;;  %v85_v10 = vld [vmem:[%s196_s0 + $0x4] ss:$8 sm:$0xf0]  }
   0x5   :  { %v23_v8 = vsel %vm4_vm0, %v81_v7, %v80_v6  ;;  %v86_v11 = vld [vmem:[%s196_s0 + $0x3] ss:$8 sm:$0xf]   ;;  %v43_v12 = vsel %vm4_vm0, %v85_v10, %v84_v9  ;;  %s101_s28 = smov 30   ;;  %s102_s4 = smov 20   ;;  %vm36_vm4 = vcmask 244936  }
   0x6   :  { %v87_v13 = vld [vmem:[%s196_s0 + $0x3] ss:$8 sm:$0xf0]   ;;  %v88_v14 = vld [vmem:[%s196_s0 + $0x2] ss:$8 sm:$0xf]  }
   0x7   :  { %v89_v15 = vld [vmem:[%s196_s0 + $0x2] ss:$8 sm:$0xf0]   ;;  %v53_v16 = vsel %vm4_vm0, %v87_v13, %v86_v11  ;;  %v90_v17 = vld [vmem:[%s196_s0 + $0x1] ss:$8 sm:$0xf]  }
   0x8   :  { %24 = vrot.lane.b32.xlu0 %v23_v8, %s101_s28  ;;  %44 = vrot.lane.b32.xlu1 %v43_v12, %s102_s4  ;;  %v63_v18 = vsel %vm4_vm0, %v89_v15, %v88_v14  ;;  %v91_v19 = vld [vmem:[%s196_s0 + $0x1] ss:$8 sm:$0xf0]   ;;  %v2_v20 = vld [vmem:[%s196_s0] ss:$8 sm:$0xf]  }
   0x9   :  { %v3_v21 = vld [vmem:[%s196_s0] ss:$8 sm:$0xf0]   ;;  %s103_s0 = smov 15   ;;  %s104_s13 = smov 10   ;;  %v73_v23 = vsel %vm4_vm0, %v91_v19, %v90_v17  ;;  %vm46_vm5 = vcmask 203936  }
   0xa   :  { %v5_v22 = vsel %vm4_vm0, %v3_v21, %v2_v20  ;;  %s105_s16 = smov 5   ;;  %vm56_vm6 = vcmask 162936   ;;  %vm66_vm7 = vcmask 121936   ;;  %vm76_vm8 = vcmask 80936  }
   0xb   :  { %7 = vst.msk [vmem:[%s197_s1] sm:$0xff] %vm6_vm1, %v5_v22  }
   0xc   :  { %54 = vrot.lane.b32.xlu0 %v53_v16, %s103_s0  ;;  %64 = vrot.lane.b32.xlu1 %v63_v18, %s104_s13 }
  0x10   :  { %74 = vrot.lane.b32.xlu0 %v73_v23, %s105_s16 }
  0x76   :  { %v15_v24 = vpop.permute.xlu0 %14   ;;  %v35_v25 = vpop.permute.xlu1 %34  }
  0x77   :  { %17 = vst.msk [vmem:[%s197_s1] sm:$0xff] %vm16_vm2, %v15_v24  }
  0x7a   :  { %v25_v26 = vpop.permute.xlu0 %24   ;;  %v45_v27 = vpop.permute.xlu1 %44  }
  0x7b   :  { %27 = vst.msk [vmem:[%s197_s1] sm:$0xff] %vm26_vm3, %v25_v26  }
  0x7c   :  { %37 = vst.msk [vmem:[%s197_s1] sm:$0xff] %vm36_vm4, %v35_v25  }
  0x7d   :  { %47 = vst.msk [vmem:[%s197_s1] sm:$0xff] %vm46_vm5, %v45_v27  }
  0x7e   :  { %v55_v28 = vpop.permute.xlu0 %54   ;;  %v65_v29 = vpop.permute.xlu1 %64  }
  0x7f   :  { %57 = vst.msk [vmem:[%s197_s1] sm:$0xff] %vm56_vm6, %v55_v28  }
  0x80   :  { %67 = vst.msk [vmem:[%s197_s1] sm:$0xff] %vm66_vm7, %v65_v29  }
  0x82   :  { %v75_v30 = vpop.permute.xlu0 %74  }
  0x83   :  { %77 = vst.msk [vmem:[%s197_s1] sm:$0xff] %vm76_vm8, %v75_v30  }

// kernel: senet_forward.1
= control target key start
LH: loop header
LB: loop body
LE: loop exit
PB: predicated region body
PF: predicated region fallthrough
CT: control target
= control target key end

     0   :  { %v6804_v0 = vmov 0   ;;  %vm6806_vm0 = vmmov 0   ;;  %vm1250_vm1 = vcmask 1041409   ;;  %vm1252_vm2 = vcmask 1042434   ;;  %s8757_s2 = inlined_call_operand.vmem [shape: bf16[384,128], index: 2, kind: input, shape index: {}]   ;;  %s8758_s0 = inlined_call_operand.vmem [shape: bf16[320,384], index: 0, kind: input, shape index: {}]   ;;  %s8759_s3 = inlined_call_operand.vmem [shape: f32[1,128], index: 3, kind: input, shape index: {}]   ;;  %s8760_s4 = inlined_call_operand.vmem [shape: bf16[128,32], index: 4, kind: input, shape index: {}]   ;;  %s8761_s6 = inlined_call_operand.vmem [shape: bf16[32,128], index: 6, kind: input, shape index: {}]   ;;  %s8762_s5 = inlined_call_operand.vmem [shape: f32[1,32], index: 5, kind: input, shape index: {}]   ;;  %s8763_s1 = inlined_call_operand.vmem [shape: bf16[64,320], index: 1, kind: input, shape index: {}]   ;;  %s8764_s8 = inlined_call_operand.vmem [shape: bf16[1152,128], index: 8, kind: input, shape index: {}]   ;;  %s8765_s7 = inlined_call_operand.vmem [shape: f32[1,128], index: 7, kind: input, shape index: {}]   ;;  %s8766_s10 = inlined_call_operand.vmem [shape: bf16[128,32], index: 10, kind: input, shape index: {}]   ;;  %s8767_s12 = inlined_call_operand.vmem [shape: bf16[32,128], index: 12, kind: input, shape index: {}]   ;;  %s8768_s9 = inlined_call_operand.vmem [shape: f32[1,128], index: 9, kind: input, shape index: {}]   ;;  %s8769_s11 = inlined_call_operand.vmem [shape: f32[1,32], index: 11, kind: input, shape index: {}]   ;;  %s8770_s14 = inlined_call_operand.vmem [shape: bf16[640,128], index: 14, kind: input, shape index: {}]   ;;  %s8771_s13 = inlined_call_operand.vmem [shape: f32[1,128], index: 13, kind: input, shape index: {}]   ;;  %s8772_s16 = inlined_call_operand.vmem [shape: bf16[128,16], index: 16, kind: input, shape index: {}]   ;;  %s8773_s18 = inlined_call_operand.vmem [shape: bf16[16,128], index: 18, kind: input, shape index: {}]   ;;  %s8774_s15 = inlined_call_operand.vmem [shape: f32[1,128], index: 15, kind: input, shape index: {}]   ;;  %s8775_s17 = inlined_call_operand.vmem [shape: f32[1,16], index: 17, kind: input, shape index: {}]   ;;  %s8776_s20 = inlined_call_operand.vmem [shape: bf16[640,128], index: 20, kind: input, shape index: {}]   ;;  %s8777_s19 = inlined_call_operand.vmem [shape: f32[1,128], index: 19, kind: input, shape index: {}]   ;;  %s8778_s22 = inlined_call_operand.vmem [shape: bf16[128,16], index: 22, kind: input, shape index: {}]   ;;  %s8779_s21 = inlined_call_operand.vmem [shape: f32[1,128], index: 21, kind: input, shape index: {}]   ;;  %s8780_s24 = inlined_call_operand.vmem [shape: bf16[16,128], index: 24, kind: input, shape index: {}]   ;;  %s8781_s23 = inlined_call_operand.vmem [shape: f32[1,16], index: 23, kind: input, shape index: {}]   ;;  %s8782_s26 = inlined_call_operand.vmem [shape: bf16[128,128], index: 26, kind: input, shape index: {}]   ;;  %s8783_s25 = inlined_call_operand.vmem [shape: f32[1,128], index: 25, kind: input, shape index: {}]   ;;  %s8784_s27 = inlined_call_operand.vmem [shape: f32[1,128], index: 27, kind: input, shape index: {}]   ;;  %s8785_s28 = inlined_call_operand.vmem [shape: f32[8,128], index: 28, kind: output, shape index: {}]  }
   0x1   :  { %8839 = sst [smem:[#allocation13_spill]] %s8757_s2  ;;  %689 = vmatprep.subr.bf16.mxu0 %v6804_v0  ;;  %vm1254_vm3 = vcmask 1043459   ;;  %vm1256_vm4 = vcmask 1044484   ;;  %vm1258_vm5 = vcmask 1045509   ;;  %vm1260_vm6 = vcmask 1046534  }
   0x2   :  { %8840 = sst [smem:[#allocation14_spill]] %s8758_s0  ;;  %vm1262_vm7 = vcmask 1047559   ;;  %vm1379_vm8 = vcmask 261120   ;;  %vm1655_vm9 = vcmask 523264   ;;  %vm4057_vm10 = vcmask 130048  }
   0x3   :  { %8841 = sst [smem:[#allocation15_spill]] %s8759_s3  ;;  %s8853_s30 = sld [smem:[#allocation14_spill]] }
   0x4   :  { %8842 = sst [smem:[#allocation16_spill]] %s8760_s4 }
   0x5   :  { %8843 = sst [smem:[#allocation17_spill]] %s8761_s6 }
   0x6   :  { %8844 = sst [smem:[#allocation18_spill]] %s8762_s5  ;;  %s8869_s3 = sld [smem:[#allocation17_spill]] }
   0x7   :  { %8845 = sst [smem:[#allocation19_spill]] %s8763_s1 }
   0x8   :  { %8846 = sst [smem:[#allocation20_spill]] %s8764_s8 }
   0x9   :  { %8847 = sst [smem:[#allocation21_spill]] %s8765_s7  ;;  %v6496_v15 = vld [vmem:[%s8853_s30 + $0x4] ss:$12 sps:$4 sm:$0xff]   ;;  %v6497_v16 = vld [vmem:[%s8853_s30 + $0x8] ss:$12 sps:$4 sm:$0xff]   ;;  %s8870_s7 = sld [smem:[#allocation18_spill]] }
   0xa   :  { %8848 = sst [smem:[#allocation22_spill]] %s8766_s10  ;;  %s8852_s10 = sld [smem:[#allocation13_spill]]  ;;  %721 = vmatprep.mubr.bf16.mxu0 %v6496_v15  ;;  %6210 = vmatprep.mubr.bf16.mxu1 %v6497_v16  ;;  %v6498_v22 = vld [vmem:[%s8853_s30 + $0x20] ss:$12 sps:$4 sm:$0xff]   ;;  %v6505_v23 = vld [vmem:[%s8853_s30 + $0x38] ss:$12 sps:$4 sm:$0xff]  }
   0xb   :  { %8849 = sst [smem:[#allocation23_spill]] %s8767_s12  ;;  %v6506_v26 = vld [vmem:[%s8853_s30 + $0x50] ss:$12 sps:$4 sm:$0xff]   ;;  %v6513_v27 = vld [vmem:[%s8853_s30 + $0x68] ss:$12 sps:$4 sm:$0xff]  }
   0xc   :  { %8850 = sst [smem:[#allocation24_spill]] %s8768_s9  ;;  %v6514_v30 = vld [vmem:[%s8853_s30 + $0x80] ss:$12 sps:$4 sm:$0xff]   ;;  %v6521_v31 = vld [vmem:[%s8853_s30 + $0x98] ss:$12 sps:$4 sm:$0xff]   ;;  %s8854_s12 = sld [smem:[#allocation15_spill]] }
   0xd   :  { %8851 = sst [smem:[#allocation25_spill]] %s8769_s11  ;;  %v6494_v33 = vld [vmem:[%s8853_s30] ss:$12 sps:$4 sm:$0xff]   ;;  %v6499_v34 = vld [vmem:[%s8853_s30 + $0x1c] ss:$12 sps:$4 sm:$0xff]   ;;  %s8855_s9 = sld [smem:[#allocation16_spill]] }
   0xe   :  { %v6522_v35 = vld [vmem:[%s8853_s30 + $0xb0] ss:$12 sps:$4 sm:$0xff]   ;;  %v6529_v36 = vld [vmem:[%s8853_s30 + $0xc8] ss:$12 sps:$4 sm:$0xff]   ;;  %v6501_v37 = vld [vmem:[%s8853_s30 + $0x18] ss:$12 sps:$4 sm:$0xff]  }
   0xf   :  { %v6502_v38 = vld [vmem:[%s8853_s30 + $0x34] ss:$12 sps:$4 sm:$0xff]   ;;  %v6537_v40 = vld [vmem:[%s8853_s30 + $0xf8] ss:$12 sps:$4 sm:$0xff]   ;;  %v6504_v41 = vld [vmem:[%s8853_s30 + $0x30] ss:$12 sps:$4 sm:$0xff]  }
  0x10   :  { %v6470_v1 = vld [vmem:[%s8852_s10] sm:$0xff]   ;;  %v6471_v2 = vld [vmem:[%s8852_s10 + $0x8] sm:$0xff]   ;;  %v6472_v3 = vld [vmem:[%s8852_s10 + $0x10] sm:$0xff]   ;;  %s8922_s0 = sld [smem:[#allocation23_spill]]  ;;  %s8923_s5 = sld [smem:[#allocation24_spill]] }
  0x11   :  { %690 = vmatpush1.bf16.msra.mxu0 %v6470_v1  ;;  %v6479_v4 = vld [vmem:[%s8852_s10 + $0x80] sm:$0xff]   ;;  %v6473_v5 = vld [vmem:[%s8852_s10 + $0x18] sm:$0xff]   ;;  %v6481_v6 = vld [vmem:[%s8852_s10 + $0x88] sm:$0xff]  }
  0x12   :  { %691 = vmatprep.subr.bf16.mxu0 %v6804_v0  ;;  %6194 = vmatprep.subr.bf16.mxu1 %v6479_v4  ;;  %v6483_v7 = vld [vmem:[%s8852_s10 + $0x90] sm:$0xff]   ;;  %v6474_v8 = vld [vmem:[%s8852_s10 + $0x20] sm:$0xff]   ;;  %v6485_v9 = vld [vmem:[%s8852_s10 + $0x98] sm:$0xff]  }
  0x13   :  { %6195 = vmatpush3.bf16.msra.mxu1 %v6479_v4  ;;  %v6475_v10 = vld [vmem:[%s8852_s10 + $0x28] sm:$0xff]   ;;  %v6487_v11 = vld [vmem:[%s8852_s10 + $0xa0] sm:$0xff]   ;;  %v6476_v12 = vld [vmem:[%s8852_s10 + $0x30] sm:$0xff]  }
  0x14   :  { %6196 = vmatprep.subr.bf16.mxu1 %v6481_v6  ;;  %v6477_v13 = vld [vmem:[%s8852_s10 + $0x38] sm:$0xff]   ;;  %v6489_v14 = vld [vmem:[%s8852_s10 + $0xa8] sm:$0xff]   ;;  %v6491_v17 = vld [vmem:[%s8852_s10 + $0xb0] sm:$0xff]  }
  0x15   :  { %692 = vmatpush1.bf16.msra.mxu0 %v6471_v2  ;;  %v6478_v18 = vld [vmem:[%s8852_s10 + $0x40] sm:$0xff]   ;;  %v6493_v19 = vld [vmem:[%s8852_s10 + $0xb8] sm:$0xff]   ;;  %v6480_v20 = vld [vmem:[%s8852_s10 + $0x48] sm:$0xff]  }
  0x16   :  { %693 = vmatprep.subr.bf16.mxu0 %v6804_v0  ;;  %v6482_v21 = vld [vmem:[%s8852_s10 + $0x50] sm:$0xff]   ;;  %v6484_v24 = vld [vmem:[%s8852_s10 + $0x58] sm:$0xff]   ;;  %v6486_v25 = vld [vmem:[%s8852_s10 + $0x60] sm:$0xff]  }
  0x17   :  { %6197 = vmatpush3.bf16.msra.mxu1 %v6481_v6  ;;  %v6488_v28 = vld [vmem:[%s8852_s10 + $0x68] sm:$0xff]   ;;  %v6490_v29 = vld [vmem:[%s8852_s10 + $0x70] sm:$0xff]   ;;  %v6492_v32 = vld [vmem:[%s8852_s10 + $0x78] sm:$0xff]   ;;  %s8872_s10 = sld [smem:[#allocation20_spill]] }
  0x18   :  { %6198 = vmatprep.subr.bf16.mxu1 %v6483_v7  ;;  %v6530_v39 = vld [vmem:[%s8853_s30 + $0xe0] ss:$12 sps:$4 sm:$0xff]   ;;  %v6538_v43 = vld [vmem:[%s8853_s30 + $0x110] ss:$12 sps:$4 sm:$0xff]   ;;  %v6545_v44 = vld [vmem:[%s8853_s30 + $0x128] ss:$12 sps:$4 sm:$0xff]  }
  0x19   :  { %694 = vmatpush1.bf16.msra.mxu0 %v6472_v3  ;;  %v6507_v42 = vld [vmem:[%s8853_s30 + $0x4c] ss:$12 sps:$4 sm:$0xff]   ;;  %v6509_v45 = vld [vmem:[%s8853_s30 + $0x48] ss:$12 sps:$4 sm:$0xff]   ;;  %v6510_v46 = vld [vmem:[%s8853_s30 + $0x64] ss:$12 sps:$4 sm:$0xff]  }
  0x1a   :  { %695 = vmatprep.subr.bf16.mxu0 %v6804_v0  ;;  %v6546_v47 = vld [vmem:[%s8853_s30 + $0x140] ss:$12 sps:$4 sm:$0xff]   ;;  %v6553_v48 = vld [vmem:[%s8853_s30 + $0x158] ss:$12 sps:$4 sm:$0xff]   ;;  %v6515_v50 = vld [vmem:[%s8853_s30 + $0x7c] ss:$12 sps:$4 sm:$0xff]  }
  0x1b   :  { %6199 = vmatpush3.bf16.msra.mxu1 %v6483_v7  ;;  %v6512_v49 = vld [vmem:[%s8853_s30 + $0x60] ss:$12 sps:$4 sm:$0xff]   ;;  %v6554_v51 = vld [vmem:[%s8853_s30 + $0x170] ss:$12 sps:$4 sm:$0xff]   ;;  %v6561_v52 = vld [vmem:[%s8853_s30 + $0x188] ss:$12 sps:$4 sm:$0xff]  }
  0x1c   :  { %6200 = vmatprep.subr.bf16.mxu1 %v6485_v9  ;;  %v6517_v53 = vld [vmem:[%s8853_s30 + $0x78] ss:$12 sps:$4 sm:$0xff]   ;;  %v6518_v54 = vld [vmem:[%s8853_s30 + $0x94] ss:$12 sps:$4 sm:$0xff]   ;;  %v6520_v57 = vld [vmem:[%s8853_s30 + $0x90] ss:$12 sps:$4 sm:$0xff]  }
  0x1d   :  { %696 = vmatpush1.bf16.msra.mxu0 %v6473_v5  ;;  %v6562_v55 = vld [vmem:[%s8853_s30 + $0x1a0] ss:$12 sps:$4 sm:$0xff]   ;;  %v6569_v56 = vld [vmem:[%s8853_s30 + $0x1b8] ss:$12 sps:$4 sm:$0xff]   ;;  %v6570_v59 = vld [vmem:[%s8853_s30 + $0x1d0] ss:$12 sps:$4 sm:$0xff]  }
  0x1e   :  { %697 = vmatprep.subr.bf16.mxu0 %v6804_v0  ;;  %v6523_v58 = vld [vmem:[%s8853_s30 + $0xac] ss:$12 sps:$4 sm:$0xff]   ;;  %v6525_v60 = vld [vmem:[%s8853_s30 + $0xa8] ss:$12 sps:$4 sm:$0xff]   ;;  %v6526_v61 = vld [vmem:[%s8853_s30 + $0xc4] ss:$12 sps:$4 sm:$0xff]  }
  0x1f   :  { %6201 = vmatpush3.bf16.msra.mxu1 %v6485_v9  ;;  %v6528_v62 = vld [vmem:[%s8853_s30 + $0xc0] ss:$12 sps:$4 sm:$0xff]   ;;  %v6531_v63 = vld [vmem:[%s8853_s30 + $0xdc] ss:$12 sps:$4 sm:$0xff]   ;;  %v6542_v5 = vld [vmem:[%s8853_s30 + $0x124] ss:$12 sps:$4 sm:$0xff]  }
  0x20   :  { %6202 = vmatprep.subr.bf16.mxu1 %v6487_v11  ;;  %v6534_v1 = vld [vmem:[%s8853_s30 + $0xf4] ss:$12 sps:$4 sm:$0xff]   ;;  %v6536_v2 = vld [vmem:[%s8853_s30 + $0xf0] ss:$12 sps:$4 sm:$0xff]   ;;  %v6539_v3 = vld [vmem:[%s8853_s30 + $0x10c] ss:$12 sps:$4 sm:$0xff]  }
  0x21   :  { %698 = vmatpush1.bf16.msra.mxu0 %v6474_v8  ;;  %v6541_v4 = vld [vmem:[%s8853_s30 + $0x108] ss:$12 sps:$4 sm:$0xff]   ;;  %v6544_v6 = vld [vmem:[%s8853_s30 + $0x120] ss:$12 sps:$4 sm:$0xff]   ;;  %v6549_v8 = vld [vmem:[%s8853_s30 + $0x138] ss:$12 sps:$4 sm:$0xff]  }
  0x22   :  { %699 = vmatprep.subr.bf16.mxu0 %v6804_v0  ;;  %v6547_v7 = vld [vmem:[%s8853_s30 + $0x13c] ss:$12 sps:$4 sm:$0xff]   ;;  %v6550_v9 = vld [vmem:[%s8853_s30 + $0x154] ss:$12 sps:$4 sm:$0xff]   ;;  %v6565_v16 = vld [vmem:[%s8853_s30 + $0x198] ss:$12 sps:$4 sm:$0xff]  }
  0x23   :  { %6203 = vmatpush3.bf16.msra.mxu1 %v6487_v11  ;;  %v6555_v11 = vld [vmem:[%s8853_s30 + $0x16c] ss:$12 sps:$4 sm:$0xff]   ;;  %v6563_v15 = vld [vmem:[%s8853_s30 + $0x19c] ss:$12 sps:$4 sm:$0xff]  }
  0x24   :  { %6204 = vmatprep.subr.bf16.mxu1 %v6489_v14 }
  0x25   :  { %700 = vmatpush1.bf16.msra.mxu0 %v6475_v10  ;;  %v6552_v10 = vld [vmem:[%s8853_s30 + $0x150] ss:$12 sps:$4 sm:$0xff]  }
  0x26   :  { %701 = vmatprep.subr.bf16.mxu0 %v6804_v0 }
  0x27   :  { %6205 = vmatpush3.bf16.msra.mxu1 %v6489_v14  ;;  %v6560_v14 = vld [vmem:[%s8853_s30 + $0x180] ss:$12 sps:$4 sm:$0xff]  }
  0x28   :  { %6206 = vmatprep.subr.bf16.mxu1 %v6491_v17 }
  0x29   :  { %702 = vmatpush1.bf16.msra.mxu0 %v6476_v12  ;;  %v6557_v12 = vld [vmem:[%s8853_s30 + $0x168] ss:$12 sps:$4 sm:$0xff]  }
  0x2a   :  { %703 = vmatprep.subr.bf16.mxu0 %v6804_v0 }
  0x2b   :  { %6207 = vmatpush3.bf16.msra.mxu1 %v6491_v17  ;;  %v6566_v17 = vld [vmem:[%s8853_s30 + $0x1b4] ss:$12 sps:$4 sm:$0xff]  }
  0x2c   :  { %6208 = vmatprep.subr.bf16.mxu1 %v6493_v19 }
  0x2d   :  { %704 = vmatpush1.bf16.msra.mxu0 %v6477_v13  ;;  %v6558_v13 = vld [vmem:[%s8853_s30 + $0x184] ss:$12 sps:$4 sm:$0xff]  }
  0x2e   :  { %705 = vmatprep.subr.bf16.mxu0 %v6804_v0 }
  0x2f   :  { %6209 = vmatpush3.bf16.msra.mxu1 %v6493_v19  ;;  %v6571_v19 = vld [vmem:[%s8853_s30 + $0x1cc] ss:$12 sps:$4 sm:$0xff]  }
  0x31   :  { %706 = vmatpush1.bf16.msra.mxu0 %v6478_v18  ;;  %v6568_v18 = vld [vmem:[%s8853_s30 + $0x1b0] ss:$12 sps:$4 sm:$0xff]  }
  0x32   :  { %707 = vmatprep.subr.bf16.mxu0 %v6804_v0  ;;  %6211 = vmatmul.mubr.bf16.vlgmr.msra.gmra.mrb[0].mxu1 %v6498_v22 }
  0x33   :  { %6214 = vmatprep.mubr.bf16.mxu1 %v6505_v23 }
  0x35   :  { %708 = vmatpush1.bf16.msra.mxu0 %v6480_v20  ;;  %v6573_v20 = vld [vmem:[%s8853_s30 + $0x1c8] ss:$12 sps:$4 sm:$0xff]  }
  0x36   :  { %709 = vmatprep.subr.bf16.mxu0 %v6804_v0 }
  0x39   :  { %710 = vmatpush1.bf16.msra.mxu0 %v6482_v21 }
  0x3a   :  { %711 = vmatprep.subr.bf16.mxu0 %v6804_v0  ;;  %6215 = vmatmul.mubr.bf16.gmra.mrb[4].mxu1 %v6506_v26 }
  0x3b   :  { %6218 = vmatprep.mubr.bf16.mxu1 %v6513_v27 }
  0x3d   :  { %712 = vmatpush1.bf16.msra.mxu0 %v6484_v24 }
  0x3e   :  { %713 = vmatprep.subr.bf16.mxu0 %v6804_v0 }
  0x41   :  { %714 = vmatpush1.bf16.msra.mxu0 %v6486_v25 }
  0x42   :  { %715 = vmatprep.subr.bf16.mxu0 %v6804_v0  ;;  %6219 = vmatmul.mubr.bf16.gmra.mrb[8].mxu1 %v6514_v30 }
  0x43   :  { %6222 = vmatprep.mubr.bf16.mxu1 %v6521_v31  ;;  %v7244_v31 = vld [vmem:[%s8854_s12] ss:$0 sm:$0xff]  ;;  %s8873_s12 = sld [smem:[#allocation21_spill]] }
  0x45   :  { %716 = vmatpush1.bf16.msra.mxu0 %v6488_v28 }
  0x46   :  { %717 = vmatprep.subr.bf16.mxu0 %v6804_v0 }
  0x49   :  { %718 = vmatpush1.bf16.msra.mxu0 %v6490_v29 }
  0x4a   :  { %719 = vmatprep.subr.bf16.mxu0 %v6804_v0  ;;  %6223 = vmatmul.mubr.bf16.gmra.mrb[12].mxu1 %v6522_v35  ;;  %v6533_v0 = vld [vmem:[%s8853_s30 + $0xd8] ss:$12 sps:$4 sm:$0xff]   ;;  %s8871_s30 = sld [smem:[#allocation19_spill]] }
  0x4b   :  { %6226 = vmatprep.mubr.bf16.mxu1 %v6529_v36  ;;  %v6575_v36 = vld [vmem:[%s8855_s9 + $0x8] sm:$0xff]  }
  0x4d   :  { %720 = vmatpush1.bf16.msra.mxu0 %v6492_v32 }
  0x50   :  { %722 = vmatmul.mubr.bf16.vlgmr.msra.gmra.mrb[0].mxu0 %v6494_v33  ;;  %v8805_v33 = vmov 0.0  }
  0x51   :  { %729 = vmatprep.mubr.bf16.mxu0 %v6499_v34  ;;  %6250 = vmatprep.subr.bf16.mxu1 %v8805_v33  ;;  %1806 = vst [vmem:[#allocation2] sm:$0xf] %v8805_v33  ;;  %1807 = vst [vmem:[#allocation2 + $0x10] sm:$0xf] %v8805_v33  ;;  %v6574_v34 = vld [vmem:[%s8855_s9] sm:$0xff]  }
  0x52   :  { %6227 = vmatmul.mubr.bf16.gmra.mrb[16].mxu1 %v6530_v39  ;;  %1808 = vst [vmem:[#allocation2 + $0x20] sm:$0xf] %v8805_v33  ;;  %1809 = vst [vmem:[#allocation2 + $0x30] sm:$0xf] %v8805_v33 }
  0x53   :  { %6230 = vmatprep.mubr.bf16.mxu1 %v6537_v40  ;;  %1810 = vst [vmem:[#allocation2 + $0x40] sm:$0xf] %v8805_v33  ;;  %1811 = vst [vmem:[#allocation2 + $0x50] sm:$0xf] %v8805_v33  ;;  %6251 = vmatpush3.bf16.msra.mxu1 %v6574_v34 }
  0x54   :  { %1812 = vst [vmem:[#allocation2 + $0x60] sm:$0xf] %v8805_v33  ;;  %1813 = vst [vmem:[#allocation2 + $0x70] sm:$0xf] %v8805_v33  ;;  %6252 = vmatprep.subr.bf16.mxu1 %v8805_v33 }
  0x55   :  { %1814 = vst [vmem:[#allocation2 + $0xc] sm:$0xf] %v8805_v33  ;;  %1815 = vst [vmem:[#allocation2 + $0x1c] sm:$0xf] %v8805_v33 }
  0x56   :  { %1816 = vst [vmem:[#allocation2 + $0x2c] sm:$0xf] %v8805_v33  ;;  %1817 = vst [vmem:[#allocation2 + $0x3c] sm:$0xf] %v8805_v33 }
  0x57   :  { %1818 = vst [vmem:[#allocation2 + $0x4c] sm:$0xf] %v8805_v33  ;;  %1819 = vst [vmem:[#allocation2 + $0x5c] sm:$0xf] %v8805_v33  ;;  %6253 = vmatpush3.bf16.msra.mxu1 %v6575_v36 }
  0x58   :  { %730 = vmatmul.mubr.bf16.gmra.mrb[4].mxu0 %v6501_v37  ;;  %1820 = vst [vmem:[#allocation2 + $0x6c] sm:$0xf] %v8805_v33  ;;  %1821 = vst [vmem:[#allocation2 + $0x7c] sm:$0xf] %v8805_v33  ;;  %6254 = vmatprep.subr.bf16.mxu1 %v8805_v33 }
  0x59   :  { %737 = vmatprep.mubr.bf16.mxu0 %v6502_v38  ;;  %3226 = vst [vmem:[#allocation3] sm:$0x3] %v8805_v33  ;;  %3227 = vst [vmem:[#allocation3 + $0x10] sm:$0x3] %v8805_v33 }
  0x5a   :  { %6231 = vmatmul.mubr.bf16.gmra.mrb[20].mxu1 %v6538_v43  ;;  %3228 = vst [vmem:[#allocation3 + $0x20] sm:$0x3] %v8805_v33  ;;  %3229 = vst [vmem:[#allocation3 + $0x30] sm:$0x3] %v8805_v33 }
  0x5b   :  { %6234 = vmatprep.mubr.bf16.mxu1 %v6545_v44  ;;  %3230 = vst [vmem:[#allocation3 + $0x40] sm:$0x3] %v8805_v33  ;;  %3231 = vst [vmem:[#allocation3 + $0x50] sm:$0x3] %v8805_v33 }
  0x5c   :  { %3232 = vst [vmem:[#allocation3 + $0x60] sm:$0x3] %v8805_v33  ;;  %3233 = vst [vmem:[#allocation3 + $0x70] sm:$0x3] %v8805_v33 }
  0x5d   :  { %3234 = vst [vmem:[#allocation3 + $0xa] sm:$0x3] %v8805_v33  ;;  %3235 = vst [vmem:[#allocation3 + $0x1a] sm:$0x3] %v8805_v33 }
  0x5e   :  { %3236 = vst [vmem:[#allocation3 + $0x2a] sm:$0x3] %v8805_v33  ;;  %3237 = vst [vmem:[#allocation3 + $0x3a] sm:$0x3] %v8805_v33 }
  0x5f   :  { %3238 = vst [vmem:[#allocation3 + $0x4a] sm:$0x3] %v8805_v33  ;;  %3239 = vst [vmem:[#allocation3 + $0x5a] sm:$0x3] %v8805_v33 }
  0x60   :  { %738 = vmatmul.mubr.bf16.gmra.mrb[8].mxu0 %v6504_v41  ;;  %3240 = vst [vmem:[#allocation3 + $0x6a] sm:$0x3] %v8805_v33  ;;  %3241 = vst [vmem:[#allocation3 + $0x7a] sm:$0x3] %v8805_v33 }
  0x61   :  { %745 = vmatprep.mubr.bf16.mxu0 %v6507_v42  ;;  %4205 = vst [vmem:[#allocation4] sm:$0x3] %v8805_v33  ;;  %4206 = vst [vmem:[#allocation4 + $0x10] sm:$0x3] %v8805_v33 }
  0x62   :  { %6235 = vmatmul.mubr.bf16.gmra.mrb[24].mxu1 %v6546_v47  ;;  %4207 = vst [vmem:[#allocation4 + $0x20] sm:$0x3] %v8805_v33  ;;  %4208 = vst [vmem:[#allocation4 + $0x30] sm:$0x3] %v8805_v33 }
  0x63   :  { %6238 = vmatprep.mubr.bf16.mxu1 %v6553_v48  ;;  %4209 = vst [vmem:[#allocation4 + $0x40] sm:$0x3] %v8805_v33  ;;  %4210 = vst [vmem:[#allocation4 + $0x50] sm:$0x3] %v8805_v33 }
  0x64   :  { %4211 = vst [vmem:[#allocation4 + $0x60] sm:$0x3] %v8805_v33  ;;  %4212 = vst [vmem:[#allocation4 + $0x70] sm:$0x3] %v8805_v33 }
  0x65   :  { %4213 = vst [vmem:[#allocation4 + $0xa] sm:$0x3] %v8805_v33  ;;  %4214 = vst [vmem:[#allocation4 + $0x1a] sm:$0x3] %v8805_v33 }
  0x66   :  { %4215 = vst [vmem:[#allocation4 + $0x2a] sm:$0x3] %v8805_v33  ;;  %4216 = vst [vmem:[#allocation4 + $0x3a] sm:$0x3] %v8805_v33 }
  0x67   :  { %4217 = vst [vmem:[#allocation4 + $0x4a] sm:$0x3] %v8805_v33  ;;  %4218 = vst [vmem:[#allocation4 + $0x5a] sm:$0x3] %v8805_v33 }
  0x68   :  { %746 = vmatmul.mubr.bf16.gmra.mrb[12].mxu0 %v6509_v45  ;;  %4219 = vst [vmem:[#allocation4 + $0x6a] sm:$0x3] %v8805_v33  ;;  %4220 = vst [vmem:[#allocation4 + $0x7a] sm:$0x3] %v8805_v33 }
  0x69   :  { %753 = vmatprep.mubr.bf16.mxu0 %v6510_v46 }
  0x6a   :  { %6239 = vmatmul.mubr.bf16.gmra.mrb[28].mxu1 %v6554_v51 }
  0x6b   :  { %6242 = vmatprep.mubr.bf16.mxu1 %v6561_v52 }
  0x70   :  { %754 = vmatmul.mubr.bf16.gmra.mrb[16].mxu0 %v6512_v49 }
  0x71   :  { %761 = vmatprep.mubr.bf16.mxu0 %v6515_v50 }
  0x72   :  { %6243 = vmatmul.mubr.bf16.gmra.mrb[32].mxu1 %v6562_v55 }
  0x73   :  { %6246 = vmatprep.mubr.bf16.mxu1 %v6569_v56 }
  0x78   :  { %762 = vmatmul.mubr.bf16.gmra.mrb[20].mxu0 %v6517_v53 }
  0x79   :  { %769 = vmatprep.mubr.bf16.mxu0 %v6518_v54 }
  0x7a   :  { %6247 = vmatmul.mubr.bf16.gmra.mrb[36].mxu1 %v6570_v59 }
  0x7b   :  { %6266 = vmatprep.mubr.msk.bf16.mxu1 %vm6806_vm0, %v8805_v33 }
  0x80   :  { %770 = vmatmul.mubr.bf16.gmra.mrb[24].mxu0 %v6520_v57 }
  0x81   :  { %777 = vmatprep.mubr.bf16.mxu0 %v6523_v58 }
  0x88   :  { %778 = vmatmul.mubr.bf16.gmra.mrb[28].mxu0 %v6525_v60 }
  0x89   :  { %785 = vmatprep.mubr.bf16.mxu0 %v6526_v61  ;;  %v6576_v61 = vld [vmem:[%s8855_s9 + $0x10] sm:$0xff]  }
  0x8a   :  { %6255 = vmatpush3.bf16.msra.mxu1 %v6576_v61 }
  0x8b   :  { %6256 = vmatprep.subr.bf16.mxu1 %v8805_v33 }
  0x90   :  { %786 = vmatmul.mubr.bf16.gmra.mrb[32].mxu0 %v6528_v62  ;;  %v6577_v62 = vld [vmem:[%s8855_s9 + $0x18] sm:$0xff]  }
  0x91   :  { %793 = vmatprep.mubr.bf16.mxu0 %v6531_v63  ;;  %6257 = vmatpush3.bf16.msra.mxu1 %v6577_v62 }
  0x92   :  { %6258 = vmatprep.subr.bf16.mxu1 %v8805_v33 }
  0x98   :  { %794 = vmatmul.mubr.bf16.gmra.mrb[36].mxu0 %v6533_v0 }
  0x99   :  { %801 = vmatprep.mubr.bf16.mxu0 %v6534_v1 }
  0xa0   :  { %802 = vmatmul.mubr.bf16.gmra.mrb[40].mxu0 %v6536_v2 }
  0xa1   :  { %809 = vmatprep.mubr.bf16.mxu0 %v6539_v3 }
  0xa8   :  { %810 = vmatmul.mubr.bf16.gmra.mrb[44].mxu0 %v6541_v4 }
  0xa9   :  { %817 = vmatprep.mubr.bf16.mxu0 %v6542_v5 }
  0xb0   :  { %818 = vmatmul.mubr.bf16.gmra.mrb[48].mxu0 %v6544_v6 }
  0xb1   :  { %825 = vmatprep.mubr.bf16.mxu0 %v6547_v7 }
  0xb8   :  { %826 = vmatmul.mubr.bf16.gmra.mrb[52].mxu0 %v6549_v8 }
  0xb9   :  { %833 = vmatprep.mubr.bf16.mxu0 %v6550_v9 }
  0xc0   :  { %834 = vmatmul.mubr.bf16.gmra.mrb[56].mxu0 %v6552_v10 }
  0xc1   :  { %841 = vmatprep.mubr.bf16.mxu0 %v6555_v11 }
  0xc8   :  { %842 = vmatmul.mubr.bf16.gmra.mrb[60].mxu0 %v6557_v12 }
  0xc9   :  { %849 = vmatprep.mubr.bf16.mxu0 %v6558_v13 }
  0xd0   :  { %850 = vmatmul.mubr.bf16.gmra.mrb[64].mxu0 %v6560_v14 }
  0xd1   :  { %857 = vmatprep.mubr.bf16.mxu0 %v6563_v15 }
  0xd8   :  { %858 = vmatmul.mubr.bf16.gmra.mrb[68].mxu0 %v6565_v16 }
  0xd9   :  { %865 = vmatprep.mubr.bf16.mxu0 %v6566_v17 }
  0xe0   :  { %866 = vmatmul.mubr.bf16.gmra.mrb[72].mxu0 %v6568_v18 }
  0xe1   :  { %873 = vmatprep.mubr.bf16.mxu0 %v6571_v19 }
  0xe8   :  { %874 = vmatmul.mubr.bf16.gmra.mrb[76].mxu0 %v6573_v20 }
 0x105   :  { %v7221_v21 = vpop.f32.mrb[0].mxu1 }
 0x106   :  { %v7223_v22 = vpop.f32.mrb[1].mxu1 }
 0x107   :  { %v7225_v23 = vpop.f32.mrb[2].mxu1 }
 0x108   :  { %v7227_v24 = vpop.f32.mrb[3].mxu1 }
 0x10d   :  { %v7229_v25 = vpop.f32.mrb[4].mxu1 }
 0x10e   :  { %v7231_v26 = vpop.f32.mrb[5].mxu1 }
 0x10f   :  { %v7233_v27 = vpop.f32.mrb[6].mxu1 }
 0x110   :  { %v7235_v28 = vpop.f32.mrb[7].mxu1 }
 0x115   :  { %v7237_v29 = vpop.f32.mrb[8].mxu1 }
 0x116   :  { %v7239_v30 = vpop.f32.mrb[9].mxu1 }
 0x117   :  { %v7246_v32 = vpop.f32.mrb[10].mxu1 }
 0x118   :  { %v7300_v35 = vpop.f32.mrb[11].mxu1 }
 0x11d   :  { %v7307_v41 = vpop.f32.mrb[12].mxu1 }
 0x11e   :  { %v7313_v45 = vpop.f32.mrb[13].mxu1 }
 0x11f   :  { %v7316_v46 = vpop.f32.mrb[14].mxu1 }
 0x120   :  { %v7321_v48 = vpop.f32.mrb[15].mxu1 }
 0x123   :  { %v723_v37 = vpop.f32.mrb[0].mxu0 }
 0x124   :  { %v724_v38 = vadd.f32 %v7244_v31, %v723_v37  ;;  %v725_v39 = vpop.f32.mrb[1].mxu0 }
 0x125   :  { %v726_v40 = vpop.f32.mrb[2].mxu0  ;;  %v7324_v53 = vpop.f32.mrb[16].mxu1 }
 0x126   :  { %v727_v42 = vadd.f32 %v7244_v31, %v726_v40  ;;  %v7311_v43 = vadd.f32 %v7223_v22, %v724_v38  ;;  %v728_v44 = vpop.f32.mrb[3].mxu0  ;;  %v7330_v57 = vpop.f32.mrb[17].mxu1 }
 0x127   :  { %v7332_v58 = vpop.f32.mrb[18].mxu1 }
 0x128   :  { %v7319_v47 = vadd.f32 %v7227_v24, %v727_v42  ;;  %v7337_v60 = vpop.f32.mrb[19].mxu1 }
 0x12b   :  { %v731_v49 = vpop.f32.mrb[4].mxu0 }
 0x12c   :  { %v732_v50 = vadd.f32 %v7244_v31, %v731_v49  ;;  %v733_v51 = vpop.f32.mrb[5].mxu0 }
 0x12d   :  { %v734_v52 = vpop.f32.mrb[6].mxu0  ;;  %v7347_v3 = vpop.f32.mrb[20].mxu1 }
 0x12e   :  { %v7327_v54 = vadd.f32 %v7221_v21, %v732_v50  ;;  %v735_v55 = vadd.f32 %v7244_v31, %v734_v52  ;;  %v736_v56 = vpop.f32.mrb[7].mxu0  ;;  %v7353_v7 = vpop.f32.mrb[21].mxu1 }
 0x12f   :  { %v7355_v8 = vpop.f32.mrb[22].mxu1 }
 0x130   :  { %v7335_v59 = vadd.f32 %v7225_v23, %v735_v55  ;;  %v7361_v10 = vpop.f32.mrb[23].mxu1 }
 0x133   :  { %v739_v63 = vpop.f32.mrb[8].mxu0 }
 0x134   :  { %v740_v0 = vadd.f32 %v7244_v31, %v739_v63  ;;  %v741_v1 = vpop.f32.mrb[9].mxu0 }
 0x135   :  { %v742_v2 = vpop.f32.mrb[10].mxu0  ;;  %v7364_v15 = vpop.f32.mrb[24].mxu1 }
 0x136   :  { %v743_v4 = vadd.f32 %v7244_v31, %v742_v2  ;;  %v7351_v5 = vadd.f32 %v7231_v26, %v740_v0  ;;  %v744_v6 = vpop.f32.mrb[11].mxu0  ;;  %v7370_v19 = vpop.f32.mrb[25].mxu1 }
 0x137   :  { %v7372_v20 = vpop.f32.mrb[26].mxu1 }
 0x138   :  { %v7359_v9 = vadd.f32 %v7235_v28, %v743_v4  ;;  %v7377_v22 = vpop.f32.mrb[27].mxu1 }
 0x13b   :  { %v747_v11 = vpop.f32.mrb[12].mxu0 }
 0x13c   :  { %v748_v12 = vadd.f32 %v7244_v31, %v747_v11  ;;  %v749_v13 = vpop.f32.mrb[13].mxu0 }
 0x13d   :  { %v750_v14 = vpop.f32.mrb[14].mxu0  ;;  %v7383_v34 = vpop.f32.mrb[28].mxu1 }
 0x13e   :  { %v7367_v16 = vadd.f32 %v7229_v25, %v748_v12  ;;  %v751_v17 = vadd.f32 %v7244_v31, %v750_v14  ;;  %v752_v18 = vpop.f32.mrb[15].mxu0  ;;  %v6578_v25 = vld [vmem:[%s8855_s9 + $0x20] sm:$0xff]   ;;  %v7389_v38 = vpop.f32.mrb[29].mxu1 }
 0x13f   :  { %6259 = vmatpush3.bf16.msra.mxu1 %v6578_v25  ;;  %v7391_v39 = vpop.f32.mrb[30].mxu1 }
 0x140   :  { %v7375_v21 = vadd.f32 %v7233_v27, %v751_v17  ;;  %6260 = vmatprep.subr.bf16.mxu1 %v8805_v33  ;;  %v7397_v42 = vpop.f32.mrb[31].mxu1  ;;  %v6581_v17 = vld [vmem:[%s8855_s9 + $0x38] sm:$0xff]  }
 0x143   :  { %v755_v23 = vpop.f32.mrb[16].mxu0 }
 0x144   :  { %v756_v24 = vadd.f32 %v7244_v31, %v755_v23  ;;  %v757_v26 = vpop.f32.mrb[17].mxu0 }
 0x145   :  { %v758_v28 = vpop.f32.mrb[18].mxu0 }
 0x146   :  { %v759_v36 = vadd.f32 %v7244_v31, %v758_v28  ;;  %v7387_v37 = vadd.f32 %v7239_v30, %v756_v24  ;;  %v760_v27 = vpop.f32.mrb[19].mxu0  ;;  %v7400_v30 = vpop.f32.mrb[32].mxu1 }
 0x147   :  { %v7406_v61 = vpop.f32.mrb[33].mxu1 }
 0x148   :  { %v7395_v40 = vadd.f32 %v7300_v35, %v759_v36  ;;  %v6579_v35 = vld [vmem:[%s8855_s9 + $0x28] sm:$0xff]   ;;  %v7411_v62 = vpop.f32.mrb[34].mxu1 }
 0x149   :  { %v7416_v0 = vpop.f32.mrb[35].mxu1  ;;  %6261 = vmatpush3.bf16.msra.mxu1 %v6579_v35 }
 0x14a   :  { %6262 = vmatprep.subr.bf16.mxu1 %v8805_v33 }
 0x14b   :  { %v763_v44 = vpop.f32.mrb[20].mxu0 }
 0x14c   :  { %v764_v49 = vadd.f32 %v7244_v31, %v763_v44  ;;  %v765_v50 = vpop.f32.mrb[21].mxu0 }
 0x14d   :  { %v766_v51 = vpop.f32.mrb[22].mxu0  ;;  %v7423_v11 = vpop.f32.mrb[36].mxu1 }
 0x14e   :  { %v7403_v52 = vadd.f32 %v7237_v29, %v764_v49  ;;  %v767_v55 = vadd.f32 %v7244_v31, %v766_v51  ;;  %v768_v56 = vpop.f32.mrb[23].mxu0  ;;  %v6580_v29 = vld [vmem:[%s8855_s9 + $0x30] sm:$0xff]   ;;  %v7430_v14 = vpop.f32.mrb[37].mxu1 }
 0x14f   :  { %6263 = vmatpush3.bf16.msra.mxu1 %v6580_v29  ;;  %v7435_v18 = vpop.f32.mrb[38].mxu1 }
 0x150   :  { %v7414_v63 = vadd.f32 %v7246_v32, %v767_v55  ;;  %6264 = vmatprep.subr.bf16.mxu1 %v8805_v33  ;;  %v7442_v24 = vpop.f32.mrb[39].mxu1 }
 0x153   :  { %v771_v1 = vpop.f32.mrb[24].mxu0  ;;  %6265 = vmatpush3.bf16.msra.mxu1 %v6581_v17 }
 0x154   :  { %v772_v2 = vadd.f32 %v7244_v31, %v771_v1  ;;  %v773_v4 = vpop.f32.mrb[25].mxu0  ;;  %6270 = vmatprep.subr.bf16.mxu1 %v8805_v33 }
 0x155   :  { %v774_v6 = vpop.f32.mrb[26].mxu0 }
 0x156   :  { %v775_v32 = vadd.f32 %v7244_v31, %v774_v6  ;;  %v7428_v12 = vadd.f32 %v7313_v45, %v772_v2  ;;  %v776_v13 = vpop.f32.mrb[27].mxu0 }
 0x158   :  { %v7440_v23 = vadd.f32 %v7321_v48, %v775_v32 }
 0x15b   :  { %v779_v45 = vpop.f32.mrb[28].mxu0 }
 0x15c   :  { %v780_v26 = vadd.f32 %v7244_v31, %v779_v45  ;;  %v781_v25 = vpop.f32.mrb[29].mxu0 }
 0x15d   :  { %v782_v28 = vpop.f32.mrb[30].mxu0 }
 0x15e   :  { %v7447_v36 = vadd.f32 %v7307_v41, %v780_v26  ;;  %v783_v27 = vadd.f32 %v7244_v31, %v782_v28  ;;  %v784_v44 = vpop.f32.mrb[31].mxu0 }
 0x160   :  { %8856 = vst [vmem:[#allocation5_spill] sm:$0xff] %v7447_v36  ;;  %v7451_v49 = vadd.f32 %v7316_v46, %v783_v27 }
 0x162   :  { %8857 = vst [vmem:[#allocation6_spill] sm:$0xff] %v7451_v49 }
 0x163   :  { %v787_v48 = vpop.f32.mrb[32].mxu0 }
 0x164   :  { %v788_v50 = vadd.f32 %v7244_v31, %v787_v48  ;;  %v789_v51 = vpop.f32.mrb[33].mxu0 }
 0x165   :  { %v790_v55 = vpop.f32.mrb[34].mxu0 }
 0x166   :  { %v791_v56 = vadd.f32 %v7244_v31, %v790_v55  ;;  %v7456_v35 = vadd.f32 %v7330_v57, %v788_v50  ;;  %v792_v29 = vpop.f32.mrb[35].mxu0 }
 0x168   :  { %v7459_v41 = vadd.f32 %v7337_v60, %v791_v56 }
 0x16b   :  { %v795_v1 = vpop.f32.mrb[36].mxu0 }
 0x16c   :  { %v796_v2 = vadd.f32 %v7244_v31, %v795_v1  ;;  %v797_v4 = vpop.f32.mrb[37].mxu0 }
 0x16d   :  { %v798_v46 = vpop.f32.mrb[38].mxu0 }
 0x16e   :  { %v7463_v6 = vadd.f32 %v7324_v53, %v796_v2  ;;  %v799_v32 = vadd.f32 %v7244_v31, %v798_v46  ;;  %v800_v13 = vpop.f32.mrb[39].mxu0 }
 0x170   :  { %v7467_v17 = vadd.f32 %v7332_v58, %v799_v32 }
 0x173   :  { %v803_v57 = vpop.f32.mrb[40].mxu0 }
 0x174   :  { %v804_v45 = vadd.f32 %v7244_v31, %v803_v57  ;;  %v805_v26 = vpop.f32.mrb[41].mxu0 }
 0x175   :  { %v806_v60 = vpop.f32.mrb[42].mxu0 }
 0x176   :  { %v807_v25 = vadd.f32 %v7244_v31, %v806_v60  ;;  %v7472_v28 = vadd.f32 %v7353_v7, %v804_v45  ;;  %v808_v27 = vpop.f32.mrb[43].mxu0 }
 0x178   :  { %v7475_v53 = vadd.f32 %v7361_v10, %v807_v25 }
 0x17b   :  { %v811_v44 = vpop.f32.mrb[44].mxu0 }
 0x17c   :  { %v812_v48 = vadd.f32 %v7244_v31, %v811_v44  ;;  %v813_v50 = vpop.f32.mrb[45].mxu0 }
 0x17d   :  { %v814_v58 = vpop.f32.mrb[46].mxu0 }
 0x17e   :  { %v7479_v51 = vadd.f32 %v7347_v3, %v812_v48  ;;  %v815_v55 = vadd.f32 %v7244_v31, %v814_v58  ;;  %v816_v56 = vpop.f32.mrb[47].mxu0 }
 0x180   :  { %v7483_v29 = vadd.f32 %v7355_v8, %v815_v55 }
 0x183   :  { %v819_v7 = vpop.f32.mrb[48].mxu0 }
 0x184   :  { %v820_v1 = vadd.f32 %v7244_v31, %v819_v7  ;;  %v821_v2 = vpop.f32.mrb[49].mxu0  ;;  %v8800_v7 = vmax.f32 %v7319_v47, 0.0 }
 0x185   :  { %v822_v10 = vpop.f32.mrb[50].mxu0  ;;  %v8798_v2 = vmax.f32 %v7327_v54, 0.0 }
 0x186   :  { %v823_v4 = vadd.f32 %v7244_v31, %v822_v10  ;;  %v7488_v46 = vadd.f32 %v7370_v19, %v820_v1  ;;  %v824_v32 = vpop.f32.mrb[51].mxu0  ;;  %v8804_v1 = vmax.f32 %v7311_v43, 0.0  ;;  %v8794_v10 = vmax.f32 %v7375_v21, 0.0 }
 0x188   :  { %v7491_v3 = vadd.f32 %v7377_v22, %v823_v4 }
 0x18b   :  { %v827_v13 = vpop.f32.mrb[52].mxu0 }
 0x18c   :  { %v828_v57 = vadd.f32 %v7244_v31, %v827_v13  ;;  %v829_v45 = vpop.f32.mrb[53].mxu0  ;;  %v1115_v13 = vadd.f32 %v8800_v7, %v8804_v1  ;;  %v8816_v1 = vmax.f32 %v7440_v23, 0.0 }
 0x18d   :  { %v830_v8 = vpop.f32.mrb[54].mxu0 }
 0x18e   :  { %v7495_v26 = vadd.f32 %v7364_v15, %v828_v57  ;;  %v831_v60 = vadd.f32 %v7244_v31, %v830_v8  ;;  %v832_v25 = vpop.f32.mrb[55].mxu0  ;;  %v8795_v15 = vmax.f32 %v7367_v16, 0.0  ;;  %v8799_v57 = vmax.f32 %v7456_v35, 0.0 }
 0x18f   :  { %v8803_v8 = vmax.f32 %v7387_v37, 0.0 }
 0x190   :  { %v7499_v27 = vadd.f32 %v7372_v20, %v831_v60  ;;  %v8797_v20 = vmax.f32 %v7359_v9, 0.0  ;;  %v8801_v60 = vmax.f32 %v7414_v63, 0.0 }
 0x193   :  { %v835_v19 = vpop.f32.mrb[56].mxu0 }
 0x194   :  { %v836_v44 = vadd.f32 %v7244_v31, %v835_v19  ;;  %v837_v48 = vpop.f32.mrb[57].mxu0 }
 0x195   :  { %v838_v22 = vpop.f32.mrb[58].mxu0  ;;  %v1116_v48 = vadd.f32 %v1115_v13, %v8798_v2  ;;  %v8813_v2 = vmax.f32 %v7479_v51, 0.0 }
 0x196   :  { %v839_v50 = vadd.f32 %v7244_v31, %v838_v22  ;;  %v7504_v58 = vadd.f32 %v7389_v38, %v836_v44  ;;  %v840_v55 = vpop.f32.mrb[59].mxu0  ;;  %v1125_v38 = vadd.f32 %v8795_v15, %v8797_v20  ;;  %v8812_v20 = vmax.f32 %v7472_v28, 0.0 }
 0x197   :  { %v8802_v55 = vmax.f32 %v7403_v52, 0.0 }
 0x198   :  { %v7508_v56 = vadd.f32 %v7397_v42, %v839_v50  ;;  %v1126_v22 = vadd.f32 %v1125_v38, %v8794_v10  ;;  %v8796_v50 = vmax.f32 %v7451_v49, 0.0  ;;  %v8810_v38 = vmax.f32 %v7459_v41, 0.0 }
 0x19a   :  { %v1145_v13 = vadd.f32 %v8799_v57, %v8796_v50  ;;  %v1127_v10 = vadd.f32 %v1126_v22, %v8803_v8  ;;  %v8817_v50 = vmax.f32 %v7463_v6, 0.0 }
 0x19b   :  { %v843_v4 = vpop.f32.mrb[60].mxu0 }
 0x19c   :  { %v844_v32 = vadd.f32 %v7244_v31, %v843_v4  ;;  %v845_v42 = vpop.f32.mrb[61].mxu0  ;;  %v8807_v4 = vmax.f32 %v7428_v12, 0.0 }
 0x19d   :  { %v846_v45 = vpop.f32.mrb[62].mxu0  ;;  %v8808_v42 = vmax.f32 %v7495_v26, 0.0 }
 0x19e   :  { %v7528_v25 = vadd.f32 %v7383_v34, %v844_v32  ;;  %v847_v19 = vadd.f32 %v7244_v31, %v846_v45  ;;  %v848_v44 = vpop.f32.mrb[63].mxu0  ;;  %v8815_v32 = vmax.f32 %v7335_v59, 0.0  ;;  %v8811_v45 = vmax.f32 %v7475_v53, 0.0 }
 0x19f   :  { %v1146_v44 = vadd.f32 %v1145_v13, %v8810_v38  ;;  %v8822_v13 = vmax.f32 %v7467_v17, 0.0 }
 0x1a0   :  { %8858 = vst [vmem:[#allocation7_spill] sm:$0xff] %v7528_v25  ;;  %v7540_v34 = vadd.f32 %v7391_v39, %v847_v19  ;;  %v1135_v39 = vadd.f32 %v8801_v60, %v8802_v55  ;;  %v8809_v19 = vmax.f32 %v7491_v3, 0.0  ;;  %v8814_v60 = vmax.f32 %v7499_v27, 0.0 }
 0x1a1   :  { %v1147_v33 = vadd.f32 %v1146_v44, %v8817_v50  ;;  %v8823_v44 = vmax.f32 %v7488_v46, 0.0 }
 0x1a2   :  { %8859 = vst [vmem:[#allocation8_spill] sm:$0xff] %v7540_v34  ;;  %v1136_v7 = vadd.f32 %v1135_v39, %v8807_v4  ;;  %v1165_v22 = vadd.f32 %v8808_v42, %v8809_v19  ;;  %v1155_v39 = vadd.f32 %v8811_v45, %v8812_v20  ;;  %v8818_v42 = vmax.f32 %v7504_v58, 0.0 }
 0x1a3   :  { %v851_v57 = vpop.f32.mrb[64].mxu0  ;;  %v8820_v45 = vmax.f32 %v7483_v29, 0.0  ;;  %v8819_v19 = vmax.f32 %v7528_v25, 0.0 }
 0x1a4   :  { %v852_v55 = vadd.f32 %v7244_v31, %v851_v57  ;;  %v853_v8 = vpop.f32.mrb[65].mxu0  ;;  %v1156_v38 = vadd.f32 %v1155_v39, %v8813_v2  ;;  %v1166_v20 = vadd.f32 %v1165_v22, %v8814_v60  ;;  %v8862_v39 = vmax.f32 %v7395_v40, 0.0 }
 0x1a5   :  { %v854_v4 = vpop.f32.mrb[66].mxu0  ;;  %v8825_v60 = vmax.f32 %v7508_v56, 0.0 }
 0x1a6   :  { %v855_v57 = vadd.f32 %v7244_v31, %v854_v4  ;;  %v7581_v8 = vadd.f32 %v7406_v61, %v852_v55  ;;  %v856_v15 = vpop.f32.mrb[67].mxu0  ;;  %v1137_v55 = vadd.f32 %v1136_v7, %v8816_v1  ;;  %v1128_v2 = vadd.f32 %v1127_v10, %v8862_v39 }
 0x1a7   :  { %v1117_v15 = vadd.f32 %v1116_v48, %v8815_v32  ;;  %v1167_v22 = vadd.f32 %v1166_v20, %v8818_v42  ;;  %v8864_v48 = vmax.f32 %v7351_v5, 0.0  ;;  %v8865_v7 = vmax.f32 %v7447_v36, 0.0 }
 0x1a8   :  { %8860 = vst [vmem:[#allocation9_spill] sm:$0xff] %v7581_v8  ;;  %v8821_v4 = vmax.f32 %v7581_v8, 0.0  ;;  %v7594_v61 = vadd.f32 %v7416_v0, %v855_v57  ;;  %v8863_v0 = vmax.f32 %v7540_v34, 0.0  ;;  %v1157_v50 = vadd.f32 %v1156_v38, %v8820_v45 }
 0x1a9   :  { %v1118_v32 = vadd.f32 %v1117_v15, %v8864_v48  ;;  %v1138_v1 = vadd.f32 %v1137_v55, %v8865_v7  ;;  %v1148_v20 = vadd.f32 %v1147_v33, %v8822_v13  ;;  %v1129_v55 = vrot.slane %v1128_v2, 4 }
 0x1aa   :  { %8861 = vst [vmem:[#allocation10_spill] sm:$0xff] %v7594_v61  ;;  %v1175_v57 = vadd.f32 %v8863_v0, %v8819_v19  ;;  %v8829_v42 = vmax.f32 %v7594_v61, 0.0  ;;  %v1158_v15 = vadd.f32 %v1157_v50, %v8823_v44  ;;  %v1168_v38 = vadd.f32 %v1167_v22, %v8825_v60 }
 0x1ab   :  { %v859_v10 = vpop.f32.mrb[68].mxu0  ;;  %v1149_v13 = vrot.slane %v1148_v20, 4  ;;  %v1130_v36 = vadd.f32 %v1129_v55, %v1128_v2 }
 0x1ac   :  { %v1176_v39 = vadd.f32 %v1175_v57, %v8821_v4  ;;  %v860_v0 = vadd.f32 %v7244_v31, %v859_v10  ;;  %v861_v19 = vpop.f32.mrb[69].mxu0  ;;  %v1119_v57 = vrot.slane %v1118_v32, 4  ;;  %v1139_v4 = vrot.slane %v1138_v1, 4 }
 0x1ad   :  { %v862_v48 = vpop.f32.mrb[70].mxu0  ;;  %v1159_v44 = vrot.slane %v1158_v15, 4  ;;  %v1169_v22 = vrot.slane %v1168_v38, 4  ;;  %v1150_v60 = vadd.f32 %v1149_v13, %v1148_v20  ;;  %v1131_v34 = vrot.slane %v1130_v36, 2 }
 0x1ae   :  { %v7627_v7 = vadd.f32 %v7400_v30, %v860_v0  ;;  %v863_v33 = vadd.f32 %v7244_v31, %v862_v48  ;;  %v864_v45 = vpop.f32.mrb[71].mxu0  ;;  %v1177_v19 = vadd.f32 %v1176_v39, %v8829_v42  ;;  %v1120_v0 = vadd.f32 %v1119_v57, %v1118_v32 }
 0x1af   :  { %v1140_v48 = vadd.f32 %v1139_v4, %v1138_v1  ;;  %v1160_v39 = vadd.f32 %v1159_v44, %v1158_v15  ;;  %v1170_v25 = vadd.f32 %v1169_v22, %v1168_v38  ;;  %v1151_v1 = vrot.slane %v1150_v60, 2 }
 0x1b0   :  { %v8834_v10 = vmax.f32 %v7627_v7, 0.0  ;;  %v7634_v50 = vadd.f32 %v7411_v62, %v863_v33  ;;  %v1121_v33 = vrot.slane %v1120_v0, 2  ;;  %v1132_v44 = vadd.f32 %v1131_v34, %v1130_v36 }
 0x1b1   :  { %v1171_v20 = vrot.slane %v1170_v25, 2 }
 0x1b2   :  { %v1178_v30 = vadd.f32 %v1177_v19, %v8834_v10  ;;  %v1141_v19 = vrot.slane %v1140_v48, 2  ;;  %v8835_v15 = vmax.f32 %v7634_v50, 0.0  ;;  %v1122_v38 = vadd.f32 %v1121_v33, %v1120_v0 }
 0x1b3   :  { %v867_v45 = vpop.f32.mrb[72].mxu0  ;;  %v1133_v34 = vrot.slane %v1132_v44, 1 }
 0x1b4   :  { %v1179_v8 = vrot.slane %v1178_v30, 4  ;;  %v868_v49 = vadd.f32 %v7244_v31, %v867_v45  ;;  %v869_v61 = vpop.f32.mrb[73].mxu0 }
 0x1b5   :  { %v870_v42 = vpop.f32.mrb[74].mxu0  ;;  %v1161_v61 = vrot.slane %v1160_v39, 2 }
 0x1b6   :  { %v871_v62 = vadd.f32 %v7244_v31, %v870_v42  ;;  %v7641_v2 = vadd.f32 %v7430_v14, %v868_v49  ;;  %v872_v55 = vpop.f32.mrb[75].mxu0  ;;  %v1180_v32 = vadd.f32 %v1179_v8, %v1178_v30  ;;  %v1142_v42 = vadd.f32 %v1141_v19, %v1140_v48 }
 0x1b7   :  { %v1152_v49 = vadd.f32 %v1151_v1, %v1150_v60  ;;  %v1162_v45 = vadd.f32 %v1161_v61, %v1160_v39  ;;  %v1123_v55 = vrot.slane %v1122_v38, 1 }
 0x1b8   :  { %v8832_v13 = vmax.f32 %v7641_v2, 0.0  ;;  %v7645_v4 = vadd.f32 %v7442_v24, %v871_v62  ;;  %v1181_v57 = vrot.slane %v1180_v32, 2  ;;  %v1172_v62 = vadd.f32 %v1171_v20, %v1170_v25 }
 0x1b9   :  { %v1143_v33 = vrot.slane %v1142_v42, 1  ;;  %v1153_v1 = vrot.slane %v1152_v49, 1  ;;  %v1163_v61 = vrot.slane %v1162_v45, 1  ;;  %v1134_v25 = vadd.f32 %v1133_v34, %v1132_v44 }
 0x1ba   :  { %8866 = vst [vmem:[#allocation11_spill] sm:$0xff] %v7645_v4  ;;  %v1185_v8 = vadd.f32 %v8832_v13, %v8835_v15  ;;  %v8833_v22 = vmax.f32 %v7645_v4, 0.0  ;;  %v1182_v19 = vadd.f32 %v1181_v57, %v1180_v32  ;;  %v1173_v20 = vrot.slane %v1172_v62, 1 }
 0x1bb   :  { %v875_v14 = vpop.f32.mrb[76].mxu0  ;;  %v1124_v32 = vadd.f32 %v1123_v55, %v1122_v38  ;;  %v1154_v57 = vadd.f32 %v1153_v1, %v1152_v49 }
 0x1bc   :  { %v876_v24 = vadd.f32 %v7244_v31, %v875_v14  ;;  %v877_v30 = vpop.f32.mrb[77].mxu0  ;;  %v1186_v13 = vadd.f32 %v1185_v8, %v8833_v22  ;;  %v1174_v22 = vadd.f32 %v1173_v20, %v1172_v62 }
 0x1bd   :  { %v878_v36 = vpop.f32.mrb[78].mxu0  ;;  %v1183_v30 = vrot.slane %v1182_v19, 1  ;;  %v1195_v44 = vmul.f32 0.025, %v1124_v32  ;;  %v1198_v34 = vmul.f32 0.025, %v1154_v57 }
 0x1be   :  { %v7655_v0 = vadd.f32 %v7423_v11, %v876_v24  ;;  %v879_v48 = vadd.f32 %v7244_v31, %v878_v36  ;;  %v880_v60 = vpop.f32.mrb[79].mxu0  ;;  %v1144_v24 = vadd.f32 %v1143_v33, %v1142_v42  ;;  %v1164_v36 = vadd.f32 %v1163_v61, %v1162_v45 }
 0x1bf   :  { %v1196_v60 = vmul.f32 0.025, %v1134_v25  ;;  %v1184_v10 = vadd.f32 %v1183_v30, %v1182_v19  ;;  %v1203_v38 = vpack.c.bf16 %v1195_v44, %v1195_v44  ;;  %v1206_v49 = vpack.c.bf16 %v1198_v34, %v1198_v34  ;;  %v6582_v34 = vld [vmem:[%s8869_s3] sm:$0xff]  }
 0x1c0   :  { %8867 = vst [vmem:[#allocation12_spill] sm:$0xff] %v7655_v0  ;;  %v8837_v14 = vmax.f32 %v7655_v0, 0.0  ;;  %v7662_v39 = vadd.f32 %v7435_v18, %v879_v48  ;;  %v1197_v48 = vmul.f32 0.025, %v1144_v24  ;;  %v1199_v0 = vmul.f32 0.025, %v1164_v36 }
 0x1c1   :  { %v1201_v33 = vmul.f32 0.025, %v1184_v10  ;;  %v1242_v19 = vunpack.c.l.b16 %v1203_v38  ;;  %v1245_v20 = vunpack.c.l.b16 %v1206_v49  ;;  %v8868_v44 = vmov 0.0  }
 0x1c2   :  { %v1187_v11 = vadd.f32 %v1186_v13, %v8837_v14  ;;  %v1114_v31 = vmax.f32 %v7662_v39, 0.0  ;;  %v1204_v13 = vpack.c.bf16 %v1196_v60, %v1196_v60  ;;  %v1200_v14 = vmul.f32 0.025, %v1174_v22  ;;  %v6593_v39 = vld [vmem:[%s8871_s30 + $0x4c] ss:$12 sps:$4 sm:$0xff]  }
 0x1c3   :  { %v1205_v42 = vpack.c.bf16 %v1197_v48, %v1197_v48  ;;  %v1207_v1 = vpack.c.bf16 %v1199_v0, %v1199_v0  ;;  %v1209_v25 = vpack.c.bf16 %v1201_v33, %v1201_v33 }
 0x1c4   :  { %v1188_v8 = vadd.f32 %v1187_v11, %v1114_v31  ;;  %v1243_v11 = vunpack.c.l.b16 %v1204_v13  ;;  %v1208_v45 = vpack.c.bf16 %v1200_v14, %v1200_v14  ;;  %v6583_v13 = vld [vmem:[%s8869_s3 + $0x8] sm:$0xff]   ;;  %s8921_s3 = sld [smem:[#allocation22_spill]] }
 0x1c5   :  { %v1244_v62 = vunpack.c.l.b16 %v1205_v42  ;;  %v1246_v30 = vunpack.c.l.b16 %v1207_v1  ;;  %v5473_v42 = vld [vmem:[%s8870_s7] ss:$0 sm:$0xff] }
 0x1c6   :  { %v1189_v18 = vrot.slane %v1188_v8, 4  ;;  %v1251_v22 = vsel %vm1250_vm1, %v1243_v11, %v1242_v19  ;;  %v1247_v10 = vunpack.c.l.b16 %v1208_v45  ;;  %v6602_v19 = vld [vmem:[%s8872_s10 + $0xc8] sm:$0xff]  }
 0x1c8   :  { %v1190_v15 = vadd.f32 %v1189_v18, %v1188_v8 }
 0x1ca   :  { %v1191_v4 = vrot.slane %v1190_v15, 2 }
 0x1cc   :  { %v1192_v55 = vadd.f32 %v1191_v4, %v1190_v15  ;;  %v1253_v4 = vsel %vm1252_vm2, %v1244_v62, %v1251_v22  ;;  %v1248_v15 = vunpack.c.l.b16 %v1209_v25  ;;  %v6600_v62 = vld [vmem:[%s8872_s10 + $0xc0] sm:$0xff]  }
 0x1cd   :  { %v1255_v0 = vsel %vm1254_vm3, %v1245_v20, %v1253_v4  ;;  %v6601_v25 = vld [vmem:[%s8872_s10 + $0x80] sm:$0xff]   ;;  %5835 = vmatprep.subr.bf16.mxu0 %v6600_v62  ;;  %v6603_v20 = vld [vmem:[%s8872_s10 + $0x88] sm:$0xff]   ;;  %v1434_v4 = vlaneseq }
 0x1ce   :  { %v1193_v61 = vrot.slane %v1192_v55, 1  ;;  %v1257_v57 = vsel %vm1256_vm4, %v1246_v30, %v1255_v0  ;;  %5836 = vmatpush3.bf16.msra.mxu0 %v6601_v25  ;;  %v6605_v30 = vld [vmem:[%s8872_s10 + $0x90] sm:$0xff]   ;;  %v5482_v22 = vld [vmem:[%s8873_s12] ss:$0 sm:$0xff]  ;;  %s8924_s12 = sld [smem:[#allocation25_spill]] }
 0x1cf   :  { %v1259_v8 = vsel %vm1258_vm5, %v1247_v10, %v1257_v57  ;;  %5837 = vmatprep.subr.bf16.mxu0 %v6602_v19  ;;  %v6606_v10 = vld [vmem:[%s8872_s10 + $0xd8] sm:$0xff]   ;;  %v6608_v0 = vld [vmem:[%s8872_s10 + $0xe0] sm:$0xff]  }
 0x1d0   :  { %v1194_v24 = vadd.f32 %v1193_v61, %v1192_v55  ;;  %v1261_v60 = vsel %vm1260_vm6, %v1248_v15, %v1259_v8  ;;  %v6586_v61 = vld [vmem:[%s8871_s30 + $0x4] ss:$12 sps:$4 sm:$0xff]   ;;  %v1435_v8 = vshrl.u32 %v1434_v4, 7 }
 0x1d2   :  { %v1202_v32 = vmul.f32 0.025, %v1194_v24  ;;  %v6604_v24 = vld [vmem:[%s8872_s10 + $0xd0] sm:$0xff]   ;;  %5838 = vmatpush3.bf16.msra.mxu0 %v6603_v20 }
 0x1d3   :  { %5839 = vmatprep.subr.bf16.mxu0 %v6604_v24 }
 0x1d4   :  { %v1210_v14 = vpack.c.bf16 %v1202_v32, %v1202_v32  ;;  %v6607_v32 = vld [vmem:[%s8872_s10 + $0x98] sm:$0xff]  }
 0x1d6   :  { %v1249_v36 = vunpack.c.l.b16 %v1210_v14  ;;  %5840 = vmatpush3.bf16.msra.mxu0 %v6605_v30 }
 0x1d7   :  { %5841 = vmatprep.subr.bf16.mxu0 %v6606_v10 }
 0x1d8   :  { %v1263_v18 = vsel %vm1262_vm7, %v1249_v36, %v1261_v60 }
 0x1d9   :  { %v1264_v48 = vpack.c.b16 %v1263_v18, %v1263_v18 }
 0x1da   :  { %5842 = vmatpush3.bf16.msra.mxu0 %v6607_v32  ;;  %v8874_v32 = vmax.f32 %v7311_v43, 0.0  ;;  %v8879_v43 = vmax.f32 %v7467_v17, 0.0 }
 0x1db   :  { %6267 = vmatmul.mubr.bf16.vlgmr.msra.gmra.mrb[40].mxu1 %v1264_v48  ;;  %v6609_v48 = vld [vmem:[%s8872_s10 + $0xa0] sm:$0xff]   ;;  %5843 = vmatprep.subr.bf16.mxu0 %v6608_v0 }
 0x1dc   :  { %6274 = vmatprep.mubr.msk.bf16.mxu1 %vm6806_vm0, %v8868_v44  ;;  %6271 = vmatpush3.bf16.msra.mxu1 %v6582_v34 }
 0x1dd   :  { %6272 = vmatprep.subr.bf16.mxu1 %v8868_v44 }
 0x1de   :  { %5844 = vmatpush3.bf16.msra.mxu0 %v6609_v48 }
 0x1e0   :  { %6273 = vmatpush3.bf16.msra.mxu1 %v6583_v13 }
 0x2ae   :  { %v1348_v33 = vpop.f32.mrb[40].mxu1 }
 0x2af   :  { %v1349_v38 = vadd.f32 %v5473_v42, %v1348_v33  ;;  %v6268_v49 = vpop.f32.mrb[41].mxu1  ;;  %v7725_v42 = vsub.s32 0, %v1435_v8  ;;  %v6807_v33 = vmov 1966171168  }
 0x2b0   :  { %v1351_v55 = vpop.f32.mrb[42].mxu1 }
 0x2b1   :  { %v1354_v1 = vmax.f32 %v1349_v38, 0.0  ;;  %v6269_v11 = vpop.f32.mrb[43].mxu1  ;;  %v1432_v38 = vunpack.c.l.s4 %v6807_v33 }
 0x2b3   :  { %v1355_v45 = vpack.c.bf16 %v1354_v1, %v1354_v1  ;;  %v1433_v49 = vunpack.c.0.s8 %v1432_v38 }
 0x2b5   :  { %6275 = vmatmul.mubr.msk.bf16.vlgmr.msra.gmra.mrb[44].mxu1 %vm1379_vm8, %v1355_v45  ;;  %v7727_v55 = vsub.s32 %v1433_v49, %v1435_v8  ;;  %v8881_v49 = vmax.f32 %v7335_v59, 0.0  ;;  %v8885_v59 = vmax.f32 %v7479_v51, 0.0 }
 0x2b6   :  { %1700 = vmatprep.mubr.bf16.mxu1 %v6586_v61 }
 0x388   :  { %v1417_v15 = vpop.f32.mrb[44].mxu1 }
 0x389   :  { %v1418_v14 = vadd.f32 %v5482_v22, %v1417_v15  ;;  %v6276_v57 = vpop.f32.mrb[45].mxu1  ;;  %v8875_v15 = vmax.f32 %v7319_v47, 0.0 }
 0x38a   :  { %v1420_v36 = vpop.f32.mrb[46].mxu1  ;;  %v8876_v57 = vmax.f32 %v7456_v35, 0.0  ;;  %v8880_v35 = vmax.f32 %v7327_v54, 0.0 }
 0x38b   :  { %v5486_v60 = vmul.f32 -1.442695, %v1418_v14  ;;  %v6277_v18 = vpop.f32.mrb[47].mxu1  ;;  %v8877_v36 = vmax.f32 %v7459_v41, 0.0 }
 0x38c   :  { %v8878_v18 = vmax.f32 %v7463_v6, 0.0  ;;  %v8882_v6 = vmax.f32 %v7472_v28, 0.0 }
 0x38d   :  { %6788 = vpow2.f32 %v5486_v60 }
 0x397   :  { %v6789_v34 = vpop.eup %6788 }
 0x398   :  { %v1426_v13 = vadd.f32 1.0, %v6789_v34 }
 0x39a   :  { %6790 = vrcp.f32 %v1426_v13 }
 0x3a4   :  { %v6791_v1 = vpop.eup %6790 }
 0x3a5   :  { %v1430_v11 = vcombine.high %v6791_v1, %v6791_v1  ;;  %v1437_v45 = vrot.slane %v6791_v1, %v7727_v55 }
 0x3a7   :  { %v1444_v61 = vrot.slane %v1430_v11, %v7727_v55  ;;  %v1445_v62 = vcombine.high %v1437_v45, %v1437_v45  ;;  %v1453_v25 = vrot.slane %v1437_v45, %v7727_v55  ;;  %v8883_v45 = vmax.f32 %v7475_v53, 0.0 }
 0x3a8   :  { %v8887_v53 = vmax.f32 %v7351_v5, 0.0 }
 0x3a9   :  { %v1467_v19 = vrot.slane %v1445_v62, %v7727_v55  ;;  %v1460_v20 = vrot.slane %v1444_v61, %v7727_v55  ;;  %v1482_v24 = vrot.slane %v1453_v25, %v7725_v42  ;;  %v1446_v10 = vcombine.high %v1444_v61, %v1444_v61 }
 0x3ab   :  { %v1477_v30 = vcombine.high %v1467_v19, %v1467_v19  ;;  %v1519_v4 = vmul.f32 %v1482_v24, %v8874_v32  ;;  %v1520_v0 = vmul.f32 %v1482_v24, %v8875_v15  ;;  %v1498_v14 = vrot.slane %v1460_v20, %v7725_v42 }
 0x3ac   :  { %v1486_v13 = vrot.slane %v1467_v19, %v7725_v42  ;;  %v1521_v38 = vmul.f32 %v1482_v24, %v8880_v35  ;;  %v1522_v41 = vmul.f32 %v1482_v24, %v8881_v49  ;;  %v1474_v61 = vrot.slane %v1446_v10, %v7727_v55 }
 0x3ad   :  { %v7736_v22 = vrot.slane %v1477_v30, %v7725_v42  ;;  %v1575_v33 = vpack.c.bf16 %v1520_v0, %v1519_v4  ;;  %v1539_v11 = vmul.f32 %v1498_v14, %v8882_v6  ;;  %v1540_v17 = vmul.f32 %v1498_v14, %v8883_v45 }
 0x3ae   :  { %v1576_v62 = vpack.c.bf16 %v1522_v41, %v1521_v38  ;;  %v8884_v19 = vmax.f32 %v7359_v9, 0.0  ;;  %v1541_v32 = vmul.f32 %v1498_v14, %v8885_v59  ;;  %v8886_v4 = vmax.f32 %v7483_v29, 0.0 }
 0x3af   :  { %v1535_v8 = vmul.f32 %v7736_v22, %v8876_v57  ;;  %v1536_v60 = vmul.f32 %v7736_v22, %v8877_v36  ;;  %v1537_v48 = vmul.f32 %v7736_v22, %v8878_v18  ;;  %v1538_v34 = vmul.f32 %v7736_v22, %v8879_v43 }
 0x3b0   :  { %v1524_v54 = vmul.f32 %v1486_v13, %v8884_v19  ;;  %v1585_v30 = vpack.c.bf16 %v1540_v17, %v1539_v11  ;;  %v1542_v15 = vmul.f32 %v1498_v14, %v8886_v4  ;;  %v1502_v28 = vrot.slane %v1474_v61, %v7725_v42  ;;  %v8902_v19 = vld [vmem:[#allocation7_spill] sm:$0xff] }
 0x3b1   :  { %v1583_v47 = vpack.c.bf16 %v1536_v60, %v1535_v8  ;;  %v1584_v1 = vpack.c.bf16 %v1538_v34, %v1537_v48  ;;  %v1523_v0 = vmul.f32 %v1482_v24, %v8887_v53  ;;  %v1475_v10 = vcombine.high %v1453_v25, %v1453_v25 }
 0x3b2   :  { %v8888_v8 = vmax.f32 %v7367_v16, 0.0  ;;  %v8889_v36 = vmax.f32 %v7375_v21, 0.0  ;;  %v1586_v51 = vpack.c.bf16 %v1542_v15, %v1541_v32  ;;  %v8890_v18 = vmax.f32 %v7491_v3, 0.0  ;;  %v8906_v15 = vld [vmem:[#allocation6_spill] sm:$0xff] }
 0x3b3   :  { %5747 = vmatprep.subr.bf16.mxu1 %v1583_v47  ;;  %v1577_v57 = vpack.c.bf16 %v1524_v54, %v1523_v0  ;;  %v8891_v48 = vmax.f32 %v7488_v46, 0.0  ;;  %v1490_v5 = vrot.slane %v1475_v10, %v7725_v42  ;;  %v8892_v25 = vmax.f32 %v7387_v37, 0.0  ;;  %v8908_v0 = vld [vmem:[#allocation9_spill] sm:$0xff] }
 0x3b4   :  { %5748 = vmatpush3.bf16.msra.mxu1 %v1575_v33  ;;  %v1525_v9 = vmul.f32 %v1486_v13, %v8888_v8  ;;  %v1526_v60 = vmul.f32 %v1486_v13, %v8889_v36  ;;  %v1544_v29 = vmul.f32 %v1502_v28, %v8890_v18  ;;  %v8893_v16 = vmax.f32 %v7395_v40, 0.0 }
 0x3b5   :  { %5749 = vmatprep.subr.bf16.mxu1 %v1584_v1  ;;  %v1543_v43 = vmul.f32 %v1498_v14, %v8891_v48  ;;  %v1527_v34 = vmul.f32 %v1486_v13, %v8892_v25  ;;  %v8894_v33 = vmax.f32 %v7495_v26, 0.0  ;;  %v8895_v3 = vmax.f32 %v7499_v27, 0.0 }
 0x3b6   :  { %v1578_v24 = vpack.c.bf16 %v1526_v60, %v1525_v9  ;;  %v1528_v47 = vmul.f32 %v1486_v13, %v8893_v16  ;;  %v1476_v49 = vcombine.high %v1460_v20, %v1460_v20  ;;  %v8896_v14 = vmax.f32 %v7403_v52, 0.0  ;;  %v8912_v60 = vld [vmem:[#allocation5_spill] sm:$0xff] }
 0x3b7   :  { %v1587_v21 = vpack.c.bf16 %v1544_v29, %v1543_v43  ;;  %v1545_v35 = vmul.f32 %v1502_v28, %v8894_v33  ;;  %v1546_v38 = vmul.f32 %v1502_v28, %v8895_v3  ;;  %v8897_v37 = vmax.f32 %v7414_v63, 0.0  ;;  %v6589_v3 = vld [vmem:[%s8871_s30 + $0x18] ss:$12 sps:$4 sm:$0xff]  }
 0x3b8   :  { %5750 = vmatpush3.bf16.msra.mxu1 %v1576_v62  ;;  %v1579_v46 = vpack.c.bf16 %v1528_v47, %v1527_v34  ;;  %v1529_v41 = vmul.f32 %v1490_v5, %v8896_v14  ;;  %v8898_v40 = vmax.f32 %v7504_v58, 0.0  ;;  %v8899_v26 = vmax.f32 %v7508_v56, 0.0  ;;  %v8904_v58 = vld [vmem:[#allocation8_spill] sm:$0xff] }
 0x3b9   :  { %5751 = vmatprep.subr.bf16.mxu1 %v1585_v30  ;;  %v1530_v1 = vmul.f32 %v1490_v5, %v8897_v37  ;;  %v1588_v6 = vpack.c.bf16 %v1546_v38, %v1545_v35  ;;  %v1506_v27 = vrot.slane %v1476_v49, %v7725_v42  ;;  %v8900_v45 = vmax.f32 %v7428_v12, 0.0  ;;  %v8919_v38 = vld [vmem:[#allocation12_spill] sm:$0xff]  ;;  %v6596_v37 = vld [vmem:[%s8871_s30 + $0x8] ss:$12 sps:$4 sm:$0xff]  }
 0x3ba   :  { %v1547_v13 = vmul.f32 %v1502_v28, %v8898_v40  ;;  %v1548_v11 = vmul.f32 %v1502_v28, %v8899_v26  ;;  %v8901_v52 = vmax.f32 %v7440_v23, 0.0  ;;  %v8903_v54 = vmax.f32 %v8902_v19, 0.0  ;;  %v6599_v40 = vld [vmem:[%s8871_s30 + $0x50] ss:$12 sps:$4 sm:$0xff]   ;;  %v6611_v26 = vld [vmem:[%s8872_s10 + $0xa8] sm:$0xff]  }
 0x3bb   :  { %v1580_v20 = vpack.c.bf16 %v1530_v1, %v1529_v41  ;;  %v1531_v17 = vmul.f32 %v1490_v5, %v8900_v45  ;;  %v8905_v59 = vmax.f32 %v8904_v58, 0.0  ;;  %v1478_v56 = vcombine.high %v1474_v61, %v1474_v61  ;;  %v6592_v41 = vld [vmem:[%s8871_s30 + $0x30] ss:$12 sps:$4 sm:$0xff]   ;;  %v6597_v1 = vld [vmem:[%s8871_s30 + $0x20] ss:$12 sps:$4 sm:$0xff]  }
 0x3bc   :  { %5752 = vmatpush3.bf16.msra.mxu1 %v1577_v57  ;;  %v1532_v62 = vmul.f32 %v1490_v5, %v8901_v52  ;;  %v1589_v63 = vpack.c.bf16 %v1548_v11, %v1547_v13  ;;  %v1549_v30 = vmul.f32 %v1506_v27, %v8903_v54  ;;  %v8907_v28 = vmax.f32 %v8906_v15, 0.0  ;;  %v8910_v57 = vld [vmem:[#allocation10_spill] sm:$0xff]  ;;  %v6612_v11 = vld [vmem:[%s8872_s10 + $0x40] sm:$0xff]   ;;  %v6617_v52 = vld [vmem:[%s8872_s10 + $0xb0] sm:$0xff]  }
 0x3bd   :  { %5753 = vmatprep.subr.bf16.mxu1 %v1586_v51  ;;  %v1550_v32 = vmul.f32 %v1506_v27, %v8905_v59  ;;  %v8909_v10 = vmax.f32 %v8908_v0, 0.0  ;;  %v8911_v8 = vmax.f32 %v8910_v57, 0.0  ;;  %v1510_v36 = vrot.slane %v1478_v56, %v7725_v42  ;;  %v6610_v13 = vld [vmem:[%s8872_s10 + $0xe8] sm:$0xff]   ;;  %v6620_v19 = vld [vmem:[%s8872_s10 + $0x58] sm:$0xff]   ;;  %v6623_v58 = vld [vmem:[%s8872_s10 + $0x20] sm:$0xff]  }
 0x3be   :  { %v1581_v4 = vpack.c.bf16 %v1532_v62, %v1531_v17  ;;  %v1534_v53 = vmul.f32 %v7736_v22, %v8907_v28  ;;  %v8913_v51 = vmax.f32 %v8912_v60, 0.0  ;;  %v6584_v22 = vld [vmem:[%s8871_s30] ss:$12 sps:$4 sm:$0xff]   ;;  %v8914_v48 = vmax.f32 %v7634_v50, 0.0  ;;  %5845 = vmatprep.subr.bf16.mxu0 %v6610_v13  ;;  %v6616_v17 = vld [vmem:[%s8872_s10 + $0xf0] sm:$0xff]   ;;  %v6621_v54 = vld [vmem:[%s8872_s10 + $0x18] sm:$0xff]  }
 0x3bf   :  { %v1590_v12 = vpack.c.bf16 %v1550_v32, %v1549_v30  ;;  %v1551_v23 = vmul.f32 %v1506_v27, %v8909_v10  ;;  %v1552_v9 = vmul.f32 %v1506_v27, %v8911_v8  ;;  %v8915_v25 = vmax.f32 %v7627_v7, 0.0  ;;  %5846 = vmatpush3.bf16.msra.mxu0 %v6611_v26  ;;  %v6615_v45 = vld [vmem:[%s8872_s10 + $0x8] sm:$0xff]   ;;  %v6618_v62 = vld [vmem:[%s8872_s10 + $0x50] sm:$0xff]   ;;  %v6622_v30 = vld [vmem:[%s8872_s10 + $0x60] sm:$0xff]  }
 0x3c0   :  { %5754 = vmatpush3.bf16.msra.mxu1 %v1578_v24  ;;  %v1533_v61 = vmul.f32 %v1490_v5, %v8913_v51  ;;  %v1554_v43 = vmul.f32 %v1510_v36, %v8914_v48  ;;  %v6587_v24 = vld [vmem:[%s8871_s30 + $0x1c] ss:$12 sps:$4 sm:$0xff]   ;;  %v8916_v16 = vmax.f32 %v7641_v2, 0.0  ;;  %v8920_v49 = vmax.f32 %v8919_v38, 0.0  ;;  %v6590_v2 = vld [vmem:[%s8871_s30 + $0x34] ss:$12 sps:$4 sm:$0xff]   ;;  %5847 = vmatprep.subr.bf16.mxu0 %v6616_v17 }
 0x3c1   :  { %5755 = vmatprep.subr.bf16.mxu1 %v1587_v21  ;;  %v1591_v29 = vpack.c.bf16 %v1552_v9, %v1551_v23  ;;  %v1553_v34 = vmul.f32 %v1506_v27, %v8915_v25  ;;  %v8917_v21 = vld [vmem:[#allocation11_spill] sm:$0xff]  ;;  %v6613_v27 = vld [vmem:[%s8872_s10] sm:$0xff]   ;;  %v6624_v59 = vld [vmem:[%s8872_s10 + $0x68] sm:$0xff]  }
 0x3c2   :  { %v1582_v18 = vpack.c.bf16 %v1534_v53, %v1533_v61  ;;  %v1555_v47 = vmul.f32 %v1510_v36, %v8916_v16  ;;  %v8918_v33 = vmax.f32 %v8917_v21, 0.0  ;;  %v1557_v7 = vmul.f32 %v1510_v36, %v8920_v49  ;;  %v6625_v32 = vld [vmem:[%s8872_s10 + $0x28] sm:$0xff]   ;;  %v6626_v56 = vld [vmem:[%s8872_s10 + $0x70] sm:$0xff]   ;;  %v6628_v15 = vld [vmem:[%s8872_s10 + $0xf8] sm:$0xff]  }
 0x3c3   :  { %v1592_v5 = vpack.c.bf16 %v1554_v43, %v1553_v34  ;;  %5848 = vmatpush3.bf16.msra.mxu0 %v6617_v52  ;;  %v6629_v28 = vld [vmem:[%s8872_s10 + $0xb8] sm:$0xff]   ;;  %v6633_v0 = vld [vmem:[%s8872_s10 + $0x1c0] sm:$0xff]  }
 0x3c4   :  { %5756 = vmatpush3.bf16.msra.mxu1 %v1579_v46  ;;  %v1556_v35 = vmul.f32 %v1510_v36, %v8918_v33  ;;  %v1558_v46 = vmul.f32 %v1510_v36, %v1114_v31  ;;  %v6595_v31 = vld [vmem:[%s8871_s30 + $0x48] ss:$12 sps:$4 sm:$0xff]   ;;  %v6630_v53 = vld [vmem:[%s8872_s10 + $0x78] sm:$0xff]   ;;  %5849 = vmatprep.subr.bf16.mxu0 %v6628_v15  ;;  %v6632_v10 = vld [vmem:[%s8872_s10 + $0x140] sm:$0xff]  }
 0x3c5   :  { %5757 = vmatprep.subr.bf16.mxu1 %v1588_v6  ;;  %v6598_v6 = vld [vmem:[%s8871_s30 + $0x38] ss:$12 sps:$4 sm:$0xff]  }
 0x3c6   :  { %v1593_v50 = vpack.c.bf16 %v1556_v35, %v1555_v47  ;;  %v1594_v14 = vpack.c.bf16 %v1558_v46, %v1557_v7 }
 0x3c7   :  { %5850 = vmatpush3.bf16.msra.mxu0 %v6629_v28 }
 0x3c8   :  { %5758 = vmatpush3.bf16.msra.mxu1 %v1580_v20  ;;  %v6614_v20 = vld [vmem:[%s8872_s10 + $0x48] sm:$0xff]   ;;  %5915 = vmatprep.subr.bf16.mxu0 %v6633_v0 }
 0x3c9   :  { %5759 = vmatprep.subr.bf16.mxu1 %v1589_v63  ;;  %v6619_v63 = vld [vmem:[%s8872_s10 + $0x10] sm:$0xff]  }
 0x3cc   :  { %5760 = vmatpush3.bf16.msra.mxu1 %v1581_v4  ;;  %v6627_v4 = vld [vmem:[%s8872_s10 + $0x30] sm:$0xff]  }
 0x3cd   :  { %5761 = vmatprep.subr.bf16.mxu1 %v1590_v12  ;;  %v6631_v12 = vld [vmem:[%s8872_s10 + $0x38] sm:$0xff]  }
 0x3d0   :  { %5762 = vmatpush3.bf16.msra.mxu1 %v1582_v18 }
 0x3d1   :  { %6278 = vmatprep.subr.bf16.mxu1 %v1591_v29 }
 0x3d3   :  { %1701 = vmatmul.mubr.bf16.vlgmr.msra.gmra.mrb[48].mxu1 %v6584_v22 }
 0x3d4   :  { %6279 = vmatpush3.bf16.msra.mxu1 %v1591_v29  ;;  %1708 = vmatprep.mubr.bf16.mxu1 %v6587_v24 }
 0x3d5   :  { %6280 = vmatprep.subr.bf16.mxu1 %v1592_v5 }
 0x3d8   :  { %6281 = vmatpush3.bf16.msra.mxu1 %v1592_v5 }
 0x3d9   :  { %6282 = vmatprep.subr.bf16.mxu1 %v1593_v50 }
 0x3db   :  { %1709 = vmatmul.mubr.bf16.gmra.mrb[52].mxu1 %v6589_v3 }
 0x3dc   :  { %6283 = vmatpush3.bf16.msra.mxu1 %v1593_v50  ;;  %1716 = vmatprep.mubr.bf16.mxu1 %v6590_v2 }
 0x3dd   :  { %6284 = vmatprep.subr.bf16.mxu1 %v1594_v14 }
 0x3e0   :  { %6285 = vmatpush3.bf16.msra.mxu1 %v1594_v14 }
 0x3e1   :  { %5795 = vmatprep.subr.bf16.mxu1 %v6612_v11 }
 0x3e3   :  { %1717 = vmatmul.mubr.bf16.gmra.mrb[56].mxu1 %v6592_v41 }
 0x3e4   :  { %1724 = vmatprep.mubr.bf16.mxu1 %v6593_v39 }
 0x3eb   :  { %1725 = vmatmul.mubr.bf16.gmra.mrb[60].mxu1 %v6595_v31 }
 0x3ec   :  { %6286 = vmatprep.mubr.msk.bf16.mxu1 %vm1655_vm9, %v6596_v37 }
 0x3f3   :  { %6287 = vmatmul.mubr.msk.bf16.vlgmr.msra.gmra.mrb[64].mxu1 %vm1655_vm9, %v6597_v1 }
 0x3f4   :  { %6290 = vmatprep.mubr.msk.bf16.mxu1 %vm1655_vm9, %v6598_v6  ;;  %5796 = vmatpush3.bf16.msra.mxu1 %v6613_v27 }
 0x3f5   :  { %5797 = vmatprep.subr.bf16.mxu1 %v6614_v20 }
 0x3f8   :  { %5798 = vmatpush3.bf16.msra.mxu1 %v6615_v45 }
 0x3f9   :  { %5799 = vmatprep.subr.bf16.mxu1 %v6618_v62 }
 0x3fb   :  { %6291 = vmatmul.mubr.msk.bf16.gmra.mrb[68].mxu1 %vm1655_vm9, %v6599_v40 }
 0x3fc   :  { %5800 = vmatpush3.bf16.msra.mxu1 %v6619_v63 }
 0x3fd   :  { %5801 = vmatprep.subr.bf16.mxu1 %v6620_v19 }
 0x400   :  { %5802 = vmatpush3.bf16.msra.mxu1 %v6621_v54 }
 0x401   :  { %5803 = vmatprep.subr.bf16.mxu1 %v6622_v30 }
 0x404   :  { %5804 = vmatpush3.bf16.msra.mxu1 %v6623_v58 }
 0x405   :  { %5805 = vmatprep.subr.bf16.mxu1 %v6624_v59 }
 0x408   :  { %5806 = vmatpush3.bf16.msra.mxu1 %v6625_v32 }
 0x409   :  { %5807 = vmatprep.subr.bf16.mxu1 %v6626_v56 }
 0x40c   :  { %5808 = vmatpush3.bf16.msra.mxu1 %v6627_v4 }
 0x40d   :  { %5809 = vmatprep.subr.bf16.mxu1 %v6630_v53 }
 0x410   :  { %5810 = vmatpush3.bf16.msra.mxu1 %v6631_v12 }
 0x411   :  { %5875 = vmatprep.subr.bf16.mxu1 %v6632_v10 }
 0x4a6   :  { %v5763_v23 = vpop.f32.mrb[48].mxu1 }
 0x4a7   :  { %v5764_v57 = vpop.f32.mrb[49].mxu1 }
 0x4a8   :  { %v5765_v8 = vadd.f32 %v5764_v57, %v5763_v23  ;;  %v5766_v9 = vpop.f32.mrb[50].mxu1 }
 0x4a9   :  { %v5767_v36 = vpop.f32.mrb[51].mxu1 }
 0x4aa   :  { %v5768_v60 = vadd.f32 %v5767_v36, %v5766_v9  ;;  %v6634_v9 = vld [vmem:[%s8872_s10 + $0x100] sm:$0xff]  }
 0x4ae   :  { %v5769_v51 = vpop.f32.mrb[52].mxu1 }
 0x4af   :  { %v5770_v61 = vpop.f32.mrb[53].mxu1 }
 0x4b0   :  { %v5771_v18 = vadd.f32 %v5770_v61, %v5769_v51  ;;  %v5772_v29 = vpop.f32.mrb[54].mxu1 }
 0x4b1   :  { %v5773_v22 = vpop.f32.mrb[55].mxu1 }
 0x4b2   :  { %v5774_v48 = vadd.f32 %v5773_v22, %v5772_v29 }
 0x4b6   :  { %v5775_v43 = vpop.f32.mrb[56].mxu1 }
 0x4b7   :  { %v5776_v24 = vpop.f32.mrb[57].mxu1 }
 0x4b8   :  { %v5777_v25 = vadd.f32 %v5776_v24, %v5775_v43  ;;  %v5778_v34 = vpop.f32.mrb[58].mxu1  ;;  %v6637_v43 = vld [vmem:[%s8872_s10 + $0x1c8] sm:$0xff]  }
 0x4b9   :  { %v5779_v5 = vpop.f32.mrb[59].mxu1  ;;  %v6638_v24 = vld [vmem:[%s8872_s10 + $0x108] sm:$0xff]  }
 0x4ba   :  { %v5780_v16 = vadd.f32 %v5779_v5, %v5778_v34  ;;  %v6640_v34 = vld [vmem:[%s8872_s10 + $0x150] sm:$0xff]  }
 0x4be   :  { %v5781_v47 = vpop.f32.mrb[60].mxu1 }
 0x4bf   :  { %v5782_v21 = vpop.f32.mrb[61].mxu1 }
 0x4c0   :  { %v5783_v33 = vadd.f32 %v5782_v21, %v5781_v47  ;;  %v5784_v35 = vpop.f32.mrb[62].mxu1  ;;  %v6641_v47 = vld [vmem:[%s8872_s10 + $0x1d0] sm:$0xff]  }
 0x4c1   :  { %v5785_v50 = vpop.f32.mrb[63].mxu1 }
 0x4c2   :  { %v5786_v3 = vadd.f32 %v5785_v50, %v5784_v35 }
 0x4c6   :  { %v6288_v38 = vpop.f32.mrb[64].mxu1 }
 0x4c7   :  { %v1776_v49 = vadd.f32 %v6288_v38, %v5771_v18  ;;  %v1767_v7 = vpop.f32.mrb[65].mxu1  ;;  %v6635_v18 = vld [vmem:[%s8872_s10 + $0x180] sm:$0xff]  }
 0x4c8   :  { %v1768_v46 = vadd.f32 %v5765_v8, %v1767_v7  ;;  %v6289_v2 = vpop.f32.mrb[66].mxu1 }
 0x4c9   :  { %v7935_v14 = vmul.f32 0.2, %v1776_v49  ;;  %v1779_v41 = vadd.f32 %v6289_v2, %v5774_v48  ;;  %v1770_v39 = vpop.f32.mrb[67].mxu1  ;;  %v6636_v48 = vld [vmem:[%s8872_s10 + $0x148] sm:$0xff]   ;;  %v6643_v2 = vld [vmem:[%s8872_s10 + $0x190] sm:$0xff]  }
 0x4ca   :  { %v7937_v31 = vmul.f32 0.2, %v1768_v46  ;;  %v1771_v37 = vadd.f32 %v5768_v60, %v1770_v39 }
 0x4cb   :  { %1824 = vst [vmem:[#allocation2 + $0x24] sm:$0xff] %v7935_v14  ;;  %v7940_v1 = vmul.f32 0.2, %v1779_v41 }
 0x4cc   :  { %1822 = vst [vmem:[#allocation2 + $0x4] sm:$0xff] %v7937_v31  ;;  %v7943_v6 = vmul.f32 0.2, %v1771_v37  ;;  %v6644_v37 = vld [vmem:[%s8872_s10 + $0x158] sm:$0xff]  }
 0x4cd   :  { %1825 = vst [vmem:[#allocation2 + $0x34] sm:$0xff] %v7940_v1  ;;  %v1915_v40 = vpack.c.bf16 %v7940_v1, %v7935_v14 }
 0x4ce   :  { %1823 = vst [vmem:[#allocation2 + $0x14] sm:$0xff] %v7943_v6  ;;  %v6292_v13 = vpop.f32.mrb[68].mxu1  ;;  %v1906_v26 = vpack.c.bf16 %v7943_v6, %v7937_v31 }
 0x4cf   :  { %v1792_v11 = vadd.f32 %v6292_v13, %v5783_v33  ;;  %v1783_v27 = vpop.f32.mrb[69].mxu1  ;;  %v6645_v13 = vld [vmem:[%s8872_s10 + $0x1d8] sm:$0xff]  }
 0x4d0   :  { %v1784_v20 = vadd.f32 %v5777_v25, %v1783_v27  ;;  %v6293_v45 = vpop.f32.mrb[70].mxu1  ;;  %v6639_v25 = vld [vmem:[%s8872_s10 + $0x188] sm:$0xff]   ;;  %v6647_v27 = vld [vmem:[%s8872_s10 + $0x198] sm:$0xff]  }
 0x4d1   :  { %v7951_v17 = vmul.f32 0.2, %v1792_v11  ;;  %v1795_v52 = vadd.f32 %v6293_v45, %v5786_v3  ;;  %v1786_v62 = vpop.f32.mrb[71].mxu1  ;;  %v6642_v3 = vld [vmem:[%s8872_s10 + $0x110] sm:$0xff]   ;;  %v6646_v11 = vld [vmem:[%s8872_s10 + $0x118] sm:$0xff]  }
 0x4d2   :  { %v7953_v63 = vmul.f32 0.2, %v1784_v20  ;;  %v1787_v19 = vadd.f32 %v5780_v16, %v1786_v62  ;;  %v1840_v51 = vld [vmem:[#allocation2 + $0x21] sm:$0xff] }
 0x4d3   :  { %1828 = vst [vmem:[#allocation2 + $0x64] sm:$0xff] %v7951_v17  ;;  %v7956_v54 = vmul.f32 0.2, %v1795_v52  ;;  %v1838_v30 = vld [vmem:[#allocation2 + $0x1] sm:$0xff] }
 0x4d4   :  { %v1854_v58 = vld [vmem:[#allocation2 + $0x3] sm:$0xff]  ;;  %1826 = vst [vmem:[#allocation2 + $0x44] sm:$0xff] %v7953_v63  ;;  %v7959_v59 = vmul.f32 0.2, %v1787_v19  ;;  %v1841_v56 = vld [vmem:[#allocation2 + $0x31] sm:$0xff] }
 0x4d5   :  { %v1830_v32 = vld [vmem:[#allocation2] sm:$0xff]  ;;  %v1857_v4 = vld [vmem:[#allocation2 + $0x33] sm:$0xff]  ;;  %1829 = vst [vmem:[#allocation2 + $0x74] sm:$0xff] %v7956_v54  ;;  %v1933_v12 = vpack.c.bf16 %v7956_v54, %v7951_v17  ;;  %v1912_v29 = vpack.c.bf16 %v1841_v56, %v1840_v51 }
 0x4d6   :  { %v1839_v15 = vld [vmem:[#allocation2 + $0x11] sm:$0xff]  ;;  %1827 = vst [vmem:[#allocation2 + $0x54] sm:$0xff] %v7959_v59  ;;  %v1846_v57 = vld [vmem:[#allocation2 + $0x2] sm:$0xff]  ;;  %v1924_v36 = vpack.c.bf16 %v7959_v59, %v7953_v63 }
 0x4d7   :  { %v1855_v28 = vld [vmem:[#allocation2 + $0x13] sm:$0xff]  ;;  %v1903_v0 = vpack.c.bf16 %v1839_v15, %v1838_v30  ;;  %v1856_v61 = vld [vmem:[#allocation2 + $0x23] sm:$0xff] }
 0x4d8   :  { %v1831_v53 = vld [vmem:[#allocation2 + $0x10] sm:$0xff]  ;;  %v1905_v10 = vpack.c.bf16 %v1855_v28, %v1854_v58  ;;  %v1914_v22 = vpack.c.bf16 %v1857_v4, %v1856_v61  ;;  %v1832_v35 = vld [vmem:[#allocation2 + $0x20] sm:$0xff]  ;;  %v6671_v63 = vld [vmem:[%s8872_s10 + $0x238] sm:$0xff]  }
 0x4d9   :  { %v1902_v23 = vpack.c.bf16 %v1831_v53, %v1830_v32  ;;  %v1847_v8 = vld [vmem:[#allocation2 + $0x12] sm:$0xff]  ;;  %2553 = vmatprep.mubr.bf16.mxu1 %v1903_v0  ;;  %v1848_v50 = vld [vmem:[#allocation2 + $0x22] sm:$0xff] }
 0x4da   :  { %v1904_v60 = vpack.c.bf16 %v1847_v8, %v1846_v57  ;;  %2618 = vmatprep.mubr.bf16.mxu0 %v1905_v10  ;;  %v1833_v5 = vld [vmem:[#allocation2 + $0x30] sm:$0xff]  ;;  %v6648_v20 = vld [vmem:[%s8872_s10 + $0x160] sm:$0xff]   ;;  %v6652_v57 = vld [vmem:[%s8872_s10 + $0x168] sm:$0xff]  }
 0x4db   :  { %2554 = vmatmul.mubr.bf16.vlgmr.msra.gmra.mrb[72].mxu1 %v1902_v23  ;;  %v1849_v16 = vld [vmem:[#allocation2 + $0x32] sm:$0xff]  ;;  %v1911_v38 = vpack.c.bf16 %v1833_v5, %v1832_v35  ;;  %v1842_v7 = vld [vmem:[#allocation2 + $0x41] sm:$0xff] }
 0x4dc   :  { %2619 = vmatmul.mubr.bf16.vlgmr.msra.gmra.mrb[80].mxu0 %v1904_v60  ;;  %2561 = vmatprep.mubr.bf16.mxu1 %v1912_v29  ;;  %v1913_v49 = vpack.c.bf16 %v1849_v16, %v1848_v50  ;;  %v1858_v46 = vld [vmem:[#allocation2 + $0x43] sm:$0xff]  ;;  %v1845_v19 = vld [vmem:[#allocation2 + $0x71] sm:$0xff] }
 0x4dd   :  { %2626 = vmatprep.mubr.bf16.mxu0 %v1914_v22  ;;  %5876 = vmatpush3.bf16.msra.mxu1 %v6634_v9  ;;  %v1843_v21 = vld [vmem:[#allocation2 + $0x51] sm:$0xff]  ;;  %v6649_v62 = vld [vmem:[%s8872_s10 + $0x1e0] sm:$0xff]   ;;  %v6653_v8 = vld [vmem:[%s8872_s10 + $0x1e8] sm:$0xff]  }
 0x4de   :  { %5916 = vmatpush3.bf16.msra.mxu0 %v6635_v18  ;;  %5877 = vmatprep.subr.bf16.mxu1 %v6636_v48  ;;  %v1859_v33 = vld [vmem:[#allocation2 + $0x53] sm:$0xff]  ;;  %v1921_v41 = vpack.c.bf16 %v1843_v21, %v1842_v7  ;;  %v1834_v58 = vld [vmem:[#allocation2 + $0x40] sm:$0xff]  ;;  %v6654_v9 = vld [vmem:[%s8872_s10 + $0x128] sm:$0xff]  }
 0x4df   :  { %5917 = vmatprep.subr.bf16.mxu0 %v6637_v43  ;;  %v1923_v39 = vpack.c.bf16 %v1859_v33, %v1858_v46  ;;  %v1835_v45 = vld [vmem:[#allocation2 + $0x50] sm:$0xff]  ;;  %v1850_v32 = vld [vmem:[#allocation2 + $0x42] sm:$0xff]  ;;  %v6660_v50 = vld [vmem:[%s8872_s10 + $0x178] sm:$0xff]  }
 0x4e0   :  { %v1851_v52 = vld [vmem:[#allocation2 + $0x52] sm:$0xff]  ;;  %v6650_v56 = vld [vmem:[%s8872_s10 + $0x120] sm:$0xff]   ;;  %v1920_v4 = vpack.c.bf16 %v1835_v45, %v1834_v58  ;;  %v6655_v60 = vld [vmem:[%s8872_s10 + $0x1a8] sm:$0xff]  }
 0x4e1   :  { %5878 = vmatpush3.bf16.msra.mxu1 %v6638_v24  ;;  %v1861_v30 = vld [vmem:[#allocation2 + $0x73] sm:$0xff]  ;;  %v1922_v15 = vpack.c.bf16 %v1851_v52, %v1850_v32  ;;  %v1844_v28 = vld [vmem:[#allocation2 + $0x61] sm:$0xff] }
 0x4e2   :  { %5918 = vmatpush3.bf16.msra.mxu0 %v6639_v25  ;;  %5879 = vmatprep.subr.bf16.mxu1 %v6640_v34  ;;  %v1860_v53 = vld [vmem:[#allocation2 + $0x63] sm:$0xff]  ;;  %v1930_v10 = vpack.c.bf16 %v1845_v19, %v1844_v28  ;;  %v6656_v51 = vld [vmem:[%s8872_s10 + $0x170] sm:$0xff]   ;;  %v1897_v59 = vld [vmem:[#allocation2 + $0x38] sm:$0xff] }
 0x4e3   :  { %5919 = vmatprep.subr.bf16.mxu0 %v6641_v47  ;;  %2562 = vmatmul.mubr.bf16.gmra.mrb[76].mxu1 %v1911_v38  ;;  %v6651_v0 = vld [vmem:[%s8872_s10 + $0x1a0] sm:$0xff]   ;;  %v1932_v23 = vpack.c.bf16 %v1861_v30, %v1860_v53  ;;  %v1837_v61 = vld [vmem:[#allocation2 + $0x70] sm:$0xff]  ;;  %v6662_v38 = vld [vmem:[%s8872_s10 + $0x138] sm:$0xff]  }
 0x4e4   :  { %2627 = vmatmul.mubr.bf16.gmra.mrb[84].mxu0 %v1913_v49  ;;  %2569 = vmatprep.mubr.bf16.mxu1 %v1921_v41  ;;  %v1853_v18 = vld [vmem:[#allocation2 + $0x72] sm:$0xff]  ;;  %v1836_v43 = vld [vmem:[#allocation2 + $0x60] sm:$0xff]  ;;  %v6665_v45 = vld [vmem:[%s8872_s10 + $0x208] sm:$0xff]  }
 0x4e5   :  { %2634 = vmatprep.mubr.bf16.mxu0 %v1923_v39  ;;  %5880 = vmatpush3.bf16.msra.mxu1 %v6642_v3  ;;  %v6657_v29 = vld [vmem:[%s8872_s10 + $0x1f0] sm:$0xff]   ;;  %v1852_v24 = vld [vmem:[#allocation2 + $0x62] sm:$0xff]  ;;  %v1929_v34 = vpack.c.bf16 %v1837_v61, %v1836_v43  ;;  %v6661_v3 = vld [vmem:[%s8872_s10 + $0x1f8] sm:$0xff]  }
 0x4e6   :  { %5920 = vmatpush3.bf16.msra.mxu0 %v6643_v2  ;;  %5881 = vmatprep.subr.bf16.mxu1 %v6644_v37  ;;  %v1871_v22 = vld [vmem:[#allocation2 + $0x15] sm:$0xff]  ;;  %v1931_v5 = vpack.c.bf16 %v1853_v18, %v1852_v24  ;;  %v1870_v16 = vld [vmem:[#allocation2 + $0x5] sm:$0xff] }
 0x4e7   :  { %5921 = vmatprep.subr.bf16.mxu0 %v6645_v13  ;;  %v1887_v48 = vld [vmem:[#allocation2 + $0x17] sm:$0xff]  ;;  %v1886_v21 = vld [vmem:[#allocation2 + $0x7] sm:$0xff]  ;;  %v1907_v33 = vpack.c.bf16 %v1871_v22, %v1870_v16 }
 0x4e8   :  { %v6658_v25 = vld [vmem:[%s8872_s10 + $0x130] sm:$0xff]   ;;  %v1909_v35 = vpack.c.bf16 %v1887_v48, %v1886_v21  ;;  %v6663_v49 = vld [vmem:[%s8872_s10 + $0x1b8] sm:$0xff]   ;;  %v6664_v7 = vld [vmem:[%s8872_s10 + $0x200] sm:$0xff]  }
 0x4e9   :  { %5882 = vmatpush3.bf16.msra.mxu1 %v6646_v11  ;;  %v6659_v47 = vld [vmem:[%s8872_s10 + $0x1b0] sm:$0xff]   ;;  %v1878_v39 = vld [vmem:[#allocation2 + $0x6] sm:$0xff]  ;;  %v1901_v17 = vld [vmem:[#allocation2 + $0x78] sm:$0xff] }
 0x4ea   :  { %5922 = vmatpush3.bf16.msra.mxu0 %v6647_v27  ;;  %5883 = vmatprep.subr.bf16.mxu1 %v6648_v20  ;;  %v1879_v46 = vld [vmem:[#allocation2 + $0x16] sm:$0xff]  ;;  %v1872_v13 = vld [vmem:[#allocation2 + $0x25] sm:$0xff] }
 0x4eb   :  { %5923 = vmatprep.subr.bf16.mxu0 %v6649_v62  ;;  %2570 = vmatmul.mubr.bf16.gmra.mrb[80].mxu1 %v1920_v4  ;;  %v1873_v2 = vld [vmem:[#allocation2 + $0x35] sm:$0xff]  ;;  %v1908_v37 = vpack.c.bf16 %v1879_v46, %v1878_v39  ;;  %v1888_v11 = vld [vmem:[#allocation2 + $0x27] sm:$0xff] }
 0x4ec   :  { %2635 = vmatmul.mubr.bf16.gmra.mrb[88].mxu0 %v1922_v15  ;;  %2577 = vmatprep.mubr.bf16.mxu1 %v1930_v10  ;;  %v1889_v41 = vld [vmem:[#allocation2 + $0x37] sm:$0xff]  ;;  %v1916_v27 = vpack.c.bf16 %v1873_v2, %v1872_v13  ;;  %v1880_v58 = vld [vmem:[#allocation2 + $0x26] sm:$0xff] }
 0x4ed   :  { %2642 = vmatprep.mubr.bf16.mxu0 %v1932_v23  ;;  %5884 = vmatpush3.bf16.msra.mxu1 %v6650_v56  ;;  %v1918_v20 = vpack.c.bf16 %v1889_v41, %v1888_v11  ;;  %v1881_v52 = vld [vmem:[#allocation2 + $0x36] sm:$0xff]  ;;  %v1874_v56 = vld [vmem:[#allocation2 + $0x45] sm:$0xff] }
 0x4ee   :  { %5924 = vmatpush3.bf16.msra.mxu0 %v6651_v0  ;;  %5885 = vmatprep.subr.bf16.mxu1 %v6652_v57  ;;  %v6666_v62 = vld [vmem:[%s8872_s10 + $0x210] sm:$0xff]   ;;  %v1917_v32 = vpack.c.bf16 %v1881_v52, %v1880_v58  ;;  %v1890_v4 = vld [vmem:[#allocation2 + $0x47] sm:$0xff] }
 0x4ef   :  { %5925 = vmatprep.subr.bf16.mxu0 %v6653_v8  ;;  %v1875_v19 = vld [vmem:[#allocation2 + $0x55] sm:$0xff]  ;;  %v6668_v28 = vld [vmem:[%s8872_s10 + $0x220] sm:$0xff]   ;;  %v1896_v48 = vld [vmem:[#allocation2 + $0x28] sm:$0xff] }
 0x4f0   :  { %v1891_v30 = vld [vmem:[#allocation2 + $0x57] sm:$0xff]  ;;  %v1925_v31 = vpack.c.bf16 %v1875_v19, %v1874_v56  ;;  %v1882_v10 = vld [vmem:[#allocation2 + $0x46] sm:$0xff]  ;;  %v1919_v43 = vpack.c.bf16 %v1897_v59, %v1896_v48 }
 0x4f1   :  { %5886 = vmatpush3.bf16.msra.mxu1 %v6654_v9  ;;  %v1927_v6 = vpack.c.bf16 %v1891_v30, %v1890_v4  ;;  %v1883_v15 = vld [vmem:[#allocation2 + $0x56] sm:$0xff]  ;;  %v1876_v57 = vld [vmem:[#allocation2 + $0x65] sm:$0xff] }
 0x4f2   :  { %5926 = vmatpush3.bf16.msra.mxu0 %v6655_v60  ;;  %5887 = vmatprep.subr.bf16.mxu1 %v6656_v51  ;;  %v1877_v53 = vld [vmem:[#allocation2 + $0x75] sm:$0xff]  ;;  %v1926_v23 = vpack.c.bf16 %v1883_v15, %v1882_v10  ;;  %v1892_v8 = vld [vmem:[#allocation2 + $0x67] sm:$0xff] }
 0x4f3   :  { %5927 = vmatprep.subr.bf16.mxu0 %v6657_v29  ;;  %2578 = vmatmul.mubr.bf16.gmra.mrb[84].mxu1 %v1929_v34  ;;  %v1893_v0 = vld [vmem:[#allocation2 + $0x77] sm:$0xff]  ;;  %v1934_v14 = vpack.c.bf16 %v1877_v53, %v1876_v57  ;;  %v1884_v61 = vld [vmem:[#allocation2 + $0x66] sm:$0xff] }
 0x4f4   :  { %2643 = vmatmul.mubr.bf16.gmra.mrb[92].mxu0 %v1931_v5  ;;  %2683 = vmatprep.mubr.bf16.mxu1 %v1907_v33  ;;  %v1936_v1 = vpack.c.bf16 %v1893_v0, %v1892_v8  ;;  %v1885_v9 = vld [vmem:[#allocation2 + $0x76] sm:$0xff]  ;;  %v1894_v29 = vld [vmem:[#allocation2 + $0x8] sm:$0xff]  ;;  %v6672_v34 = vld [vmem:[%s8921_s3] sm:$0xff]  }
 0x4f5   :  { %2748 = vmatprep.mubr.bf16.mxu0 %v1909_v35  ;;  %5888 = vmatpush3.bf16.msra.mxu1 %v6658_v25  ;;  %v6670_v60 = vld [vmem:[%s8872_s10 + $0x230] sm:$0xff]   ;;  %v1895_v51 = vld [vmem:[#allocation2 + $0x18] sm:$0xff]  ;;  %v1935_v18 = vpack.c.bf16 %v1885_v9, %v1884_v61  ;;  %v1898_v24 = vld [vmem:[#allocation2 + $0x48] sm:$0xff] }
 0x4f6   :  { %5928 = vmatpush3.bf16.msra.mxu0 %v6659_v47  ;;  %5889 = vmatprep.subr.bf16.mxu1 %v6660_v50  ;;  %v1910_v22 = vpack.c.bf16 %v1895_v51, %v1894_v29  ;;  %v1900_v54 = vld [vmem:[#allocation2 + $0x68] sm:$0xff]  ;;  %v6674_v16 = vld [vmem:[%s8921_s3 + $0x10] sm:$0xff]   ;;  %v6675_v47 = vld [vmem:[%s8921_s3 + $0x18] sm:$0xff]  }
 0x4f7   :  { %5929 = vmatprep.subr.bf16.mxu0 %v6661_v3  ;;  %v6673_v5 = vld [vmem:[%s8921_s3 + $0x8] sm:$0xff]   ;;  %v6676_v21 = vld [vmem:[%s8921_s3 + $0x20] sm:$0xff]   ;;  %v6678_v50 = vld [vmem:[%s8921_s3 + $0x30] sm:$0xff]  }
 0x4f8   :  { %v6680_v33 = vld [vmem:[%s8922_s0] sm:$0xff]   ;;  %v6677_v35 = vld [vmem:[%s8921_s3 + $0x28] sm:$0xff]   ;;  %v6679_v3 = vld [vmem:[%s8921_s3 + $0x38] sm:$0xff]  }
 0x4f9   :  { %5890 = vmatpush3.bf16.msra.mxu1 %v6662_v38 }
 0x4fa   :  { %5930 = vmatpush3.bf16.msra.mxu0 %v6663_v49  ;;  %6294 = vmatprep.subr.bf16.mxu1 %v6664_v7 }
 0x4fb   :  { %6318 = vmatprep.subr.bf16.mxu0 %v8868_v44 }
 0x4fc   :  { %2684 = vmatmul.mubr.bf16.vlgmr.msra.gmra.mrb[88].mxu1 %v1906_v26  ;;  %v6667_v26 = vld [vmem:[%s8872_s10 + $0x218] sm:$0xff]  }
 0x4fd   :  { %2749 = vmatmul.mubr.bf16.vlgmr.msra.gmra.mrb[96].mxu0 %v1908_v37  ;;  %2691 = vmatprep.mubr.bf16.mxu1 %v1916_v27 }
 0x4fe   :  { %2756 = vmatprep.mubr.bf16.mxu0 %v1918_v20  ;;  %6295 = vmatpush3.bf16.msra.mxu1 %v6664_v7  ;;  %v5503_v7 = vld [vmem:[%s8923_s5] ss:$0 sm:$0xff] }
 0x4ff   :  { %6296 = vmatprep.subr.bf16.mxu1 %v6665_v45  ;;  %6319 = vmatpush3.bf16.msra.mxu0 %v6672_v34 }
 0x500   :  { %6320 = vmatprep.subr.bf16.mxu0 %v8868_v44 }
 0x502   :  { %6297 = vmatpush3.bf16.msra.mxu1 %v6665_v45 }
 0x503   :  { %6298 = vmatprep.subr.bf16.mxu1 %v6666_v62  ;;  %6321 = vmatpush3.bf16.msra.mxu0 %v6673_v5 }
 0x504   :  { %2692 = vmatmul.mubr.bf16.gmra.mrb[92].mxu1 %v1915_v40  ;;  %v6669_v40 = vld [vmem:[%s8872_s10 + $0x228] sm:$0xff]   ;;  %6322 = vmatprep.subr.bf16.mxu0 %v8868_v44 }
 0x505   :  { %2757 = vmatmul.mubr.bf16.gmra.mrb[100].mxu0 %v1917_v32  ;;  %2699 = vmatprep.mubr.bf16.mxu1 %v1925_v31 }
 0x506   :  { %2764 = vmatprep.mubr.bf16.mxu0 %v1927_v6  ;;  %6299 = vmatpush3.bf16.msra.mxu1 %v6666_v62 }
 0x507   :  { %6300 = vmatprep.subr.bf16.mxu1 %v6667_v26  ;;  %6323 = vmatpush3.bf16.msra.mxu0 %v6674_v16 }
 0x508   :  { %6324 = vmatprep.subr.bf16.mxu0 %v8868_v44 }
 0x50a   :  { %6301 = vmatpush3.bf16.msra.mxu1 %v6667_v26 }
 0x50b   :  { %6302 = vmatprep.subr.bf16.mxu1 %v6668_v28  ;;  %6325 = vmatpush3.bf16.msra.mxu0 %v6675_v47 }
 0x50c   :  { %2700 = vmatmul.mubr.bf16.gmra.mrb[96].mxu1 %v1924_v36  ;;  %v1899_v36 = vld [vmem:[#allocation2 + $0x58] sm:$0xff]  ;;  %6326 = vmatprep.subr.bf16.mxu0 %v8868_v44 }
 0x50d   :  { %2765 = vmatmul.mubr.bf16.gmra.mrb[104].mxu0 %v1926_v23  ;;  %2707 = vmatprep.mubr.bf16.mxu1 %v1934_v14  ;;  %v1928_v25 = vpack.c.bf16 %v1899_v36, %v1898_v24 }
 0x50e   :  { %2772 = vmatprep.mubr.bf16.mxu0 %v1936_v1  ;;  %6303 = vmatpush3.bf16.msra.mxu1 %v6668_v28 }
 0x50f   :  { %6304 = vmatprep.subr.bf16.mxu1 %v6669_v40  ;;  %6327 = vmatpush3.bf16.msra.mxu0 %v6676_v21 }
 0x510   :  { %6328 = vmatprep.subr.bf16.mxu0 %v8868_v44 }
 0x512   :  { %6305 = vmatpush3.bf16.msra.mxu1 %v6669_v40 }
 0x513   :  { %6306 = vmatprep.subr.bf16.mxu1 %v6670_v60  ;;  %6329 = vmatpush3.bf16.msra.mxu0 %v6677_v35 }
 0x514   :  { %2708 = vmatmul.mubr.bf16.gmra.mrb[100].mxu1 %v1933_v12  ;;  %v1937_v12 = vpack.c.bf16 %v1901_v17, %v1900_v54  ;;  %6330 = vmatprep.subr.bf16.mxu0 %v8868_v44 }
 0x515   :  { %2773 = vmatmul.mubr.bf16.gmra.mrb[108].mxu0 %v1935_v18  ;;  %6310 = vmatprep.mubr.bf16.mxu1 %v1910_v22 }
 0x516   :  { %6334 = vmatprep.mubr.msk.bf16.mxu0 %vm6806_vm0, %v8868_v44  ;;  %6307 = vmatpush3.bf16.msra.mxu1 %v6670_v60 }
 0x517   :  { %6308 = vmatprep.subr.bf16.mxu1 %v6671_v63  ;;  %6331 = vmatpush3.bf16.msra.mxu0 %v6678_v50 }
 0x518   :  { %6332 = vmatprep.subr.bf16.mxu0 %v8868_v44 }
 0x51a   :  { %6309 = vmatpush3.bf16.msra.mxu1 %v6671_v63 }
 0x51b   :  { %6338 = vmatprep.subr.bf16.mxu1 %v8868_v44  ;;  %6333 = vmatpush3.bf16.msra.mxu0 %v6679_v3 }
 0x51d   :  { %6311 = vmatmul.mubr.bf16.vlgmr.msra.gmra.mrb[104].mxu1 %v1919_v43 }
 0x51e   :  { %6314 = vmatprep.mubr.bf16.mxu1 %v1928_v25  ;;  %6339 = vmatpush3.bf16.msra.mxu1 %v6680_v33 }
 0x51f   :  { %6340 = vmatprep.subr.bf16.mxu1 %v8868_v44 }
 0x525   :  { %6315 = vmatmul.mubr.bf16.gmra.mrb[108].mxu1 %v1937_v12 }
 0x526   :  { %6342 = vmatprep.mubr.msk.bf16.mxu1 %vm6806_vm0, %v8868_v44 }
 0x5ae   :  { %v5811_v38 = vpop.f32.mrb[72].mxu1 }
 0x5af   :  { %v5851_v49 = vpop.f32.mrb[80].mxu0  ;;  %v5812_v46 = vpop.f32.mrb[73].mxu1 }
 0x5b0   :  { %v5852_v2 = vpop.f32.mrb[81].mxu0  ;;  %v5813_v41 = vadd.f32 %v5812_v46, %v5811_v38  ;;  %v5814_v37 = vpop.f32.mrb[74].mxu1 }
 0x5b1   :  { %v5853_v39 = vadd.f32 %v5852_v2, %v5851_v49  ;;  %v5854_v13 = vpop.f32.mrb[82].mxu0  ;;  %v5815_v11 = vpop.f32.mrb[75].mxu1 }
 0x5b2   :  { %v5855_v27 = vpop.f32.mrb[83].mxu0  ;;  %v2556_v20 = vadd.f32 %v5813_v41, %v5503_v7  ;;  %v5816_v45 = vadd.f32 %v5815_v11, %v5814_v37 }
 0x5b3   :  { %v5856_v52 = vadd.f32 %v5855_v27, %v5854_v13 }
 0x5b4   :  { %v2621_v62 = vadd.f32 %v5853_v39, %v2556_v20  ;;  %v2559_v19 = vadd.f32 %v5816_v45, %v5503_v7 }
 0x5b6   :  { %v2624_v30 = vadd.f32 %v5856_v52, %v2559_v19  ;;  %v5817_v58 = vpop.f32.mrb[76].mxu1 }
 0x5b7   :  { %v5857_v32 = vpop.f32.mrb[84].mxu0  ;;  %v5818_v56 = vpop.f32.mrb[77].mxu1 }
 0x5b8   :  { %v5858_v4 = vpop.f32.mrb[85].mxu0  ;;  %v5819_v31 = vadd.f32 %v5818_v56, %v5817_v58  ;;  %v5820_v26 = vpop.f32.mrb[78].mxu1 }
 0x5b9   :  { %v5859_v6 = vadd.f32 %v5858_v4, %v5857_v32  ;;  %v5860_v15 = vpop.f32.mrb[86].mxu0  ;;  %v5821_v28 = vpop.f32.mrb[79].mxu1 }
 0x5ba   :  { %v5861_v53 = vpop.f32.mrb[87].mxu0  ;;  %v2564_v0 = vadd.f32 %v5819_v31, %v5503_v7  ;;  %v5822_v10 = vadd.f32 %v5821_v28, %v5820_v26 }
 0x5bb   :  { %v5862_v23 = vadd.f32 %v5861_v53, %v5860_v15 }
 0x5bc   :  { %v2629_v57 = vadd.f32 %v5859_v6, %v2564_v0  ;;  %v2567_v8 = vadd.f32 %v5822_v10, %v5503_v7 }
 0x5be   :  { %v2632_v14 = vadd.f32 %v5862_v23, %v2567_v8  ;;  %v5823_v1 = vpop.f32.mrb[80].mxu1 }
 0x5bf   :  { %v5863_v40 = vpop.f32.mrb[88].mxu0  ;;  %v5824_v9 = vpop.f32.mrb[81].mxu1 }
 0x5c0   :  { %v5864_v60 = vpop.f32.mrb[89].mxu0  ;;  %v5825_v51 = vadd.f32 %v5824_v9, %v5823_v1  ;;  %v5826_v18 = vpop.f32.mrb[82].mxu1 }
 0x5c1   :  { %v5865_v61 = vadd.f32 %v5864_v60, %v5863_v40  ;;  %v5866_v29 = vpop.f32.mrb[90].mxu0  ;;  %v5827_v22 = vpop.f32.mrb[83].mxu1 }
 0x5c2   :  { %v5867_v63 = vpop.f32.mrb[91].mxu0  ;;  %v2572_v59 = vadd.f32 %v5825_v51, %v5503_v7  ;;  %v5828_v36 = vadd.f32 %v5827_v22, %v5826_v18 }
 0x5c3   :  { %v5868_v48 = vadd.f32 %v5867_v63, %v5866_v29 }
 0x5c4   :  { %v2637_v43 = vadd.f32 %v5865_v61, %v2572_v59  ;;  %v2575_v24 = vadd.f32 %v5828_v36, %v5503_v7 }
 0x5c6   :  { %v2640_v25 = vadd.f32 %v5868_v48, %v2575_v24  ;;  %v5829_v17 = vpop.f32.mrb[84].mxu1 }
 0x5c7   :  { %v5869_v54 = vpop.f32.mrb[92].mxu0  ;;  %v5830_v12 = vpop.f32.mrb[85].mxu1 }
 0x5c8   :  { %v5870_v34 = vpop.f32.mrb[93].mxu0  ;;  %v5831_v5 = vadd.f32 %v5830_v12, %v5829_v17  ;;  %v5832_v47 = vpop.f32.mrb[86].mxu1 }
 0x5c9   :  { %v5871_v16 = vadd.f32 %v5870_v34, %v5869_v54  ;;  %v5872_v21 = vpop.f32.mrb[94].mxu0  ;;  %v5833_v33 = vpop.f32.mrb[87].mxu1 }
 0x5ca   :  { %v5873_v35 = vpop.f32.mrb[95].mxu0  ;;  %v2580_v50 = vadd.f32 %v5831_v5, %v5503_v7  ;;  %v5834_v3 = vadd.f32 %v5833_v33, %v5832_v47 }
 0x5cb   :  { %v5874_v38 = vadd.f32 %v5873_v35, %v5872_v21 }
 0x5cc   :  { %v2645_v49 = vadd.f32 %v5871_v16, %v2580_v50  ;;  %v2583_v46 = vadd.f32 %v5834_v3, %v5503_v7 }
 0x5ce   :  { %v2648_v2 = vadd.f32 %v5874_v38, %v2583_v46 }
 0x5cf   :  { %v5891_v41 = vpop.f32.mrb[88].mxu1 }
 0x5d0   :  { %v5931_v39 = vpop.f32.mrb[96].mxu0  ;;  %v5892_v37 = vpop.f32.mrb[89].mxu1 }
 0x5d1   :  { %v5932_v13 = vpop.f32.mrb[97].mxu0  ;;  %v5893_v11 = vadd.f32 %v5892_v37, %v5891_v41  ;;  %v5894_v20 = vpop.f32.mrb[90].mxu1 }
 0x5d2   :  { %v5933_v27 = vadd.f32 %v5932_v13, %v5931_v39  ;;  %v5934_v45 = vpop.f32.mrb[98].mxu0  ;;  %v5895_v52 = vpop.f32.mrb[91].mxu1 }
 0x5d3   :  { %v5935_v19 = vpop.f32.mrb[99].mxu0  ;;  %v2686_v58 = vadd.f32 %v5893_v11, %v2621_v62  ;;  %v5896_v32 = vadd.f32 %v5895_v52, %v5894_v20 }
 0x5d4   :  { %v5936_v56 = vadd.f32 %v5935_v19, %v5934_v45 }
 0x5d5   :  { %v2689_v4 = vadd.f32 %v5896_v32, %v2624_v30  ;;  %v2751_v31 = vadd.f32 %v5933_v27, %v2686_v58 }
 0x5d7   :  { %v5897_v6 = vpop.f32.mrb[92].mxu1  ;;  %v2754_v15 = vadd.f32 %v5936_v56, %v2689_v4 }
 0x5d8   :  { %v5937_v26 = vpop.f32.mrb[100].mxu0  ;;  %v5898_v7 = vpop.f32.mrb[93].mxu1 }
 0x5d9   :  { %v5938_v28 = vpop.f32.mrb[101].mxu0  ;;  %v5899_v53 = vadd.f32 %v5898_v7, %v5897_v6  ;;  %v5900_v10 = vpop.f32.mrb[94].mxu1 }
 0x5da   :  { %v5939_v0 = vadd.f32 %v5938_v28, %v5937_v26  ;;  %v5940_v23 = vpop.f32.mrb[102].mxu0  ;;  %v5901_v8 = vpop.f32.mrb[95].mxu1 }
 0x5db   :  { %v5941_v1 = vpop.f32.mrb[103].mxu0  ;;  %v2694_v40 = vadd.f32 %v5899_v53, %v2629_v57  ;;  %v5902_v9 = vadd.f32 %v5901_v8, %v5900_v10 }
 0x5dc   :  { %v5942_v60 = vadd.f32 %v5941_v1, %v5940_v23 }
 0x5dd   :  { %v2697_v51 = vadd.f32 %v5902_v9, %v2632_v14  ;;  %v2759_v62 = vadd.f32 %v5939_v0, %v2694_v40 }
 0x5df   :  { %v5903_v61 = vpop.f32.mrb[96].mxu1  ;;  %v2762_v30 = vadd.f32 %v5942_v60, %v2697_v51 }
 0x5e0   :  { %v5943_v18 = vpop.f32.mrb[104].mxu0  ;;  %v5904_v29 = vpop.f32.mrb[97].mxu1 }
 0x5e1   :  { %v5944_v22 = vpop.f32.mrb[105].mxu0  ;;  %v5905_v63 = vadd.f32 %v5904_v29, %v5903_v61  ;;  %v5906_v36 = vpop.f32.mrb[98].mxu1 }
 0x5e2   :  { %v5945_v59 = vadd.f32 %v5944_v22, %v5943_v18  ;;  %v5946_v48 = vpop.f32.mrb[106].mxu0  ;;  %v5907_v24 = vpop.f32.mrb[99].mxu1 }
 0x5e3   :  { %v5947_v17 = vpop.f32.mrb[107].mxu0  ;;  %v2702_v54 = vadd.f32 %v5905_v63, %v2637_v43  ;;  %v5908_v12 = vadd.f32 %v5907_v24, %v5906_v36 }
 0x5e4   :  { %v5948_v34 = vadd.f32 %v5947_v17, %v5946_v48 }
 0x5e5   :  { %v2705_v5 = vadd.f32 %v5908_v12, %v2640_v25  ;;  %v2767_v57 = vadd.f32 %v5945_v59, %v2702_v54 }
 0x5e7   :  { %v5909_v16 = vpop.f32.mrb[100].mxu1  ;;  %v2770_v14 = vadd.f32 %v5948_v34, %v2705_v5 }
 0x5e8   :  { %v5949_v47 = vpop.f32.mrb[108].mxu0  ;;  %v5910_v21 = vpop.f32.mrb[101].mxu1 }
 0x5e9   :  { %v5950_v33 = vpop.f32.mrb[109].mxu0  ;;  %v5911_v35 = vadd.f32 %v5910_v21, %v5909_v16  ;;  %v5912_v3 = vpop.f32.mrb[102].mxu1 }
 0x5ea   :  { %v5951_v50 = vadd.f32 %v5950_v33, %v5949_v47  ;;  %v5952_v38 = vpop.f32.mrb[110].mxu0  ;;  %v5913_v46 = vpop.f32.mrb[103].mxu1 }
 0x5eb   :  { %v5953_v41 = vpop.f32.mrb[111].mxu0  ;;  %v2710_v39 = vadd.f32 %v5911_v35, %v2645_v49  ;;  %v5914_v37 = vadd.f32 %v5913_v46, %v5912_v3 }
 0x5ec   :  { %v5954_v13 = vadd.f32 %v5953_v41, %v5952_v38 }
 0x5ed   :  { %v2713_v11 = vadd.f32 %v5914_v37, %v2648_v2  ;;  %v2775_v43 = vadd.f32 %v5951_v50, %v2710_v39 }
 0x5ef   :  { %v2778_v27 = vadd.f32 %v5954_v13, %v2713_v11 }
 0x5f0   :  { %v6312_v20 = vpop.f32.mrb[104].mxu1 }
 0x5f1   :  { %v2824_v25 = vadd.f32 %v6312_v20, %v2759_v62  ;;  %v2815_v45 = vpop.f32.mrb[105].mxu1 }
 0x5f2   :  { %v2816_v52 = vadd.f32 %v2815_v45, %v2751_v31  ;;  %v6313_v19 = vpop.f32.mrb[106].mxu1 }
 0x5f3   :  { %v8137_v58 = vmax.f32 %v2824_v25, 0.0  ;;  %v2827_v32 = vadd.f32 %v6313_v19, %v2762_v30  ;;  %v2818_v56 = vpop.f32.mrb[107].mxu1 }
 0x5f4   :  { %v8139_v4 = vmax.f32 %v2816_v52, 0.0  ;;  %v2819_v6 = vadd.f32 %v2818_v56, %v2754_v15 }
 0x5f5   :  { %v2866_v26 = vrot.slane %v8137_v58, 4  ;;  %v8142_v49 = vmax.f32 %v2827_v32, 0.0 }
 0x5f6   :  { %v2854_v2 = vrot.slane %v8139_v4, 4  ;;  %v8145_v7 = vmax.f32 %v2819_v6, 0.0 }
 0x5f7   :  { %v2867_v28 = vadd.f32 %v2866_v26, %v8137_v58  ;;  %v2872_v31 = vrot.slane %v8142_v49, 4 }
 0x5f8   :  { %v2855_v53 = vadd.f32 %v2854_v2, %v8139_v4  ;;  %v2860_v0 = vrot.slane %v8145_v7, 4  ;;  %v6316_v10 = vpop.f32.mrb[108].mxu1 }
 0x5f9   :  { %v2868_v23 = vrot.slane %v2867_v28, 2  ;;  %v2873_v15 = vadd.f32 %v2872_v31, %v8142_v49  ;;  %v2840_v8 = vadd.f32 %v6316_v10, %v2775_v43  ;;  %v2831_v1 = vpop.f32.mrb[109].mxu1 }
 0x5fa   :  { %v2856_v40 = vrot.slane %v2855_v53, 2  ;;  %v2861_v9 = vadd.f32 %v2860_v0, %v8145_v7  ;;  %v2832_v60 = vadd.f32 %v2831_v1, %v2767_v57  ;;  %v6317_v51 = vpop.f32.mrb[110].mxu1 }
 0x5fb   :  { %v2869_v62 = vadd.f32 %v2868_v23, %v2867_v28  ;;  %v2874_v61 = vrot.slane %v2873_v15, 2  ;;  %v8153_v18 = vmax.f32 %v2840_v8, 0.0  ;;  %v2843_v30 = vadd.f32 %v6317_v51, %v2778_v27  ;;  %v2834_v29 = vpop.f32.mrb[111].mxu1 }
 0x5fc   :  { %v2857_v22 = vadd.f32 %v2856_v40, %v2855_v53  ;;  %v2862_v63 = vrot.slane %v2861_v9, 2  ;;  %v8155_v59 = vmax.f32 %v2832_v60, 0.0  ;;  %v2835_v36 = vadd.f32 %v2834_v29, %v2770_v14 }
 0x5fd   :  { %v2870_v48 = vrot.slane %v2869_v62, 1  ;;  %v2875_v24 = vadd.f32 %v2874_v61, %v2873_v15  ;;  %v2890_v17 = vrot.slane %v8153_v18, 4  ;;  %v8158_v54 = vmax.f32 %v2843_v30, 0.0 }
 0x5fe   :  { %v2858_v12 = vrot.slane %v2857_v22, 1  ;;  %v2863_v34 = vadd.f32 %v2862_v63, %v2861_v9  ;;  %v2878_v5 = vrot.slane %v8155_v59, 4  ;;  %v8161_v57 = vmax.f32 %v2835_v36, 0.0 }
 0x5ff   :  { %v2871_v16 = vadd.f32 %v2870_v48, %v2869_v62  ;;  %v2876_v47 = vrot.slane %v2875_v24, 1  ;;  %v2891_v21 = vadd.f32 %v2890_v17, %v8153_v18  ;;  %v2896_v33 = vrot.slane %v8158_v54, 4 }
 0x600   :  { %v2859_v35 = vadd.f32 %v2858_v12, %v2857_v22  ;;  %v2864_v14 = vrot.slane %v2863_v34, 1  ;;  %v2879_v50 = vadd.f32 %v2878_v5, %v8155_v59  ;;  %v2884_v3 = vrot.slane %v8161_v57, 4 }
 0x601   :  { %v2904_v38 = vmul.f32 0.125, %v2871_v16  ;;  %v2877_v46 = vadd.f32 %v2876_v47, %v2875_v24  ;;  %v2892_v41 = vrot.slane %v2891_v21, 2  ;;  %v2897_v39 = vadd.f32 %v2896_v33, %v8158_v54 }
 0x602   :  { %v2902_v37 = vmul.f32 0.125, %v2859_v35  ;;  %v2865_v13 = vadd.f32 %v2864_v14, %v2863_v34  ;;  %v2880_v11 = vrot.slane %v2879_v50, 2  ;;  %v2885_v43 = vadd.f32 %v2884_v3, %v8161_v57  ;;  %v6681_v3 = vld [vmem:[%s8922_s0 + $0x8] sm:$0xff]  }
 0x603   :  { %v2893_v27 = vadd.f32 %v2892_v41, %v2891_v21  ;;  %v2898_v20 = vrot.slane %v2897_v39, 2  ;;  %v2905_v32 = vmul.f32 0.125, %v2877_v46  ;;  %v2912_v26 = vpack.c.bf16 %v2904_v38, %v2904_v38  ;;  %6341 = vmatpush3.bf16.msra.mxu1 %v6681_v3  ;;  %v5576_v38 = vld [vmem:[%s8924_s12] ss:$0 sm:$0xff] }
 0x604   :  { %v2910_v25 = vpack.c.bf16 %v2902_v37, %v2902_v37  ;;  %v2903_v45 = vmul.f32 0.125, %v2865_v13  ;;  %v2881_v52 = vadd.f32 %v2880_v11, %v2879_v50  ;;  %v2886_v19 = vrot.slane %v2885_v43, 2 }
 0x605   :  { %v2894_v56 = vrot.slane %v2893_v27, 1  ;;  %v2899_v6 = vadd.f32 %v2898_v20, %v2897_v39  ;;  %v2913_v1 = vpack.c.bf16 %v2905_v32, %v2905_v32  ;;  %v2951_v60 = vunpack.c.l.b16 %v2912_v26  ;;  %v6683_v20 = vld [vmem:[%s8770_s14 + $0xc0] sm:$0xff]   ;;  %v6688_v32 = vld [vmem:[%s8770_s14 + $0x8] sm:$0xff]   ;;  %v6691_v26 = vld [vmem:[%s8770_s14 + $0xd0] sm:$0xff]  }
 0x606   :  { %v2911_v2 = vpack.c.bf16 %v2903_v45, %v2903_v45  ;;  %v2882_v28 = vrot.slane %v2881_v52, 1  ;;  %v2887_v31 = vadd.f32 %v2886_v19, %v2885_v43  ;;  %v2949_v10 = vunpack.c.l.b16 %v2910_v25  ;;  %v6684_v25 = vld [vmem:[%s8770_s14] sm:$0xff]   ;;  %6019 = vmatprep.subr.bf16.mxu0 %v6683_v20  ;;  %v6687_v19 = vld [vmem:[%s8770_s14 + $0xc8] sm:$0xff]  }
 0x607   :  { %v2895_v53 = vadd.f32 %v2894_v56, %v2893_v27  ;;  %v2900_v0 = vrot.slane %v2899_v6, 1  ;;  %v2952_v36 = vunpack.c.l.b16 %v2913_v1  ;;  %v6682_v27 = vld [vmem:[%s8770_s14 + $0x40] sm:$0xff]   ;;  %v6689_v56 = vld [vmem:[%s8770_s14 + $0x88] sm:$0xff]  }
 0x608   :  { %v2950_v23 = vunpack.c.l.b16 %v2911_v2  ;;  %v2883_v15 = vadd.f32 %v2882_v28, %v2881_v52  ;;  %v2888_v8 = vrot.slane %v2887_v31, 1  ;;  %5979 = vmatprep.subr.bf16.mxu1 %v6682_v27  ;;  %v6685_v45 = vld [vmem:[%s8770_s14 + $0x80] sm:$0xff]   ;;  %v6686_v52 = vld [vmem:[%s8770_s14 + $0x48] sm:$0xff]   ;;  %v6692_v2 = vld [vmem:[%s8770_s14 + $0x10] sm:$0xff]  }
 0x609   :  { %v2908_v40 = vmul.f32 0.125, %v2895_v53  ;;  %v2901_v9 = vadd.f32 %v2900_v0, %v2899_v6  ;;  %v6690_v6 = vld [vmem:[%s8770_s14 + $0x50] sm:$0xff]   ;;  %v6695_v53 = vld [vmem:[%s8770_s14 + $0xd8] sm:$0xff]   ;;  %v6701_v1 = vld [vmem:[%s8770_s14 + $0xa0] sm:$0xff]  }
 0x60a   :  { %v2957_v51 = vsel %vm1250_vm1, %v2950_v23, %v2949_v10  ;;  %v2906_v62 = vmul.f32 0.125, %v2883_v15  ;;  %v2889_v61 = vadd.f32 %v2888_v8, %v2887_v31  ;;  %v6693_v28 = vld [vmem:[%s8770_s14 + $0x90] sm:$0xff]   ;;  %v6694_v31 = vld [vmem:[%s8770_s14 + $0x58] sm:$0xff]   ;;  %v6698_v23 = vld [vmem:[%s8770_s14 + $0x60] sm:$0xff]  }
 0x60b   :  { %v2909_v30 = vmul.f32 0.125, %v2901_v9  ;;  %v2958_v29 = vsel %vm1252_vm2, %v2951_v60, %v2957_v51  ;;  %v2916_v48 = vpack.c.bf16 %v2908_v40, %v2908_v40  ;;  %v6696_v0 = vld [vmem:[%s8770_s14 + $0x18] sm:$0xff]   ;;  %v6699_v15 = vld [vmem:[%s8770_s14 + $0xe0] sm:$0xff]   ;;  %v6702_v40 = vld [vmem:[%s8770_s14 + $0x68] sm:$0xff]  }
 0x60c   :  { %v2914_v22 = vpack.c.bf16 %v2906_v62, %v2906_v62  ;;  %v2907_v63 = vmul.f32 0.125, %v2889_v61  ;;  %v2959_v34 = vsel %vm1254_vm3, %v2952_v36, %v2958_v29  ;;  %v6697_v10 = vld [vmem:[%s8770_s14 + $0x98] sm:$0xff]   ;;  %v6700_v8 = vld [vmem:[%s8770_s14 + $0x20] sm:$0xff]   ;;  %v6703_v9 = vld [vmem:[%s8770_s14 + $0xe8] sm:$0xff]  }
 0x60d   :  { %v2917_v17 = vpack.c.bf16 %v2909_v30, %v2909_v30  ;;  %v2955_v47 = vunpack.c.l.b16 %v2916_v48  ;;  %v6704_v60 = vld [vmem:[%s8770_s14 + $0x28] sm:$0xff]   ;;  %v6706_v62 = vld [vmem:[%s8770_s14 + $0x70] sm:$0xff]   ;;  %v6712_v36 = vld [vmem:[%s8770_s14 + $0x38] sm:$0xff]  }
 0x60e   :  { %v2953_v24 = vunpack.c.l.b16 %v2914_v22  ;;  %v2915_v12 = vpack.c.bf16 %v2907_v63, %v2907_v63  ;;  %v6705_v51 = vld [vmem:[%s8770_s14 + $0xa8] sm:$0xff]   ;;  %v6707_v61 = vld [vmem:[%s8770_s14 + $0xf0] sm:$0xff]   ;;  %v6710_v22 = vld [vmem:[%s8770_s14 + $0x78] sm:$0xff]  }
 0x60f   :  { %v2956_v21 = vunpack.c.l.b16 %v2917_v17  ;;  %v6708_v30 = vld [vmem:[%s8770_s14 + $0x30] sm:$0xff]   ;;  %v6711_v63 = vld [vmem:[%s8770_s14 + $0xf8] sm:$0xff]   ;;  %v5585_v17 = vld [vmem:[%s8771_s13] ss:$0 sm:$0xff] }
 0x610   :  { %v2960_v5 = vsel %vm1256_vm4, %v2953_v24, %v2959_v34  ;;  %v2954_v16 = vunpack.c.l.b16 %v2915_v12  ;;  %v6709_v29 = vld [vmem:[%s8770_s14 + $0xb0] sm:$0xff]   ;;  %v6713_v48 = vld [vmem:[%s8770_s14 + $0xb8] sm:$0xff]   ;;  %v8282_v24 = vld [vmem:[%s8770_s14 + $0x100] sm:$0xff]  }
 0x612   :  { %v2961_v33 = vsel %vm1258_vm5, %v2954_v16, %v2960_v5 }
 0x613   :  { %v2962_v35 = vsel %vm1260_vm6, %v2955_v47, %v2961_v33 }
 0x614   :  { %v2963_v14 = vsel %vm1262_vm7, %v2956_v21, %v2962_v35 }
 0x615   :  { %v2964_v50 = vpack.c.b16 %v2963_v14, %v2963_v14 }
 0x617   :  { %6335 = vmatmul.mubr.bf16.vlgmr.msra.gmra.mrb[112].mxu0 %v2964_v50 }
 0x618   :  { %6020 = vmatpush3.bf16.msra.mxu0 %v6685_v45 }
 0x619   :  { %6021 = vmatprep.subr.bf16.mxu0 %v6687_v19 }
 0x61c   :  { %6022 = vmatpush3.bf16.msra.mxu0 %v6689_v56 }
 0x61d   :  { %6023 = vmatprep.subr.bf16.mxu0 %v6691_v26 }
 0x620   :  { %6024 = vmatpush3.bf16.msra.mxu0 %v6693_v28 }
 0x621   :  { %6025 = vmatprep.subr.bf16.mxu0 %v6695_v53 }
 0x624   :  { %6026 = vmatpush3.bf16.msra.mxu0 %v6697_v10 }
 0x625   :  { %6027 = vmatprep.subr.bf16.mxu0 %v6699_v15 }
 0x628   :  { %6028 = vmatpush3.bf16.msra.mxu0 %v6701_v1 }
 0x629   :  { %6029 = vmatprep.subr.bf16.mxu0 %v6703_v9 }
 0x62c   :  { %6030 = vmatpush3.bf16.msra.mxu0 %v6705_v51 }
 0x62d   :  { %6031 = vmatprep.subr.bf16.mxu0 %v6707_v61 }
 0x630   :  { %6032 = vmatpush3.bf16.msra.mxu0 %v6709_v29  ;;  %v6715_v29 = vld [vmem:[%s8770_s14 + $0x108] sm:$0xff]  }
 0x631   :  { %6033 = vmatprep.subr.bf16.mxu0 %v6711_v63  ;;  %v6716_v63 = vld [vmem:[%s8770_s14 + $0x110] sm:$0xff]  }
 0x634   :  { %6034 = vmatpush3.bf16.msra.mxu0 %v6713_v48 }
 0x635   :  { %6370 = vmatprep.subr.bf16.mxu0 %v8868_v44 }
 0x6ea   :  { %v3048_v46 = vpop.f32.mrb[112].mxu0 }
 0x6eb   :  { %v3049_v41 = vadd.f32 %v5576_v38, %v3048_v46  ;;  %v6336_v39 = vpop.f32.mrb[113].mxu0 }
 0x6ec   :  { %v3051_v37 = vpop.f32.mrb[114].mxu0 }
 0x6ed   :  { %v3054_v13 = vmax.f32 %v3049_v41, 0.0  ;;  %v6337_v11 = vpop.f32.mrb[115].mxu0 }
 0x6ef   :  { %v3055_v43 = vpack.c.bf16 %v3054_v13, %v3054_v13 }
 0x6f1   :  { %6343 = vmatmul.mubr.msk.bf16.vlgmr.msra.gmra.mrb[112].mxu1 %vm1379_vm8, %v3055_v43 }
 0x6f2   :  { %5980 = vmatpush3.bf16.msra.mxu1 %v6684_v25 }
 0x6f3   :  { %5981 = vmatprep.subr.bf16.mxu1 %v6686_v52 }
 0x6f6   :  { %5982 = vmatpush3.bf16.msra.mxu1 %v6688_v32 }
 0x6f7   :  { %5983 = vmatprep.subr.bf16.mxu1 %v6690_v6 }
 0x6fa   :  { %5984 = vmatpush3.bf16.msra.mxu1 %v6692_v2 }
 0x6fb   :  { %5985 = vmatprep.subr.bf16.mxu1 %v6694_v31 }
 0x6fe   :  { %5986 = vmatpush3.bf16.msra.mxu1 %v6696_v0 }
 0x6ff   :  { %5987 = vmatprep.subr.bf16.mxu1 %v6698_v23 }
 0x702   :  { %5988 = vmatpush3.bf16.msra.mxu1 %v6700_v8 }
 0x703   :  { %5989 = vmatprep.subr.bf16.mxu1 %v6702_v40 }
 0x706   :  { %5990 = vmatpush3.bf16.msra.mxu1 %v6704_v60 }
 0x707   :  { %5991 = vmatprep.subr.bf16.mxu1 %v6706_v62 }
 0x70a   :  { %5992 = vmatpush3.bf16.msra.mxu1 %v6708_v30 }
 0x70b   :  { %5993 = vmatprep.subr.bf16.mxu1 %v6710_v22 }
 0x70e   :  { %5994 = vmatpush3.bf16.msra.mxu1 %v6712_v36 }
 0x70f   :  { %6346 = vmatprep.subr.bf16.mxu1 %v8282_v24 }
 0x7c4   :  { %v3116_v12 = vpop.f32.mrb[112].mxu1 }
 0x7c5   :  { %v3117_v34 = vadd.f32 %v5585_v17, %v3116_v12  ;;  %v6344_v5 = vpop.f32.mrb[113].mxu1 }
 0x7c6   :  { %v3119_v16 = vpop.f32.mrb[114].mxu1 }
 0x7c7   :  { %v5589_v47 = vmul.f32 -1.442695, %v3117_v34  ;;  %v6345_v21 = vpop.f32.mrb[115].mxu1 }
 0x7c9   :  { %6792 = vpow2.f32 %v5589_v47 }
 0x7d3   :  { %v6793_v33 = vpop.eup %6792 }
 0x7d4   :  { %v3125_v35 = vadd.f32 1.0, %v6793_v33 }
 0x7d6   :  { %6794 = vrcp.f32 %v3125_v35  ;;  %v6718_v35 = vld [vmem:[%s8770_s14 + $0x120] sm:$0xff]  }
 0x7e0   :  { %v6795_v14 = vpop.eup %6794 }
 0x7e1   :  { %v3129_v50 = vcombine.high %v6795_v14, %v6795_v14  ;;  %v3136_v3 = vrot.slane %v6795_v14, %v7727_v55 }
 0x7e3   :  { %v3143_v38 = vrot.slane %v3129_v50, %v7727_v55  ;;  %v3144_v46 = vcombine.high %v3136_v3, %v3136_v3  ;;  %v3152_v41 = vrot.slane %v3136_v3, %v7727_v55 }
 0x7e5   :  { %v3145_v39 = vcombine.high %v3143_v38, %v3143_v38  ;;  %v3159_v37 = vrot.slane %v3143_v38, %v7727_v55  ;;  %v3166_v13 = vrot.slane %v3144_v46, %v7727_v55  ;;  %v3174_v11 = vcombine.high %v3152_v41, %v3152_v41 }
 0x7e6   :  { %v3181_v43 = vrot.slane %v3152_v41, %v7725_v42 }
 0x7e7   :  { %v3173_v27 = vrot.slane %v3145_v39, %v7727_v55  ;;  %v3175_v20 = vcombine.high %v3159_v37, %v3159_v37  ;;  %v3176_v25 = vcombine.high %v3166_v13, %v3166_v13  ;;  %v3185_v45 = vrot.slane %v3166_v13, %v7725_v42 }
 0x7e8   :  { %v3189_v52 = vrot.slane %v3174_v11, %v7725_v42  ;;  %v3197_v19 = vrot.slane %v3159_v37, %v7725_v42  ;;  %v3218_v32 = vmul.f32 %v3181_v43, %v8139_v4  ;;  %v6719_v11 = vld [vmem:[%s8770_s14 + $0x128] sm:$0xff]  }
 0x7e9   :  { %v3177_v56 = vcombine.high %v3173_v27, %v3173_v27  ;;  %v3193_v6 = vrot.slane %v3176_v25, %v7725_v42  ;;  %v3201_v26 = vrot.slane %v3173_v27, %v7725_v42  ;;  %v3205_v2 = vrot.slane %v3175_v20, %v7725_v42  ;;  %v6720_v27 = vld [vmem:[%s8770_s14 + $0x130] sm:$0xff]  }
 0x7ea   :  { %v3219_v28 = vmul.f32 %v3185_v45, %v8145_v7  ;;  %v3220_v31 = vmul.f32 %v3189_v52, %v8137_v58  ;;  %v8306_v53 = vmul.f32 %v3197_v19, %v8155_v59  ;;  %3242 = vst [vmem:[#allocation3 + $0x2] sm:$0xff] %v3218_v32 }
 0x7eb   :  { %v3209_v0 = vrot.slane %v3177_v56, %v7725_v42  ;;  %v3221_v10 = vmul.f32 %v3193_v6, %v8142_v49  ;;  %v8311_v4 = vmul.f32 %v3201_v26, %v8161_v57  ;;  %v8314_v23 = vmul.f32 %v3205_v2, %v8153_v18  ;;  %v6721_v56 = vld [vmem:[%s8770_s14 + $0x138] sm:$0xff]  }
 0x7ec   :  { %3243 = vst [vmem:[#allocation3 + $0x12] sm:$0xff] %v3219_v28  ;;  %3244 = vst [vmem:[#allocation3 + $0x22] sm:$0xff] %v3220_v31 }
 0x7ed   :  { %3246 = vst [vmem:[#allocation3 + $0x42] sm:$0xff] %v8306_v53  ;;  %v8318_v58 = vmul.f32 %v3209_v0, %v8158_v54  ;;  %3245 = vst [vmem:[#allocation3 + $0x32] sm:$0xff] %v3221_v10  ;;  %v3292_v54 = vpack.c.bf16 %v3219_v28, %v3218_v32  ;;  %v3297_v34 = vpack.c.bf16 %v3221_v10, %v3220_v31 }
 0x7ee   :  { %3247 = vst [vmem:[#allocation3 + $0x52] sm:$0xff] %v8311_v4  ;;  %3248 = vst [vmem:[#allocation3 + $0x62] sm:$0xff] %v8314_v23  ;;  %v3302_v46 = vpack.c.bf16 %v8311_v4, %v8306_v53 }
 0x7ef   :  { %3249 = vst [vmem:[#allocation3 + $0x72] sm:$0xff] %v8318_v58  ;;  %v3307_v52 = vpack.c.bf16 %v8318_v58, %v8314_v23  ;;  %v6722_v23 = vld [vmem:[%s8772_s16] sm:$0xff]   ;;  %v6723_v58 = vld [vmem:[%s8772_s16 + $0x8] sm:$0xff]  }
 0x7f1   :  { %v3258_v49 = vld [vmem:[#allocation3 + $0x1] sm:$0xff] }
 0x7f2   :  { %v3274_v7 = vld [vmem:[#allocation3 + $0x3] sm:$0xff] }
 0x7f3   :  { %v3250_v59 = vld [vmem:[#allocation3] sm:$0xff]  ;;  %v3259_v57 = vld [vmem:[#allocation3 + $0x11] sm:$0xff] }
 0x7f4   :  { %v3275_v18 = vld [vmem:[#allocation3 + $0x13] sm:$0xff]  ;;  %v3291_v8 = vpack.c.bf16 %v3259_v57, %v3258_v49  ;;  %v3260_v9 = vld [vmem:[#allocation3 + $0x21] sm:$0xff] }
 0x7f5   :  { %v3251_v15 = vld [vmem:[#allocation3 + $0x10] sm:$0xff]  ;;  %v3293_v1 = vpack.c.bf16 %v3275_v18, %v3274_v7  ;;  %v3276_v62 = vld [vmem:[#allocation3 + $0x23] sm:$0xff]  ;;  %v6725_v7 = vld [vmem:[%s8772_s16 + $0x18] sm:$0xff]  }
 0x7f6   :  { %v3290_v40 = vpack.c.bf16 %v3251_v15, %v3250_v59  ;;  %v3261_v60 = vld [vmem:[#allocation3 + $0x31] sm:$0xff]  ;;  %3669 = vmatprep.mubr.bf16.mxu1 %v3291_v8  ;;  %v3252_v17 = vld [vmem:[#allocation3 + $0x20] sm:$0xff]  ;;  %v6727_v57 = vld [vmem:[%s8772_s16 + $0x28] sm:$0xff]  }
 0x7f7   :  { %v3296_v51 = vpack.c.bf16 %v3261_v60, %v3260_v9  ;;  %v3277_v61 = vld [vmem:[#allocation3 + $0x33] sm:$0xff]  ;;  %3734 = vmatprep.mubr.bf16.mxu0 %v3293_v1  ;;  %v3262_v5 = vld [vmem:[#allocation3 + $0x41] sm:$0xff]  ;;  %v5590_v9 = vld [vmem:[%s8774_s15] ss:$0 sm:$0xff] }
 0x7f8   :  { %v3298_v30 = vpack.c.bf16 %v3277_v61, %v3276_v62  ;;  %3670 = vmatmul.mubr.bf16.vlgmr.msra.gmra.mrb[116].mxu1 %v3290_v40  ;;  %3735 = vmatmul.mubr.bf16.vlgmr.msra.gmra.mrb[116].mxu0 %v3292_v54  ;;  %v3253_v22 = vld [vmem:[#allocation3 + $0x30] sm:$0xff]  ;;  %v3278_v16 = vld [vmem:[#allocation3 + $0x43] sm:$0xff]  ;;  %v6729_v8 = vld [vmem:[%s8772_s16 + $0x38] sm:$0xff]  }
 0x7f9   :  { %3677 = vmatprep.mubr.bf16.mxu1 %v3296_v51  ;;  %6347 = vmatpush3.bf16.msra.mxu1 %v8282_v24  ;;  %v3263_v36 = vld [vmem:[#allocation3 + $0x51] sm:$0xff]  ;;  %v3295_v12 = vpack.c.bf16 %v3253_v22, %v3252_v17  ;;  %v3254_v3 = vld [vmem:[#allocation3 + $0x40] sm:$0xff] }
 0x7fa   :  { %3742 = vmatprep.mubr.bf16.mxu0 %v3298_v30  ;;  %6348 = vmatprep.subr.bf16.mxu1 %v6715_v29  ;;  %v3279_v48 = vld [vmem:[#allocation3 + $0x53] sm:$0xff]  ;;  %v3301_v47 = vpack.c.bf16 %v3263_v36, %v3262_v5  ;;  %v3264_v41 = vld [vmem:[#allocation3 + $0x61] sm:$0xff] }
 0x7fb   :  { %v3303_v21 = vpack.c.bf16 %v3279_v48, %v3278_v16  ;;  %v6717_v24 = vld [vmem:[%s8770_s14 + $0x118] sm:$0xff]   ;;  %v3255_v33 = vld [vmem:[#allocation3 + $0x50] sm:$0xff]  ;;  %v3280_v39 = vld [vmem:[#allocation3 + $0x63] sm:$0xff]  ;;  %6371 = vmatpush3.bf16.msra.mxu0 %v6722_v23 }
 0x7fc   :  { %v3265_v14 = vld [vmem:[#allocation3 + $0x71] sm:$0xff]  ;;  %v3300_v38 = vpack.c.bf16 %v3255_v33, %v3254_v3  ;;  %v3256_v25 = vld [vmem:[#allocation3 + $0x60] sm:$0xff]  ;;  %6372 = vmatprep.subr.bf16.mxu0 %v8868_v44 }
 0x7fd   :  { %6349 = vmatpush3.bf16.msra.mxu1 %v6715_v29  ;;  %v3281_v50 = vld [vmem:[#allocation3 + $0x73] sm:$0xff]  ;;  %v3306_v37 = vpack.c.bf16 %v3265_v14, %v3264_v41  ;;  %v3282_v19 = vld [vmem:[#allocation3 + $0x4] sm:$0xff] }
 0x7fe   :  { %6350 = vmatprep.subr.bf16.mxu1 %v6716_v63  ;;  %v3308_v13 = vpack.c.bf16 %v3281_v50, %v3280_v39  ;;  %v3257_v43 = vld [vmem:[#allocation3 + $0x70] sm:$0xff]  ;;  %v3284_v2 = vld [vmem:[#allocation3 + $0x24] sm:$0xff] }
 0x7ff   :  { %v3283_v20 = vld [vmem:[#allocation3 + $0x14] sm:$0xff]  ;;  %v3305_v45 = vpack.c.bf16 %v3257_v43, %v3256_v25  ;;  %v3286_v31 = vld [vmem:[#allocation3 + $0x44] sm:$0xff]  ;;  %6373 = vmatpush3.bf16.msra.mxu0 %v6723_v58 }
 0x800   :  { %3678 = vmatmul.mubr.bf16.gmra.mrb[120].mxu1 %v3295_v12  ;;  %3743 = vmatmul.mubr.bf16.gmra.mrb[120].mxu0 %v3297_v34  ;;  %v3294_v32 = vpack.c.bf16 %v3283_v20, %v3282_v19  ;;  %v3285_v6 = vld [vmem:[#allocation3 + $0x34] sm:$0xff]  ;;  %v3288_v10 = vld [vmem:[#allocation3 + $0x64] sm:$0xff] }
 0x801   :  { %3685 = vmatprep.mubr.bf16.mxu1 %v3301_v47  ;;  %3750 = vmatprep.mubr.bf16.mxu0 %v3303_v21  ;;  %v3287_v26 = vld [vmem:[#allocation3 + $0x54] sm:$0xff]  ;;  %v3299_v28 = vpack.c.bf16 %v3285_v6, %v3284_v2  ;;  %v6726_v59 = vld [vmem:[%s8772_s16 + $0x20] sm:$0xff]  }
 0x802   :  { %6351 = vmatpush3.bf16.msra.mxu1 %v6716_v63  ;;  %v3304_v53 = vpack.c.bf16 %v3287_v26, %v3286_v31  ;;  %v3289_v0 = vld [vmem:[#allocation3 + $0x74] sm:$0xff]  ;;  %6374 = vmatprep.subr.bf16.mxu0 %v8868_v44  ;;  %v6730_v18 = vld [vmem:[%s8773_s18] sm:$0xff]  }
 0x803   :  { %6352 = vmatprep.subr.bf16.mxu1 %v6717_v24  ;;  %v3309_v4 = vpack.c.bf16 %v3289_v0, %v3288_v10  ;;  %v6724_v49 = vld [vmem:[%s8772_s16 + $0x10] sm:$0xff]  }
 0x804   :  { %6375 = vmatpush3.bf16.msra.mxu0 %v6724_v49  ;;  %v6728_v15 = vld [vmem:[%s8772_s16 + $0x30] sm:$0xff]  }
 0x805   :  { %6376 = vmatprep.subr.bf16.mxu0 %v8868_v44 }
 0x806   :  { %6353 = vmatpush3.bf16.msra.mxu1 %v6717_v24 }
 0x807   :  { %6354 = vmatprep.subr.bf16.mxu1 %v6718_v35 }
 0x808   :  { %3686 = vmatmul.mubr.bf16.gmra.mrb[124].mxu1 %v3300_v38  ;;  %3751 = vmatmul.mubr.bf16.gmra.mrb[124].mxu0 %v3302_v46 }
 0x809   :  { %3693 = vmatprep.mubr.bf16.mxu1 %v3306_v37  ;;  %3758 = vmatprep.mubr.bf16.mxu0 %v3308_v13 }
 0x80a   :  { %6355 = vmatpush3.bf16.msra.mxu1 %v6718_v35  ;;  %6377 = vmatpush3.bf16.msra.mxu0 %v6725_v7 }
 0x80b   :  { %6356 = vmatprep.subr.bf16.mxu1 %v6719_v11  ;;  %6378 = vmatprep.subr.bf16.mxu0 %v8868_v44 }
 0x80e   :  { %6357 = vmatpush3.bf16.msra.mxu1 %v6719_v11  ;;  %6379 = vmatpush3.bf16.msra.mxu0 %v6726_v59 }
 0x80f   :  { %6358 = vmatprep.subr.bf16.mxu1 %v6720_v27  ;;  %6380 = vmatprep.subr.bf16.mxu0 %v8868_v44 }
 0x810   :  { %3694 = vmatmul.mubr.bf16.gmra.mrb[128].mxu1 %v3305_v45  ;;  %3759 = vmatmul.mubr.bf16.gmra.mrb[128].mxu0 %v3307_v52 }
 0x811   :  { %6362 = vmatprep.mubr.bf16.mxu1 %v3294_v32  ;;  %6386 = vmatprep.mubr.msk.bf16.mxu0 %vm6806_vm0, %v8868_v44 }
 0x812   :  { %6359 = vmatpush3.bf16.msra.mxu1 %v6720_v27  ;;  %6381 = vmatpush3.bf16.msra.mxu0 %v6727_v57 }
 0x813   :  { %6360 = vmatprep.subr.bf16.mxu1 %v6721_v56  ;;  %6382 = vmatprep.subr.bf16.mxu0 %v8868_v44 }
 0x816   :  { %6361 = vmatpush3.bf16.msra.mxu1 %v6721_v56  ;;  %6383 = vmatpush3.bf16.msra.mxu0 %v6728_v15 }
 0x817   :  { %6390 = vmatprep.subr.bf16.mxu1 %v8868_v44  ;;  %6384 = vmatprep.subr.bf16.mxu0 %v8868_v44 }
 0x819   :  { %6363 = vmatmul.mubr.bf16.vlgmr.msra.gmra.mrb[132].mxu1 %v3299_v28 }
 0x81a   :  { %6366 = vmatprep.mubr.bf16.mxu1 %v3304_v53  ;;  %6391 = vmatpush3.bf16.msra.mxu1 %v6730_v18 }
 0x81b   :  { %6385 = vmatpush3.bf16.msra.mxu0 %v6729_v8 }
 0x821   :  { %6367 = vmatmul.mubr.bf16.gmra.mrb[136].mxu1 %v3309_v4 }
 0x822   :  { %6392 = vmatprep.mubr.msk.bf16.mxu1 %vm6806_vm0, %v8868_v44 }
 0x8cb   :  { %v5995_v1 = vpop.f32.mrb[116].mxu1  ;;  %v6035_v40 = vpop.f32.mrb[116].mxu0 }
 0x8cc   :  { %v5996_v60 = vpop.f32.mrb[117].mxu1  ;;  %v6036_v54 = vpop.f32.mrb[117].mxu0 }
 0x8cd   :  { %v5997_v51 = vadd.f32 %v5996_v60, %v5995_v1  ;;  %v6037_v62 = vadd.f32 %v6036_v54, %v6035_v40  ;;  %v5998_v61 = vpop.f32.mrb[118].mxu1  ;;  %v6038_v30 = vpop.f32.mrb[118].mxu0 }
 0x8ce   :  { %v5999_v29 = vpop.f32.mrb[119].mxu1  ;;  %v6039_v22 = vpop.f32.mrb[119].mxu0 }
 0x8cf   :  { %v3672_v63 = vadd.f32 %v5997_v51, %v5590_v9  ;;  %v6000_v36 = vadd.f32 %v5999_v29, %v5998_v61  ;;  %v6040_v48 = vadd.f32 %v6039_v22, %v6038_v30 }
 0x8d1   :  { %v3675_v17 = vadd.f32 %v6000_v36, %v5590_v9  ;;  %v3737_v12 = vadd.f32 %v6037_v62, %v3672_v63 }
 0x8d3   :  { %v6001_v34 = vpop.f32.mrb[120].mxu1  ;;  %v6041_v5 = vpop.f32.mrb[120].mxu0  ;;  %v3740_v16 = vadd.f32 %v6040_v48, %v3675_v17 }
 0x8d4   :  { %v6002_v47 = vpop.f32.mrb[121].mxu1  ;;  %v6042_v21 = vpop.f32.mrb[121].mxu0 }
 0x8d5   :  { %v6003_v24 = vadd.f32 %v6002_v47, %v6001_v34  ;;  %v6043_v33 = vadd.f32 %v6042_v21, %v6041_v5  ;;  %v6004_v35 = vpop.f32.mrb[122].mxu1  ;;  %v6044_v14 = vpop.f32.mrb[122].mxu0 }
 0x8d6   :  { %v6005_v50 = vpop.f32.mrb[123].mxu1  ;;  %v6045_v3 = vpop.f32.mrb[123].mxu0 }
 0x8d7   :  { %v3680_v38 = vadd.f32 %v6003_v24, %v5590_v9  ;;  %v6006_v46 = vadd.f32 %v6005_v50, %v6004_v35  ;;  %v6046_v41 = vadd.f32 %v6045_v3, %v6044_v14 }
 0x8d9   :  { %v3683_v39 = vadd.f32 %v6006_v46, %v5590_v9  ;;  %v3745_v37 = vadd.f32 %v6043_v33, %v3680_v38 }
 0x8db   :  { %v6007_v13 = vpop.f32.mrb[124].mxu1  ;;  %v6047_v11 = vpop.f32.mrb[124].mxu0  ;;  %v3748_v43 = vadd.f32 %v6046_v41, %v3683_v39 }
 0x8dc   :  { %v6008_v27 = vpop.f32.mrb[125].mxu1  ;;  %v6048_v20 = vpop.f32.mrb[125].mxu0 }
 0x8dd   :  { %v6009_v25 = vadd.f32 %v6008_v27, %v6007_v13  ;;  %v6049_v45 = vadd.f32 %v6048_v20, %v6047_v11  ;;  %v6010_v52 = vpop.f32.mrb[126].mxu1  ;;  %v6050_v19 = vpop.f32.mrb[126].mxu0 }
 0x8de   :  { %v6011_v32 = vpop.f32.mrb[127].mxu1  ;;  %v6051_v56 = vpop.f32.mrb[127].mxu0 }
 0x8df   :  { %v3688_v6 = vadd.f32 %v6009_v25, %v5590_v9  ;;  %v6012_v26 = vadd.f32 %v6011_v32, %v6010_v52  ;;  %v6052_v2 = vadd.f32 %v6051_v56, %v6050_v19 }
 0x8e1   :  { %v3691_v28 = vadd.f32 %v6012_v26, %v5590_v9  ;;  %v3753_v31 = vadd.f32 %v6049_v45, %v3688_v6 }
 0x8e3   :  { %v6013_v53 = vpop.f32.mrb[128].mxu1  ;;  %v6053_v0 = vpop.f32.mrb[128].mxu0  ;;  %v3756_v10 = vadd.f32 %v6052_v2, %v3691_v28 }
 0x8e4   :  { %v6014_v4 = vpop.f32.mrb[129].mxu1  ;;  %v6054_v23 = vpop.f32.mrb[129].mxu0 }
 0x8e5   :  { %v6015_v58 = vadd.f32 %v6014_v4, %v6013_v53  ;;  %v6055_v49 = vadd.f32 %v6054_v23, %v6053_v0  ;;  %v6016_v7 = vpop.f32.mrb[130].mxu1  ;;  %v6056_v59 = vpop.f32.mrb[130].mxu0 }
 0x8e6   :  { %v6017_v57 = vpop.f32.mrb[131].mxu1  ;;  %v6057_v18 = vpop.f32.mrb[131].mxu0 }
 0x8e7   :  { %v3696_v15 = vadd.f32 %v6015_v58, %v5590_v9  ;;  %v6018_v8 = vadd.f32 %v6017_v57, %v6016_v7  ;;  %v6058_v1 = vadd.f32 %v6057_v18, %v6056_v59 }
 0x8e9   :  { %v3699_v40 = vadd.f32 %v6018_v8, %v5590_v9  ;;  %v3761_v60 = vadd.f32 %v6055_v49, %v3696_v15 }
 0x8eb   :  { %v3764_v54 = vadd.f32 %v6058_v1, %v3699_v40 }
 0x8ec   :  { %v6364_v51 = vpop.f32.mrb[132].mxu1 }
 0x8ed   :  { %v3810_v62 = vadd.f32 %v6364_v51, %v3745_v37  ;;  %v3801_v61 = vpop.f32.mrb[133].mxu1 }
 0x8ee   :  { %v3802_v30 = vadd.f32 %v3801_v61, %v3737_v12  ;;  %v6365_v29 = vpop.f32.mrb[134].mxu1 }
 0x8ef   :  { %v8391_v22 = vmax.f32 %v3810_v62, 0.0  ;;  %v3813_v63 = vadd.f32 %v6365_v29, %v3748_v43  ;;  %v3804_v36 = vpop.f32.mrb[135].mxu1 }
 0x8f0   :  { %v8393_v48 = vmax.f32 %v3802_v30, 0.0  ;;  %v3805_v17 = vadd.f32 %v3804_v36, %v3740_v16 }
 0x8f1   :  { %v3852_v34 = vrot.slane %v8391_v22, 4  ;;  %v8396_v5 = vmax.f32 %v3813_v63, 0.0 }
 0x8f2   :  { %v3840_v9 = vrot.slane %v8393_v48, 4  ;;  %v8399_v47 = vmax.f32 %v3805_v17, 0.0 }
 0x8f3   :  { %v3853_v21 = vadd.f32 %v3852_v34, %v8391_v22  ;;  %v3858_v12 = vrot.slane %v8396_v5, 4 }
 0x8f4   :  { %v3841_v24 = vadd.f32 %v3840_v9, %v8393_v48  ;;  %v3846_v33 = vrot.slane %v8399_v47, 4  ;;  %v6368_v35 = vpop.f32.mrb[136].mxu1 }
 0x8f5   :  { %v3854_v14 = vrot.slane %v3853_v21, 2  ;;  %v3859_v16 = vadd.f32 %v3858_v12, %v8396_v5  ;;  %v3826_v50 = vadd.f32 %v6368_v35, %v3761_v60  ;;  %v3817_v3 = vpop.f32.mrb[137].mxu1 }
 0x8f6   :  { %v3842_v38 = vrot.slane %v3841_v24, 2  ;;  %v3847_v46 = vadd.f32 %v3846_v33, %v8399_v47  ;;  %v3818_v41 = vadd.f32 %v3817_v3, %v3753_v31  ;;  %v6369_v39 = vpop.f32.mrb[138].mxu1 }
 0x8f7   :  { %v3855_v37 = vadd.f32 %v3854_v14, %v3853_v21  ;;  %v3860_v13 = vrot.slane %v3859_v16, 2  ;;  %v8407_v11 = vmax.f32 %v3826_v50, 0.0  ;;  %v3829_v43 = vadd.f32 %v6369_v39, %v3764_v54  ;;  %v3820_v27 = vpop.f32.mrb[139].mxu1 }
 0x8f8   :  { %v3843_v20 = vadd.f32 %v3842_v38, %v3841_v24  ;;  %v3848_v25 = vrot.slane %v3847_v46, 2  ;;  %v8409_v45 = vmax.f32 %v3818_v41, 0.0  ;;  %v3821_v52 = vadd.f32 %v3820_v27, %v3756_v10 }
 0x8f9   :  { %v3856_v19 = vrot.slane %v3855_v37, 1  ;;  %v3861_v32 = vadd.f32 %v3860_v13, %v3859_v16  ;;  %v3876_v56 = vrot.slane %v8407_v11, 4  ;;  %v8412_v6 = vmax.f32 %v3829_v43, 0.0 }
 0x8fa   :  { %v3844_v26 = vrot.slane %v3843_v20, 1  ;;  %v3849_v2 = vadd.f32 %v3848_v25, %v3847_v46  ;;  %v3864_v28 = vrot.slane %v8409_v45, 4  ;;  %v8415_v31 = vmax.f32 %v3821_v52, 0.0 }
 0x8fb   :  { %v3857_v53 = vadd.f32 %v3856_v19, %v3855_v37  ;;  %v3862_v0 = vrot.slane %v3861_v32, 1  ;;  %v3877_v4 = vadd.f32 %v3876_v56, %v8407_v11  ;;  %v3882_v23 = vrot.slane %v8412_v6, 4 }
 0x8fc   :  { %v3845_v58 = vadd.f32 %v3844_v26, %v3843_v20  ;;  %v3850_v10 = vrot.slane %v3849_v2, 1  ;;  %v3865_v49 = vadd.f32 %v3864_v28, %v8409_v45  ;;  %v3870_v7 = vrot.slane %v8415_v31, 4 }
 0x8fd   :  { %v3890_v59 = vmul.f32 0.125, %v3857_v53  ;;  %v3863_v57 = vadd.f32 %v3862_v0, %v3861_v32  ;;  %v3878_v18 = vrot.slane %v3877_v4, 2  ;;  %v3883_v15 = vadd.f32 %v3882_v23, %v8412_v6 }
 0x8fe   :  { %v3888_v8 = vmul.f32 0.125, %v3845_v58  ;;  %v3851_v1 = vadd.f32 %v3850_v10, %v3849_v2  ;;  %v3866_v40 = vrot.slane %v3865_v49, 2  ;;  %v3871_v60 = vadd.f32 %v3870_v7, %v8415_v31  ;;  %v5631_v7 = vld [vmem:[%s8775_s17] ss:$0 sm:$0xff] }
 0x8ff   :  { %v3879_v54 = vadd.f32 %v3878_v18, %v3877_v4  ;;  %v3884_v51 = vrot.slane %v3883_v15, 2  ;;  %v3891_v63 = vmul.f32 0.125, %v3863_v57  ;;  %v3898_v34 = vpack.c.bf16 %v3890_v59, %v3890_v59 }
 0x900   :  { %v3896_v62 = vpack.c.bf16 %v3888_v8, %v3888_v8  ;;  %v3889_v61 = vmul.f32 0.125, %v3851_v1  ;;  %v3867_v30 = vadd.f32 %v3866_v40, %v3865_v49  ;;  %v3872_v29 = vrot.slane %v3871_v60, 2 }
 0x901   :  { %v3880_v36 = vrot.slane %v3879_v54, 1  ;;  %v3885_v17 = vadd.f32 %v3884_v51, %v3883_v15  ;;  %v3899_v3 = vpack.c.bf16 %v3891_v63, %v3891_v63  ;;  %v3937_v41 = vunpack.c.l.b16 %v3898_v34  ;;  %v6733_v51 = vld [vmem:[%s8776_s20] sm:$0xff]   ;;  %v6738_v63 = vld [vmem:[%s8776_s20 + $0x88] sm:$0xff]   ;;  %v6741_v34 = vld [vmem:[%s8776_s20 + $0x10] sm:$0xff]  }
 0x902   :  { %v3897_v9 = vpack.c.bf16 %v3889_v61, %v3889_v61  ;;  %v3868_v21 = vrot.slane %v3867_v30, 1  ;;  %v3873_v12 = vadd.f32 %v3872_v29, %v3871_v60  ;;  %v3935_v35 = vunpack.c.l.b16 %v3896_v62  ;;  %v6731_v60 = vld [vmem:[%s8776_s20 + $0x40] sm:$0xff]   ;;  %v6735_v61 = vld [vmem:[%s8776_s20 + $0x48] sm:$0xff]  }
 0x903   :  { %v3881_v24 = vadd.f32 %v3880_v36, %v3879_v54  ;;  %v3886_v33 = vrot.slane %v3885_v17, 1  ;;  %v3938_v52 = vunpack.c.l.b16 %v3899_v3  ;;  %v6732_v54 = vld [vmem:[%s8776_s20 + $0xc0] sm:$0xff]   ;;  %6082 = vmatprep.subr.bf16.mxu0 %v6731_v60  ;;  %v6737_v29 = vld [vmem:[%s8776_s20 + $0x8] sm:$0xff]   ;;  %v6739_v36 = vld [vmem:[%s8776_s20 + $0x50] sm:$0xff]  }
 0x904   :  { %v3936_v14 = vunpack.c.l.b16 %v3897_v9  ;;  %v3869_v16 = vadd.f32 %v3868_v21, %v3867_v30  ;;  %v3874_v50 = vrot.slane %v3873_v12, 1  ;;  %6122 = vmatprep.subr.bf16.mxu1 %v6732_v54  ;;  %v6734_v62 = vld [vmem:[%s8776_s20 + $0x80] sm:$0xff]   ;;  %v6736_v30 = vld [vmem:[%s8776_s20 + $0xc8] sm:$0xff]   ;;  %v6742_v9 = vld [vmem:[%s8776_s20 + $0x90] sm:$0xff]  }
 0x905   :  { %v3894_v38 = vmul.f32 0.125, %v3881_v24  ;;  %v3887_v46 = vadd.f32 %v3886_v33, %v3885_v17  ;;  %v6740_v17 = vld [vmem:[%s8776_s20 + $0xd0] sm:$0xff]   ;;  %v6743_v21 = vld [vmem:[%s8776_s20 + $0x58] sm:$0xff]   ;;  %v6751_v3 = vld [vmem:[%s8776_s20 + $0x68] sm:$0xff]  }
 0x906   :  { %v3943_v39 = vsel %vm1250_vm1, %v3936_v14, %v3935_v35  ;;  %v3892_v37 = vmul.f32 0.125, %v3869_v16  ;;  %v3875_v13 = vadd.f32 %v3874_v50, %v3873_v12  ;;  %v6744_v12 = vld [vmem:[%s8776_s20 + $0xd8] sm:$0xff]   ;;  %v6747_v35 = vld [vmem:[%s8776_s20 + $0x60] sm:$0xff]  }
 0x907   :  { %v3895_v43 = vmul.f32 0.125, %v3887_v46  ;;  %v3944_v27 = vsel %vm1252_vm2, %v3937_v41, %v3943_v39  ;;  %v3902_v19 = vpack.c.bf16 %v3894_v38, %v3894_v38  ;;  %v6745_v24 = vld [vmem:[%s8776_s20 + $0x18] sm:$0xff]   ;;  %v6748_v14 = vld [vmem:[%s8776_s20 + $0xe0] sm:$0xff]   ;;  %v6752_v38 = vld [vmem:[%s8776_s20 + $0xe8] sm:$0xff]  }
 0x908   :  { %v3900_v20 = vpack.c.bf16 %v3892_v37, %v3892_v37  ;;  %v3893_v25 = vmul.f32 0.125, %v3875_v13  ;;  %v3945_v2 = vsel %vm1254_vm3, %v3938_v52, %v3944_v27  ;;  %v6746_v33 = vld [vmem:[%s8776_s20 + $0x98] sm:$0xff]   ;;  %v6749_v16 = vld [vmem:[%s8776_s20 + $0x20] sm:$0xff]   ;;  %v6753_v46 = vld [vmem:[%s8776_s20 + $0x28] sm:$0xff]  }
 0x909   :  { %v3903_v56 = vpack.c.bf16 %v3895_v43, %v3895_v43  ;;  %v3941_v0 = vunpack.c.l.b16 %v3902_v19  ;;  %v6750_v50 = vld [vmem:[%s8776_s20 + $0xa0] sm:$0xff]   ;;  %v6754_v41 = vld [vmem:[%s8776_s20 + $0xa8] sm:$0xff]   ;;  %v6755_v39 = vld [vmem:[%s8776_s20 + $0x70] sm:$0xff]  }
 0x90a   :  { %v3939_v32 = vunpack.c.l.b16 %v3900_v20  ;;  %v3901_v26 = vpack.c.bf16 %v3893_v25, %v3893_v25  ;;  %v6756_v37 = vld [vmem:[%s8776_s20 + $0xf0] sm:$0xff]   ;;  %v6759_v27 = vld [vmem:[%s8776_s20 + $0x78] sm:$0xff]   ;;  %v8533_v19 = vld [vmem:[%s8776_s20 + $0x100] sm:$0xff]  }
 0x90b   :  { %v3942_v4 = vunpack.c.l.b16 %v3903_v56  ;;  %v6757_v13 = vld [vmem:[%s8776_s20 + $0x30] sm:$0xff]   ;;  %v6760_v20 = vld [vmem:[%s8776_s20 + $0xf8] sm:$0xff]  }
 0x90c   :  { %v3946_v28 = vsel %vm1256_vm4, %v3939_v32, %v3945_v2  ;;  %v3940_v53 = vunpack.c.l.b16 %v3901_v26  ;;  %v6758_v43 = vld [vmem:[%s8776_s20 + $0xb0] sm:$0xff]   ;;  %v6761_v25 = vld [vmem:[%s8776_s20 + $0x38] sm:$0xff]   ;;  %v5640_v32 = vld [vmem:[%s8777_s19] ss:$0 sm:$0xff] }
 0x90d   :  { %v6762_v52 = vld [vmem:[%s8776_s20 + $0xb8] sm:$0xff]  }
 0x90e   :  { %v3947_v23 = vsel %vm1258_vm5, %v3940_v53, %v3946_v28 }
 0x90f   :  { %v3948_v58 = vsel %vm1260_vm6, %v3941_v0, %v3947_v23 }
 0x910   :  { %v3949_v10 = vsel %vm1262_vm7, %v3942_v4, %v3948_v58 }
 0x911   :  { %v3950_v49 = vpack.c.b16 %v3949_v10, %v3949_v10 }
 0x913   :  { %6387 = vmatmul.mubr.bf16.vlgmr.msra.gmra.mrb[132].mxu0 %v3950_v49 }
 0x914   :  { %6083 = vmatpush3.bf16.msra.mxu0 %v6733_v51 }
 0x915   :  { %6084 = vmatprep.subr.bf16.mxu0 %v6735_v61 }
 0x918   :  { %6085 = vmatpush3.bf16.msra.mxu0 %v6737_v29 }
 0x919   :  { %6086 = vmatprep.subr.bf16.mxu0 %v6739_v36 }
 0x91c   :  { %6087 = vmatpush3.bf16.msra.mxu0 %v6741_v34 }
 0x91d   :  { %6088 = vmatprep.subr.bf16.mxu0 %v6743_v21 }
 0x920   :  { %6089 = vmatpush3.bf16.msra.mxu0 %v6745_v24 }
 0x921   :  { %6090 = vmatprep.subr.bf16.mxu0 %v6747_v35 }
 0x924   :  { %6091 = vmatpush3.bf16.msra.mxu0 %v6749_v16 }
 0x925   :  { %6092 = vmatprep.subr.bf16.mxu0 %v6751_v3 }
 0x928   :  { %6093 = vmatpush3.bf16.msra.mxu0 %v6753_v46 }
 0x929   :  { %6094 = vmatprep.subr.bf16.mxu0 %v6755_v39 }
 0x92c   :  { %6095 = vmatpush3.bf16.msra.mxu0 %v6757_v13 }
 0x92d   :  { %6096 = vmatprep.subr.bf16.mxu0 %v6759_v27 }
 0x930   :  { %6097 = vmatpush3.bf16.msra.mxu0 %v6761_v25 }
 0x931   :  { %6396 = vmatprep.subr.bf16.mxu0 %v8533_v19 }
 0x9e6   :  { %v4034_v59 = vpop.f32.mrb[132].mxu0 }
 0x9e7   :  { %v4035_v57 = vadd.f32 %v5631_v7, %v4034_v59  ;;  %v6388_v18 = vpop.f32.mrb[133].mxu0 }
 0x9e8   :  { %v4037_v15 = vpop.f32.mrb[134].mxu0 }
 0x9e9   :  { %v4040_v8 = vmax.f32 %v4035_v57, 0.0  ;;  %v6389_v1 = vpop.f32.mrb[135].mxu0 }
 0x9eb   :  { %v4041_v40 = vpack.c.bf16 %v4040_v8, %v4040_v8 }
 0x9ed   :  { %6393 = vmatmul.mubr.msk.bf16.vlgmr.msra.gmra.mrb[140].mxu1 %vm4057_vm10, %v4041_v40 }
 0x9ee   :  { %6123 = vmatpush3.bf16.msra.mxu1 %v6734_v62 }
 0x9ef   :  { %6124 = vmatprep.subr.bf16.mxu1 %v6736_v30 }
 0x9f2   :  { %6125 = vmatpush3.bf16.msra.mxu1 %v6738_v63 }
 0x9f3   :  { %6126 = vmatprep.subr.bf16.mxu1 %v6740_v17 }
 0x9f6   :  { %6127 = vmatpush3.bf16.msra.mxu1 %v6742_v9 }
 0x9f7   :  { %6128 = vmatprep.subr.bf16.mxu1 %v6744_v12 }
 0x9fa   :  { %6129 = vmatpush3.bf16.msra.mxu1 %v6746_v33 }
 0x9fb   :  { %6130 = vmatprep.subr.bf16.mxu1 %v6748_v14 }
 0x9fe   :  { %6131 = vmatpush3.bf16.msra.mxu1 %v6750_v50 }
 0x9ff   :  { %6132 = vmatprep.subr.bf16.mxu1 %v6752_v38 }
 0xa02   :  { %6133 = vmatpush3.bf16.msra.mxu1 %v6754_v41 }
 0xa03   :  { %6134 = vmatprep.subr.bf16.mxu1 %v6756_v37 }
 0xa06   :  { %6135 = vmatpush3.bf16.msra.mxu1 %v6758_v43  ;;  %v6764_v43 = vld [vmem:[%s8776_s20 + $0x108] sm:$0xff]  }
 0xa07   :  { %6136 = vmatprep.subr.bf16.mxu1 %v6760_v20  ;;  %v6765_v20 = vld [vmem:[%s8776_s20 + $0x110] sm:$0xff]  }
 0xa0a   :  { %6137 = vmatpush3.bf16.msra.mxu1 %v6762_v52 }
 0xa0b   :  { %6420 = vmatprep.subr.bf16.mxu1 %v8868_v44 }
 0xac0   :  { %v4095_v56 = vpop.f32.mrb[140].mxu1 }
 0xac1   :  { %v4096_v26 = vadd.f32 %v5640_v32, %v4095_v56  ;;  %v6394_v2 = vpop.f32.mrb[141].mxu1 }
 0xac2   :  { %v4098_v28 = vpop.f32.mrb[142].mxu1 }
 0xac3   :  { %v5643_v53 = vmul.f32 -1.442695, %v4096_v26  ;;  %v6395_v0 = vpop.f32.mrb[143].mxu1 }
 0xac5   :  { %6796 = vpow2.f32 %v5643_v53 }
 0xacf   :  { %v6797_v4 = vpop.eup %6796 }
 0xad0   :  { %v4104_v23 = vadd.f32 1.0, %v6797_v4 }
 0xad2   :  { %6798 = vrcp.f32 %v4104_v23  ;;  %v6767_v23 = vld [vmem:[%s8776_s20 + $0x120] sm:$0xff]  }
 0xadc   :  { %v6799_v58 = vpop.eup %6798 }
 0xadd   :  { %v4108_v10 = vcombine.high %v6799_v58, %v6799_v58  ;;  %v4115_v49 = vrot.slane %v6799_v58, %v7727_v55 }
 0xadf   :  { %v4122_v7 = vrot.slane %v4108_v10, %v7727_v55  ;;  %v4123_v59 = vcombine.high %v4115_v49, %v4115_v49  ;;  %v4131_v57 = vrot.slane %v4115_v49, %v7727_v55 }
 0xae1   :  { %v4124_v18 = vcombine.high %v4122_v7, %v4122_v7  ;;  %v4138_v15 = vrot.slane %v4122_v7, %v7727_v55  ;;  %v4145_v8 = vrot.slane %v4123_v59, %v7727_v55  ;;  %v4153_v1 = vcombine.high %v4131_v57, %v4131_v57 }
 0xae2   :  { %v4160_v40 = vrot.slane %v4131_v57, %v7725_v42 }
 0xae3   :  { %v4152_v60 = vrot.slane %v4124_v18, %v7727_v55  ;;  %v4154_v54 = vcombine.high %v4138_v15, %v4138_v15  ;;  %v4155_v51 = vcombine.high %v4145_v8, %v4145_v8  ;;  %v4164_v62 = vrot.slane %v4145_v8, %v7725_v42 }
 0xae4   :  { %v4168_v61 = vrot.slane %v4153_v1, %v7725_v42  ;;  %v4176_v30 = vrot.slane %v4138_v15, %v7725_v42  ;;  %v4197_v29 = vmul.f32 %v4160_v40, %v8393_v48  ;;  %v6768_v1 = vld [vmem:[%s8776_s20 + $0x128] sm:$0xff]  }
 0xae5   :  { %v4156_v63 = vcombine.high %v4152_v60, %v4152_v60  ;;  %v4172_v36 = vrot.slane %v4155_v51, %v7725_v42  ;;  %v4180_v17 = vrot.slane %v4152_v60, %v7725_v42  ;;  %v4184_v34 = vrot.slane %v4154_v54, %v7725_v42  ;;  %v6769_v60 = vld [vmem:[%s8776_s20 + $0x130] sm:$0xff]  }
 0xae6   :  { %v4198_v9 = vmul.f32 %v4164_v62, %v8399_v47  ;;  %v4199_v21 = vmul.f32 %v4168_v61, %v8391_v22  ;;  %v8557_v12 = vmul.f32 %v4176_v30, %v8409_v45  ;;  %4221 = vst [vmem:[#allocation4 + $0x2] sm:$0xff] %v4197_v29 }
 0xae7   :  { %v4188_v24 = vrot.slane %v4156_v63, %v7725_v42  ;;  %v4200_v33 = vmul.f32 %v4172_v36, %v8396_v5  ;;  %v8562_v48 = vmul.f32 %v4180_v17, %v8415_v31  ;;  %v8565_v35 = vmul.f32 %v4184_v34, %v8407_v11  ;;  %v6770_v63 = vld [vmem:[%s8776_s20 + $0x138] sm:$0xff]  }
 0xae8   :  { %4222 = vst [vmem:[#allocation4 + $0x12] sm:$0xff] %v4198_v9  ;;  %4223 = vst [vmem:[#allocation4 + $0x22] sm:$0xff] %v4199_v21 }
 0xae9   :  { %4225 = vst [vmem:[#allocation4 + $0x42] sm:$0xff] %v8557_v12  ;;  %v8569_v22 = vmul.f32 %v4188_v24, %v8412_v6  ;;  %4224 = vst [vmem:[#allocation4 + $0x32] sm:$0xff] %v4200_v33  ;;  %v4271_v6 = vpack.c.bf16 %v4198_v9, %v4197_v29  ;;  %v4276_v26 = vpack.c.bf16 %v4200_v33, %v4199_v21 }
 0xaea   :  { %4226 = vst [vmem:[#allocation4 + $0x52] sm:$0xff] %v8562_v48  ;;  %4227 = vst [vmem:[#allocation4 + $0x62] sm:$0xff] %v8565_v35  ;;  %v4281_v59 = vpack.c.bf16 %v8562_v48, %v8557_v12 }
 0xaeb   :  { %4228 = vst [vmem:[#allocation4 + $0x72] sm:$0xff] %v8569_v22  ;;  %v4286_v61 = vpack.c.bf16 %v8569_v22, %v8565_v35  ;;  %v6771_v35 = vld [vmem:[%s8778_s22] sm:$0xff]   ;;  %v6772_v22 = vld [vmem:[%s8778_s22 + $0x8] sm:$0xff]  }
 0xaed   :  { %v4237_v5 = vld [vmem:[#allocation4 + $0x1] sm:$0xff] }
 0xaee   :  { %v4253_v47 = vld [vmem:[#allocation4 + $0x3] sm:$0xff] }
 0xaef   :  { %v4229_v45 = vld [vmem:[#allocation4] sm:$0xff]  ;;  %v4238_v31 = vld [vmem:[#allocation4 + $0x11] sm:$0xff] }
 0xaf0   :  { %v4254_v11 = vld [vmem:[#allocation4 + $0x13] sm:$0xff]  ;;  %v4270_v16 = vpack.c.bf16 %v4238_v31, %v4237_v5  ;;  %v4239_v38 = vld [vmem:[#allocation4 + $0x21] sm:$0xff] }
 0xaf1   :  { %v4230_v14 = vld [vmem:[#allocation4 + $0x10] sm:$0xff]  ;;  %v4272_v50 = vpack.c.bf16 %v4254_v11, %v4253_v47  ;;  %v4255_v39 = vld [vmem:[#allocation4 + $0x23] sm:$0xff]  ;;  %v6774_v47 = vld [vmem:[%s8778_s22 + $0x18] sm:$0xff]  }
 0xaf2   :  { %v4269_v3 = vpack.c.bf16 %v4230_v14, %v4229_v45  ;;  %v4240_v46 = vld [vmem:[#allocation4 + $0x31] sm:$0xff]  ;;  %4648 = vmatprep.mubr.bf16.mxu0 %v4270_v16  ;;  %v4231_v32 = vld [vmem:[#allocation4 + $0x20] sm:$0xff]  ;;  %v6776_v31 = vld [vmem:[%s8778_s22 + $0x28] sm:$0xff]  }
 0xaf3   :  { %v4275_v41 = vpack.c.bf16 %v4240_v46, %v4239_v38  ;;  %v4256_v37 = vld [vmem:[#allocation4 + $0x33] sm:$0xff]  ;;  %4713 = vmatprep.mubr.bf16.mxu1 %v4272_v50  ;;  %v4241_v2 = vld [vmem:[#allocation4 + $0x41] sm:$0xff] }
 0xaf4   :  { %v4277_v13 = vpack.c.bf16 %v4256_v37, %v4255_v39  ;;  %4649 = vmatmul.mubr.bf16.vlgmr.msra.gmra.mrb[136].mxu0 %v4269_v3  ;;  %4714 = vmatmul.mubr.bf16.vlgmr.msra.gmra.mrb[144].mxu1 %v4271_v6  ;;  %v4232_v27 = vld [vmem:[#allocation4 + $0x30] sm:$0xff]  ;;  %v4257_v28 = vld [vmem:[#allocation4 + $0x43] sm:$0xff]  ;;  %v6778_v14 = vld [vmem:[%s8778_s22 + $0x38] sm:$0xff]  }
 0xaf5   :  { %4656 = vmatprep.mubr.bf16.mxu0 %v4275_v41  ;;  %6397 = vmatpush3.bf16.msra.mxu0 %v8533_v19  ;;  %v4242_v25 = vld [vmem:[#allocation4 + $0x51] sm:$0xff]  ;;  %v4274_v56 = vpack.c.bf16 %v4232_v27, %v4231_v32  ;;  %v4233_v49 = vld [vmem:[#allocation4 + $0x40] sm:$0xff] }
 0xaf6   :  { %4721 = vmatprep.mubr.bf16.mxu1 %v4277_v13  ;;  %6398 = vmatprep.subr.bf16.mxu0 %v6764_v43  ;;  %v4258_v52 = vld [vmem:[#allocation4 + $0x53] sm:$0xff]  ;;  %v4280_v53 = vpack.c.bf16 %v4242_v25, %v4241_v2  ;;  %v4243_v57 = vld [vmem:[#allocation4 + $0x61] sm:$0xff]  ;;  %v5644_v3 = vld [vmem:[%s8779_s21] ss:$0 sm:$0xff] }
 0xaf7   :  { %v4282_v0 = vpack.c.bf16 %v4258_v52, %v4257_v28  ;;  %v6766_v19 = vld [vmem:[%s8776_s20 + $0x118] sm:$0xff]   ;;  %v4234_v4 = vld [vmem:[#allocation4 + $0x50] sm:$0xff]  ;;  %v4259_v18 = vld [vmem:[#allocation4 + $0x63] sm:$0xff]  ;;  %6421 = vmatpush3.bf16.msra.mxu1 %v6771_v35 }
 0xaf8   :  { %v4244_v58 = vld [vmem:[#allocation4 + $0x71] sm:$0xff]  ;;  %v4279_v7 = vpack.c.bf16 %v4234_v4, %v4233_v49  ;;  %v4235_v51 = vld [vmem:[#allocation4 + $0x60] sm:$0xff]  ;;  %6422 = vmatprep.subr.bf16.mxu1 %v8868_v44 }
 0xaf9   :  { %6399 = vmatpush3.bf16.msra.mxu0 %v6764_v43  ;;  %v4260_v10 = vld [vmem:[#allocation4 + $0x73] sm:$0xff]  ;;  %v4285_v15 = vpack.c.bf16 %v4244_v58, %v4243_v57  ;;  %v4261_v30 = vld [vmem:[#allocation4 + $0x4] sm:$0xff] }
 0xafa   :  { %6400 = vmatprep.subr.bf16.mxu0 %v6765_v20  ;;  %v4287_v8 = vpack.c.bf16 %v4260_v10, %v4259_v18  ;;  %v4236_v40 = vld [vmem:[#allocation4 + $0x70] sm:$0xff]  ;;  %v4263_v34 = vld [vmem:[#allocation4 + $0x24] sm:$0xff] }
 0xafb   :  { %v4262_v54 = vld [vmem:[#allocation4 + $0x14] sm:$0xff]  ;;  %v4284_v62 = vpack.c.bf16 %v4236_v40, %v4235_v51  ;;  %v4265_v21 = vld [vmem:[#allocation4 + $0x44] sm:$0xff]  ;;  %6423 = vmatpush3.bf16.msra.mxu1 %v6772_v22 }
 0xafc   :  { %4657 = vmatmul.mubr.bf16.gmra.mrb[140].mxu0 %v4274_v56  ;;  %4722 = vmatmul.mubr.bf16.gmra.mrb[148].mxu1 %v4276_v26  ;;  %v4273_v29 = vpack.c.bf16 %v4262_v54, %v4261_v30  ;;  %v4264_v36 = vld [vmem:[#allocation4 + $0x34] sm:$0xff]  ;;  %v4267_v33 = vld [vmem:[#allocation4 + $0x64] sm:$0xff] }
 0xafd   :  { %4664 = vmatprep.mubr.bf16.mxu0 %v4280_v53  ;;  %4729 = vmatprep.mubr.bf16.mxu1 %v4282_v0  ;;  %v4266_v17 = vld [vmem:[#allocation4 + $0x54] sm:$0xff]  ;;  %v4278_v9 = vpack.c.bf16 %v4264_v36, %v4263_v34  ;;  %v6775_v45 = vld [vmem:[%s8778_s22 + $0x20] sm:$0xff]  }
 0xafe   :  { %6401 = vmatpush3.bf16.msra.mxu0 %v6765_v20  ;;  %v4283_v12 = vpack.c.bf16 %v4266_v17, %v4265_v21  ;;  %v4268_v24 = vld [vmem:[#allocation4 + $0x74] sm:$0xff]  ;;  %6424 = vmatprep.subr.bf16.mxu1 %v8868_v44 }
 0xaff   :  { %6402 = vmatprep.subr.bf16.mxu0 %v6766_v19  ;;  %v4288_v48 = vpack.c.bf16 %v4268_v24, %v4267_v33  ;;  %v6773_v5 = vld [vmem:[%s8778_s22 + $0x10] sm:$0xff]  }
 0xb00   :  { %6425 = vmatpush3.bf16.msra.mxu1 %v6773_v5  ;;  %v6777_v11 = vld [vmem:[%s8778_s22 + $0x30] sm:$0xff]  }
 0xb01   :  { %6426 = vmatprep.subr.bf16.mxu1 %v8868_v44 }
 0xb02   :  { %6403 = vmatpush3.bf16.msra.mxu0 %v6766_v19 }
 0xb03   :  { %6404 = vmatprep.subr.bf16.mxu0 %v6767_v23 }
 0xb04   :  { %4665 = vmatmul.mubr.bf16.gmra.mrb[144].mxu0 %v4279_v7  ;;  %4730 = vmatmul.mubr.bf16.gmra.mrb[152].mxu1 %v4281_v59 }
 0xb05   :  { %4672 = vmatprep.mubr.bf16.mxu0 %v4285_v15  ;;  %4737 = vmatprep.mubr.bf16.mxu1 %v4287_v8 }
 0xb06   :  { %6405 = vmatpush3.bf16.msra.mxu0 %v6767_v23  ;;  %6427 = vmatpush3.bf16.msra.mxu1 %v6774_v47 }
 0xb07   :  { %6406 = vmatprep.subr.bf16.mxu0 %v6768_v1  ;;  %6428 = vmatprep.subr.bf16.mxu1 %v8868_v44 }
 0xb0a   :  { %6407 = vmatpush3.bf16.msra.mxu0 %v6768_v1  ;;  %6429 = vmatpush3.bf16.msra.mxu1 %v6775_v45 }
 0xb0b   :  { %6408 = vmatprep.subr.bf16.mxu0 %v6769_v60  ;;  %6430 = vmatprep.subr.bf16.mxu1 %v8868_v44 }
 0xb0c   :  { %4673 = vmatmul.mubr.bf16.gmra.mrb[148].mxu0 %v4284_v62  ;;  %4738 = vmatmul.mubr.bf16.gmra.mrb[156].mxu1 %v4286_v61 }
 0xb0d   :  { %6412 = vmatprep.mubr.bf16.mxu0 %v4273_v29  ;;  %6436 = vmatprep.mubr.msk.bf16.mxu1 %vm6806_vm0, %v8868_v44 }
 0xb0e   :  { %6409 = vmatpush3.bf16.msra.mxu0 %v6769_v60  ;;  %6431 = vmatpush3.bf16.msra.mxu1 %v6776_v31 }
 0xb0f   :  { %6410 = vmatprep.subr.bf16.mxu0 %v6770_v63  ;;  %6432 = vmatprep.subr.bf16.mxu1 %v8868_v44 }
 0xb12   :  { %6411 = vmatpush3.bf16.msra.mxu0 %v6770_v63  ;;  %6433 = vmatpush3.bf16.msra.mxu1 %v6777_v11 }
 0xb13   :  { %6446 = vmatprep.subr.bf16.mxu0 %v8868_v44  ;;  %6434 = vmatprep.subr.bf16.mxu1 %v8868_v44 }
 0xb15   :  { %6413 = vmatmul.mubr.bf16.vlgmr.msra.gmra.mrb[152].mxu0 %v4278_v9 }
 0xb16   :  { %6416 = vmatprep.mubr.bf16.mxu0 %v4283_v12  ;;  %6435 = vmatpush3.bf16.msra.mxu1 %v6778_v14 }
 0xb17   :  { %6440 = vmatprep.subr.bf16.mxu1 %v8868_v44 }
 0xb1d   :  { %6417 = vmatmul.mubr.bf16.gmra.mrb[156].mxu0 %v4288_v48 }
 0xb1e   :  { %6462 = vmatprep.mubr.msk.bf16.mxu0 %vm6806_vm0, %v8868_v44 }
 0xbc7   :  { %v6098_v16 = vpop.f32.mrb[136].mxu0  ;;  %v6138_v50 = vpop.f32.mrb[144].mxu1 }
 0xbc8   :  { %v6099_v38 = vpop.f32.mrb[137].mxu0  ;;  %v6139_v46 = vpop.f32.mrb[145].mxu1 }
 0xbc9   :  { %v6100_v6 = vadd.f32 %v6099_v38, %v6098_v16  ;;  %v6140_v41 = vadd.f32 %v6139_v46, %v6138_v50  ;;  %v6101_v39 = vpop.f32.mrb[138].mxu0  ;;  %v6141_v37 = vpop.f32.mrb[146].mxu1 }
 0xbca   :  { %v6102_v13 = vpop.f32.mrb[139].mxu0  ;;  %v6142_v43 = vpop.f32.mrb[147].mxu1 }
 0xbcb   :  { %v4651_v27 = vadd.f32 %v6100_v6, %v5644_v3  ;;  %v6103_v20 = vadd.f32 %v6102_v13, %v6101_v39  ;;  %v6143_v25 = vadd.f32 %v6142_v43, %v6141_v37 }
 0xbcd   :  { %v4654_v52 = vadd.f32 %v6103_v20, %v5644_v3  ;;  %v4716_v32 = vadd.f32 %v6140_v41, %v4651_v27 }
 0xbcf   :  { %v6104_v56 = vpop.f32.mrb[140].mxu0  ;;  %v6144_v26 = vpop.f32.mrb[148].mxu1  ;;  %v4719_v2 = vadd.f32 %v6143_v25, %v4654_v52 }
 0xbd0   :  { %v6105_v28 = vpop.f32.mrb[141].mxu0  ;;  %v6145_v53 = vpop.f32.mrb[149].mxu1 }
 0xbd1   :  { %v6106_v0 = vadd.f32 %v6105_v28, %v6104_v56  ;;  %v6146_v19 = vadd.f32 %v6145_v53, %v6144_v26  ;;  %v6107_v4 = vpop.f32.mrb[142].mxu0  ;;  %v6147_v23 = vpop.f32.mrb[150].mxu1 }
 0xbd2   :  { %v6108_v58 = vpop.f32.mrb[143].mxu0  ;;  %v6148_v10 = vpop.f32.mrb[151].mxu1 }
 0xbd3   :  { %v4659_v49 = vadd.f32 %v6106_v0, %v5644_v3  ;;  %v6109_v7 = vadd.f32 %v6108_v58, %v6107_v4  ;;  %v6149_v59 = vadd.f32 %v6148_v10, %v6147_v23 }
 0xbd5   :  { %v4662_v57 = vadd.f32 %v6109_v7, %v5644_v3  ;;  %v4724_v18 = vadd.f32 %v6146_v19, %v4659_v49 }
 0xbd7   :  { %v6110_v15 = vpop.f32.mrb[144].mxu0  ;;  %v6150_v8 = vpop.f32.mrb[152].mxu1  ;;  %v4727_v1 = vadd.f32 %v6149_v59, %v4662_v57 }
 0xbd8   :  { %v6111_v40 = vpop.f32.mrb[145].mxu0  ;;  %v6151_v60 = vpop.f32.mrb[153].mxu1 }
 0xbd9   :  { %v6112_v54 = vadd.f32 %v6111_v40, %v6110_v15  ;;  %v6152_v51 = vadd.f32 %v6151_v60, %v6150_v8  ;;  %v6113_v62 = vpop.f32.mrb[146].mxu0  ;;  %v6153_v61 = vpop.f32.mrb[154].mxu1 }
 0xbda   :  { %v6114_v30 = vpop.f32.mrb[147].mxu0  ;;  %v6154_v29 = vpop.f32.mrb[155].mxu1 }
 0xbdb   :  { %v4667_v63 = vadd.f32 %v6112_v54, %v5644_v3  ;;  %v6115_v36 = vadd.f32 %v6114_v30, %v6113_v62  ;;  %v6155_v17 = vadd.f32 %v6154_v29, %v6153_v61 }
 0xbdd   :  { %v4670_v34 = vadd.f32 %v6115_v36, %v5644_v3  ;;  %v4732_v9 = vadd.f32 %v6152_v51, %v4667_v63 }
 0xbdf   :  { %v6116_v21 = vpop.f32.mrb[148].mxu0  ;;  %v6156_v12 = vpop.f32.mrb[156].mxu1  ;;  %v4735_v24 = vadd.f32 %v6155_v17, %v4670_v34 }
 0xbe0   :  { %v6117_v33 = vpop.f32.mrb[149].mxu0  ;;  %v6157_v48 = vpop.f32.mrb[157].mxu1 }
 0xbe1   :  { %v6118_v35 = vadd.f32 %v6117_v33, %v6116_v21  ;;  %v6158_v22 = vadd.f32 %v6157_v48, %v6156_v12  ;;  %v6119_v5 = vpop.f32.mrb[150].mxu0  ;;  %v6159_v47 = vpop.f32.mrb[158].mxu1 }
 0xbe2   :  { %v6120_v45 = vpop.f32.mrb[151].mxu0  ;;  %v6160_v31 = vpop.f32.mrb[159].mxu1 }
 0xbe3   :  { %v4675_v11 = vadd.f32 %v6118_v35, %v5644_v3  ;;  %v6121_v14 = vadd.f32 %v6120_v45, %v6119_v5  ;;  %v6161_v16 = vadd.f32 %v6160_v31, %v6159_v47 }
 0xbe5   :  { %v4678_v50 = vadd.f32 %v6121_v14, %v5644_v3  ;;  %v4740_v38 = vadd.f32 %v6158_v22, %v4675_v11 }
 0xbe7   :  { %v4743_v46 = vadd.f32 %v6161_v16, %v4678_v50 }
 0xbe8   :  { %v6414_v6 = vpop.f32.mrb[152].mxu0 }
 0xbe9   :  { %v4789_v41 = vadd.f32 %v6414_v6, %v4724_v18  ;;  %v4780_v39 = vpop.f32.mrb[153].mxu0 }
 0xbea   :  { %v4781_v37 = vadd.f32 %v4780_v39, %v4716_v32  ;;  %v6415_v13 = vpop.f32.mrb[154].mxu0 }
 0xbeb   :  { %v8640_v43 = vmax.f32 %v4789_v41, 0.0  ;;  %v4792_v27 = vadd.f32 %v6415_v13, %v4727_v1  ;;  %v4783_v20 = vpop.f32.mrb[155].mxu0 }
 0xbec   :  { %v8642_v25 = vmax.f32 %v4781_v37, 0.0  ;;  %v4784_v52 = vadd.f32 %v4783_v20, %v4719_v2 }
 0xbed   :  { %v4831_v56 = vrot.slane %v8640_v43, 4  ;;  %v8645_v26 = vmax.f32 %v4792_v27, 0.0 }
 0xbee   :  { %v4819_v3 = vrot.slane %v8642_v25, 4  ;;  %v8648_v28 = vmax.f32 %v4784_v52, 0.0 }
 0xbef   :  { %v4832_v53 = vadd.f32 %v4831_v56, %v8640_v43  ;;  %v4837_v32 = vrot.slane %v8645_v26, 4 }
 0xbf0   :  { %v4820_v0 = vadd.f32 %v4819_v3, %v8642_v25  ;;  %v4825_v19 = vrot.slane %v8648_v28, 4  ;;  %v6418_v4 = vpop.f32.mrb[156].mxu0 }
 0xbf1   :  { %v4833_v23 = vrot.slane %v4832_v53, 2  ;;  %v4838_v2 = vadd.f32 %v4837_v32, %v8645_v26  ;;  %v4805_v58 = vadd.f32 %v6418_v4, %v4740_v38  ;;  %v4796_v10 = vpop.f32.mrb[157].mxu0 }
 0xbf2   :  { %v4821_v49 = vrot.slane %v4820_v0, 2  ;;  %v4826_v7 = vadd.f32 %v4825_v19, %v8648_v28  ;;  %v4797_v59 = vadd.f32 %v4796_v10, %v4732_v9  ;;  %v6419_v57 = vpop.f32.mrb[158].mxu0 }
 0xbf3   :  { %v4834_v18 = vadd.f32 %v4833_v23, %v4832_v53  ;;  %v4839_v15 = vrot.slane %v4838_v2, 2  ;;  %v8656_v8 = vmax.f32 %v4805_v58, 0.0  ;;  %v4808_v1 = vadd.f32 %v6419_v57, %v4743_v46  ;;  %v4799_v40 = vpop.f32.mrb[159].mxu0 }
 0xbf4   :  { %v4822_v60 = vadd.f32 %v4821_v49, %v4820_v0  ;;  %v4827_v54 = vrot.slane %v4826_v7, 2  ;;  %v8658_v51 = vmax.f32 %v4797_v59, 0.0  ;;  %v4800_v62 = vadd.f32 %v4799_v40, %v4735_v24 }
 0xbf5   :  { %v4835_v61 = vrot.slane %v4834_v18, 1  ;;  %v4840_v30 = vadd.f32 %v4839_v15, %v4838_v2  ;;  %v4855_v29 = vrot.slane %v8656_v8, 4  ;;  %v8661_v63 = vmax.f32 %v4808_v1, 0.0 }
 0xbf6   :  { %v4823_v36 = vrot.slane %v4822_v60, 1  ;;  %v4828_v17 = vadd.f32 %v4827_v54, %v4826_v7  ;;  %v4843_v34 = vrot.slane %v8658_v51, 4  ;;  %v8664_v9 = vmax.f32 %v4800_v62, 0.0 }
 0xbf7   :  { %v4836_v21 = vadd.f32 %v4835_v61, %v4834_v18  ;;  %v4841_v12 = vrot.slane %v4840_v30, 1  ;;  %v4856_v33 = vadd.f32 %v4855_v29, %v8656_v8  ;;  %v4861_v48 = vrot.slane %v8661_v63, 4 }
 0xbf8   :  { %v4824_v35 = vadd.f32 %v4823_v36, %v4822_v60  ;;  %v4829_v24 = vrot.slane %v4828_v17, 1  ;;  %v4844_v22 = vadd.f32 %v4843_v34, %v8658_v51  ;;  %v4849_v5 = vrot.slane %v8664_v9, 4 }
 0xbf9   :  { %v4869_v47 = vmul.f32 0.125, %v4836_v21  ;;  %v4842_v45 = vadd.f32 %v4841_v12, %v4840_v30  ;;  %v4857_v31 = vrot.slane %v4856_v33, 2  ;;  %v4862_v11 = vadd.f32 %v4861_v48, %v8661_v63 }
 0xbfa   :  { %v4867_v14 = vmul.f32 0.125, %v4824_v35  ;;  %v4830_v16 = vadd.f32 %v4829_v24, %v4828_v17  ;;  %v4845_v50 = vrot.slane %v4844_v22, 2  ;;  %v4850_v38 = vadd.f32 %v4849_v5, %v8664_v9  ;;  %v6779_v5 = vld [vmem:[%s8780_s24] sm:$0xff]  }
 0xbfb   :  { %v4858_v46 = vadd.f32 %v4857_v31, %v4856_v33  ;;  %v4863_v6 = vrot.slane %v4862_v11, 2  ;;  %v4870_v27 = vmul.f32 0.125, %v4842_v45  ;;  %v4877_v56 = vpack.c.bf16 %v4869_v47, %v4869_v47  ;;  %v5685_v47 = vld [vmem:[%s8781_s23] ss:$0 sm:$0xff] }
 0xbfc   :  { %v4875_v41 = vpack.c.bf16 %v4867_v14, %v4867_v14  ;;  %v4868_v39 = vmul.f32 0.125, %v4830_v16  ;;  %v4846_v37 = vadd.f32 %v4845_v50, %v4844_v22  ;;  %v4851_v13 = vrot.slane %v4850_v38, 2 }
 0xbfd   :  { %v4859_v20 = vrot.slane %v4858_v46, 1  ;;  %v4864_v52 = vadd.f32 %v4863_v6, %v4862_v11  ;;  %v4878_v10 = vpack.c.bf16 %v4870_v27, %v4870_v27  ;;  %v4916_v59 = vunpack.c.l.b16 %v4877_v56  ;;  %v6781_v6 = vld [vmem:[%s8782_s26 + $0x8] sm:$0xff]   ;;  %v6786_v27 = vld [vmem:[%s8782_s26 + $0x30] sm:$0xff]  }
 0xbfe   :  { %v4876_v3 = vpack.c.bf16 %v4868_v39, %v4868_v39  ;;  %v4847_v53 = vrot.slane %v4846_v37, 1  ;;  %v4852_v32 = vadd.f32 %v4851_v13, %v4850_v38  ;;  %v4914_v4 = vunpack.c.l.b16 %v4875_v41  ;;  %v6782_v41 = vld [vmem:[%s8782_s26 + $0x10] sm:$0xff]   ;;  %v6783_v39 = vld [vmem:[%s8782_s26 + $0x18] sm:$0xff]   ;;  %v6785_v13 = vld [vmem:[%s8782_s26 + $0x28] sm:$0xff]  }
 0xbff   :  { %v4860_v0 = vadd.f32 %v4859_v20, %v4858_v46  ;;  %v4865_v19 = vrot.slane %v4864_v52, 1  ;;  %v4917_v62 = vunpack.c.l.b16 %v4878_v10  ;;  %v6780_v46 = vld [vmem:[%s8782_s26] sm:$0xff]   ;;  %v6787_v20 = vld [vmem:[%s8782_s26 + $0x38] sm:$0xff]  }
 0xc00   :  { %v4915_v23 = vunpack.c.l.b16 %v4876_v3  ;;  %v4848_v2 = vadd.f32 %v4847_v53, %v4846_v37  ;;  %v4853_v58 = vrot.slane %v4852_v32, 1  ;;  %6447 = vmatpush3.bf16.msra.mxu0 %v6780_v46  ;;  %v6784_v37 = vld [vmem:[%s8782_s26 + $0x20] sm:$0xff]  }
 0xc01   :  { %v4873_v49 = vmul.f32 0.125, %v4860_v0  ;;  %v4866_v7 = vadd.f32 %v4865_v19, %v4864_v52  ;;  %6448 = vmatprep.subr.bf16.mxu0 %v8868_v44  ;;  %v5694_v52 = vld [vmem:[%s8783_s25] ss:$0 sm:$0xff] }
 0xc02   :  { %v4922_v57 = vsel %vm1250_vm1, %v4915_v23, %v4914_v4  ;;  %v4871_v18 = vmul.f32 0.125, %v4848_v2  ;;  %v4854_v15 = vadd.f32 %v4853_v58, %v4852_v32 }
 0xc03   :  { %v4874_v1 = vmul.f32 0.125, %v4866_v7  ;;  %v4923_v40 = vsel %vm1252_vm2, %v4916_v59, %v4922_v57  ;;  %v4881_v61 = vpack.c.bf16 %v4873_v49, %v4873_v49 }
 0xc04   :  { %v4879_v60 = vpack.c.bf16 %v4871_v18, %v4871_v18  ;;  %v4872_v54 = vmul.f32 0.125, %v4854_v15  ;;  %v4924_v17 = vsel %vm1254_vm3, %v4917_v62, %v4923_v40  ;;  %6449 = vmatpush3.bf16.msra.mxu0 %v6781_v6 }
 0xc05   :  { %v4882_v29 = vpack.c.bf16 %v4874_v1, %v4874_v1  ;;  %v4920_v12 = vunpack.c.l.b16 %v4881_v61  ;;  %6450 = vmatprep.subr.bf16.mxu0 %v8868_v44 }
 0xc06   :  { %v4918_v30 = vunpack.c.l.b16 %v4879_v60  ;;  %v4880_v36 = vpack.c.bf16 %v4872_v54, %v4872_v54 }
 0xc07   :  { %v4921_v33 = vunpack.c.l.b16 %v4882_v29 }
 0xc08   :  { %v4925_v34 = vsel %vm1256_vm4, %v4918_v30, %v4924_v17  ;;  %v4919_v21 = vunpack.c.l.b16 %v4880_v36  ;;  %6451 = vmatpush3.bf16.msra.mxu0 %v6782_v41 }
 0xc09   :  { %6452 = vmatprep.subr.bf16.mxu0 %v8868_v44 }
 0xc0a   :  { %v4926_v48 = vsel %vm1258_vm5, %v4919_v21, %v4925_v34 }
 0xc0b   :  { %v4927_v35 = vsel %vm1260_vm6, %v4920_v12, %v4926_v48 }
 0xc0c   :  { %v4928_v24 = vsel %vm1262_vm7, %v4921_v33, %v4927_v35  ;;  %6453 = vmatpush3.bf16.msra.mxu0 %v6783_v39 }
 0xc0d   :  { %v4929_v22 = vpack.c.b16 %v4928_v24, %v4928_v24  ;;  %6454 = vmatprep.subr.bf16.mxu0 %v8868_v44 }
 0xc0f   :  { %6437 = vmatmul.mubr.bf16.vlgmr.msra.gmra.mrb[160].mxu1 %v4929_v22 }
 0xc10   :  { %6442 = vmatprep.mubr.msk.bf16.mxu1 %vm6806_vm0, %v8868_v44  ;;  %6441 = vmatpush3.bf16.msra.mxu1 %v6779_v5 }
 0xc11   :  { %6455 = vmatpush3.bf16.msra.mxu0 %v6784_v37 }
 0xc12   :  { %6456 = vmatprep.subr.bf16.mxu0 %v8868_v44 }
 0xc15   :  { %6457 = vmatpush3.bf16.msra.mxu0 %v6785_v13 }
 0xc16   :  { %6458 = vmatprep.subr.bf16.mxu0 %v8868_v44 }
 0xc19   :  { %6459 = vmatpush3.bf16.msra.mxu0 %v6786_v27 }
 0xc1a   :  { %6460 = vmatprep.subr.bf16.mxu0 %v8868_v44 }
 0xc1d   :  { %6461 = vmatpush3.bf16.msra.mxu0 %v6787_v20 }
 0xce2   :  { %v5013_v45 = vpop.f32.mrb[160].mxu1 }
 0xce3   :  { %v5014_v31 = vadd.f32 %v5685_v47, %v5013_v45  ;;  %v6438_v11 = vpop.f32.mrb[161].mxu1 }
 0xce4   :  { %v5016_v14 = vpop.f32.mrb[162].mxu1 }
 0xce5   :  { %v5019_v16 = vmax.f32 %v5014_v31, 0.0  ;;  %v6439_v50 = vpop.f32.mrb[163].mxu1 }
 0xce7   :  { %v5020_v38 = vpack.c.bf16 %v5019_v16, %v5019_v16 }
 0xce9   :  { %6443 = vmatmul.mubr.msk.bf16.vlgmr.msra.gmra.mrb[164].mxu1 %vm4057_vm10, %v5020_v38 }
 0xdbc   :  { %v5073_v56 = vpop.f32.mrb[164].mxu1 }
 0xdbd   :  { %v5074_v3 = vadd.f32 %v5694_v52, %v5073_v56  ;;  %v6444_v53 = vpop.f32.mrb[165].mxu1 }
 0xdbe   :  { %v5076_v32 = vpop.f32.mrb[166].mxu1 }
 0xdbf   :  { %v5697_v0 = vmul.f32 -1.442695, %v5074_v3  ;;  %v6445_v19 = vpop.f32.mrb[167].mxu1 }
 0xdc1   :  { %6800 = vpow2.f32 %v5697_v0 }
 0xdcb   :  { %v6801_v4 = vpop.eup %6800 }
 0xdcc   :  { %v5082_v23 = vadd.f32 1.0, %v6801_v4 }
 0xdce   :  { %6802 = vrcp.f32 %v5082_v23 }
 0xdd8   :  { %v6803_v2 = vpop.eup %6802 }
 0xdd9   :  { %v5086_v58 = vcombine.high %v6803_v2, %v6803_v2  ;;  %v5093_v10 = vrot.slane %v6803_v2, %v7727_v55 }
 0xddb   :  { %v5100_v44 = vrot.slane %v5086_v58, %v7727_v55  ;;  %v5101_v49 = vcombine.high %v5093_v10, %v5093_v10  ;;  %v5109_v7 = vrot.slane %v5093_v10, %v7727_v55 }
 0xddd   :  { %v5102_v59 = vcombine.high %v5100_v44, %v5100_v44  ;;  %v5116_v57 = vrot.slane %v5100_v44, %v7727_v55  ;;  %v5123_v18 = vrot.slane %v5101_v49, %v7727_v55  ;;  %v5131_v15 = vcombine.high %v5109_v7, %v5109_v7 }
 0xdde   :  { %v5138_v1 = vrot.slane %v5109_v7, %v7725_v42 }
 0xddf   :  { %v5130_v40 = vrot.slane %v5102_v59, %v7727_v55  ;;  %v5132_v60 = vcombine.high %v5116_v57, %v5116_v57  ;;  %v5133_v54 = vcombine.high %v5123_v18, %v5123_v18  ;;  %v5142_v62 = vrot.slane %v5123_v18, %v7725_v42 }
 0xde0   :  { %v5146_v61 = vrot.slane %v5131_v15, %v7725_v42  ;;  %v5154_v30 = vrot.slane %v5116_v57, %v7725_v42  ;;  %v5175_v29 = vmul.f32 %v5138_v1, %v8642_v25 }
 0xde1   :  { %v5134_v36 = vcombine.high %v5130_v40, %v5130_v40  ;;  %v5150_v17 = vrot.slane %v5133_v54, %v7725_v42  ;;  %v5158_v34 = vrot.slane %v5130_v40, %v7725_v42  ;;  %v5162_v21 = vrot.slane %v5132_v60, %v7725_v42 }
 0xde2   :  { %v5176_v12 = vmul.f32 %v5142_v62, %v8648_v28  ;;  %v5177_v55 = vmul.f32 %v5146_v61, %v8640_v43  ;;  %v5179_v33 = vmul.f32 %v5154_v30, %v8658_v51  ;;  %v5183_v48 = vrot.slane %v5175_v29, 4 }
 0xde3   :  { %v5166_v35 = vrot.slane %v5134_v36, %v7725_v42  ;;  %v5178_v24 = vmul.f32 %v5150_v17, %v8645_v26  ;;  %v5180_v25 = vmul.f32 %v5158_v34, %v8664_v9  ;;  %v5181_v22 = vmul.f32 %v5162_v21, %v8656_v8 }
 0xde4   :  { %v5184_v5 = vadd.f32 %v5183_v48, %v5175_v29  ;;  %v5189_v47 = vrot.slane %v5176_v12, 4  ;;  %v5195_v45 = vrot.slane %v5177_v55, 4  ;;  %v5207_v31 = vrot.slane %v5179_v33, 4 }
 0xde5   :  { %v5201_v11 = vrot.slane %v5178_v24, 4  ;;  %v5213_v14 = vrot.slane %v5180_v25, 4  ;;  %v5182_v28 = vmul.f32 %v5166_v35, %v8661_v63  ;;  %v5219_v43 = vrot.slane %v5181_v22, 4 }
 0xde6   :  { %v5185_v16 = vrot.slane %v5184_v5, 2  ;;  %v5190_v51 = vadd.f32 %v5189_v47, %v5176_v12  ;;  %v5196_v50 = vadd.f32 %v5195_v45, %v5177_v55  ;;  %v5208_v38 = vadd.f32 %v5207_v31, %v5179_v33 }
 0xde7   :  { %v5202_v42 = vadd.f32 %v5201_v11, %v5178_v24  ;;  %v5214_v46 = vadd.f32 %v5213_v14, %v5180_v25  ;;  %v5220_v26 = vadd.f32 %v5219_v43, %v5181_v22  ;;  %v5225_v6 = vrot.slane %v5182_v28, 4 }
 0xde8   :  { %v5186_v9 = vadd.f32 %v5185_v16, %v5184_v5  ;;  %v5191_v41 = vrot.slane %v5190_v51, 2  ;;  %v5197_v8 = vrot.slane %v5196_v50, 2  ;;  %v5209_v39 = vrot.slane %v5208_v38, 2 }
 0xde9   :  { %v5203_v37 = vrot.slane %v5202_v42, 2  ;;  %v5215_v13 = vrot.slane %v5214_v46, 2  ;;  %v5221_v27 = vrot.slane %v5220_v26, 2  ;;  %v5226_v20 = vadd.f32 %v5225_v6, %v5182_v28 }
 0xdea   :  { %v5187_v52 = vrot.slane %v5186_v9, 1  ;;  %v5192_v56 = vadd.f32 %v5191_v41, %v5190_v51  ;;  %v5198_v63 = vadd.f32 %v5197_v8, %v5196_v50  ;;  %v5210_v3 = vadd.f32 %v5209_v39, %v5208_v38 }
 0xdeb   :  { %v5204_v53 = vadd.f32 %v5203_v37, %v5202_v42  ;;  %v5216_v32 = vadd.f32 %v5215_v13, %v5214_v46  ;;  %v5222_v0 = vadd.f32 %v5221_v27, %v5220_v26  ;;  %v5227_v19 = vrot.slane %v5226_v20, 2 }
 0xdec   :  { %v5188_v4 = vadd.f32 %v5187_v52, %v5186_v9  ;;  %v5193_v23 = vrot.slane %v5192_v56, 1  ;;  %v5199_v2 = vrot.slane %v5198_v63, 1  ;;  %v5211_v58 = vrot.slane %v5210_v3, 1  ;;  %v5698_v9 = vld [vmem:[%s8784_s27] ss:$0 sm:$0xff] }
 0xded   :  { %v5205_v10 = vrot.slane %v5204_v53, 1  ;;  %v5217_v44 = vrot.slane %v5216_v32, 1  ;;  %v5223_v49 = vrot.slane %v5222_v0, 1  ;;  %v5228_v7 = vadd.f32 %v5227_v19, %v5226_v20 }
 0xdee   :  { %v5194_v59 = vadd.f32 %v5193_v23, %v5192_v56  ;;  %v5231_v57 = vmul.f32 0.125, %v5188_v4  ;;  %v5200_v18 = vadd.f32 %v5199_v2, %v5198_v63  ;;  %v5212_v15 = vadd.f32 %v5211_v58, %v5210_v3 }
 0xdef   :  { %v5206_v1 = vadd.f32 %v5205_v10, %v5204_v53  ;;  %v5218_v40 = vadd.f32 %v5217_v44, %v5216_v32  ;;  %v5224_v60 = vadd.f32 %v5223_v49, %v5222_v0  ;;  %v5229_v54 = vrot.slane %v5228_v7, 1 }
 0xdf0   :  { %v5232_v62 = vmul.f32 0.125, %v5194_v59  ;;  %v5239_v61 = vpack.c.bf16 %v5231_v57, %v5231_v57  ;;  %v5233_v30 = vmul.f32 0.125, %v5200_v18  ;;  %v5235_v29 = vmul.f32 0.125, %v5212_v15 }
 0xdf1   :  { %v5230_v36 = vadd.f32 %v5229_v54, %v5228_v7  ;;  %v5234_v17 = vmul.f32 0.125, %v5206_v1  ;;  %v5236_v34 = vmul.f32 0.125, %v5218_v40  ;;  %v5237_v21 = vmul.f32 0.125, %v5224_v60 }
 0xdf2   :  { %v5240_v12 = vpack.c.bf16 %v5232_v62, %v5232_v62  ;;  %v5241_v55 = vpack.c.bf16 %v5233_v30, %v5233_v30  ;;  %v5243_v35 = vpack.c.bf16 %v5235_v29, %v5235_v29  ;;  %v5278_v24 = vunpack.c.l.b16 %v5239_v61 }
 0xdf3   :  { %v5238_v33 = vmul.f32 0.125, %v5230_v36  ;;  %v5242_v48 = vpack.c.bf16 %v5234_v17, %v5234_v17  ;;  %v5244_v25 = vpack.c.bf16 %v5236_v34, %v5236_v34  ;;  %v5245_v47 = vpack.c.bf16 %v5237_v21, %v5237_v21 }
 0xdf4   :  { %v5279_v22 = vunpack.c.l.b16 %v5240_v12  ;;  %v5280_v5 = vunpack.c.l.b16 %v5241_v55  ;;  %v5282_v14 = vunpack.c.l.b16 %v5243_v35 }
 0xdf5   :  { %v5281_v45 = vunpack.c.l.b16 %v5242_v48  ;;  %v5246_v31 = vpack.c.bf16 %v5238_v33, %v5238_v33  ;;  %v5283_v43 = vunpack.c.l.b16 %v5244_v25  ;;  %v5284_v51 = vunpack.c.l.b16 %v5245_v47 }
 0xdf6   :  { %v5286_v11 = vsel %vm1250_vm1, %v5279_v22, %v5278_v24 }
 0xdf7   :  { %v5287_v28 = vsel %vm1252_vm2, %v5280_v5, %v5286_v11  ;;  %v5285_v38 = vunpack.c.l.b16 %v5246_v31 }
 0xdf8   :  { %v5288_v16 = vsel %vm1254_vm3, %v5281_v45, %v5287_v28 }
 0xdf9   :  { %v5289_v50 = vsel %vm1256_vm4, %v5282_v14, %v5288_v16 }
 0xdfa   :  { %v5290_v42 = vsel %vm1258_vm5, %v5283_v43, %v5289_v50 }
 0xdfb   :  { %v5291_v46 = vsel %vm1260_vm6, %v5284_v51, %v5290_v42 }
 0xdfc   :  { %v5292_v26 = vsel %vm1262_vm7, %v5285_v38, %v5291_v46 }
 0xdfd   :  { %v5293_v6 = vpack.c.b16 %v5292_v26, %v5292_v26 }
 0xdff   :  { %6463 = vmatmul.mubr.bf16.vlgmr.msra.gmra.mrb[160].mxu0 %v5293_v6 }
 0xed2   :  { %v5377_v41 = vpop.f32.mrb[160].mxu0 }
 0xed3   :  { %v5378_v8 = vadd.f32 %v5698_v9, %v5377_v41  ;;  %v6464_v39 = vpop.f32.mrb[161].mxu0 }
 0xed4   :  { %v5380_v37 = vpop.f32.mrb[162].mxu0 }
 0xed5   :  { %5383 = vst [vmem:[%s8785_s28] sm:$0xff] %v5378_v8  ;;  %v6465_v13 = vpop.f32.mrb[163].mxu0 }

</bundles_post_ra>
